<compile_context>
chip_gen: v7x
topology: tpu7x:2x2x1
jax: 0.10.0
libtpu: 0.0.40
codegen_flags: <defaults>
</compile_context>

<pallas_src>
import jax
import jax.numpy as jnp
from jax import lax
from jax.experimental import pallas as pl
from jax.experimental.pallas import tpu as pltpu


def _round_up(x, m):
    return ((x + m - 1) // m) * m


# ----------------------------- fused kernel ---------------------------------
def _make_fused_kernel(T, Bb, H, num_layers, unroll):
    TB = T * Bb
    H4, H8 = 4 * H, 8 * H

    def sigmoid(x):
        # exact: approx-reciprocal error would compound through the recurrence
        return 1.0 / (1.0 + jnp.exp(-x))

    def lstm_cell(g, c):
        # g: (Bb, 4H) pre-activations [i | f | g | o] for ONE direction.
        sg = sigmoid(g)                       # single full-width EUP pass
        i = sg[:, 0:H]
        f = sg[:, H:2 * H]
        gg = jnp.tanh(g[:, 2 * H:3 * H])
        o = sg[:, 3 * H:4 * H]
        c_new = f * c + i * gg
        h_new = o * jnp.tanh(c_new)
        return h_new, c_new

    def kernel(*refs):
        n_l = 4 * num_layers
        x_ref = refs[0]
        lstm_refs = refs[1:1 + n_l]
        w1t_ref, b1_ref, w2_ref, wfc_ref, bfc_ref = refs[1 + n_l:6 + n_l]
        out_ref, attw_ref = refs[6 + n_l:8 + n_l]
        seq_scr, gates_scr = refs[8 + n_l:10 + n_l]

        # ----------------------- bidirectional LSTM stack -------------------
        for layer in range(num_layers):
            wih_ref, whhf_ref, whhb_ref, b_ref = \
                lstm_refs[4 * layer:4 * layer + 4]

            # Phase 1 (hoisted input projection): one (T*Bb, Din) @ (Din, 8H)
            # MXU matmul for all timesteps and both directions.  Column layout
            # [fwd i,f,g,o | bwd i,f,g,o] keeps each direction's per-step gate
            # slice contiguous.
            if layer == 0:
                din = x_ref.shape[2]
                inp = x_ref[...].reshape(TB, din)
            else:
                inp = seq_scr[...]
            gates_scr[...] = (
                jnp.dot(inp, wih_ref[...], preferred_element_type=jnp.float32)
                + b_ref[...])

            # Phase 2: serial recurrence.  h/c live in vregs as loop carries.
            # fwd handles time t, bwd handles time T-1-t in the same step; two
            # contiguous (Bb, 4H) gate loads + two (Bb,H)@(H,4H) matmuls.
            def step(t, carry):
                h_f, c_f, h_b, c_b = carry
                off_f = pl.multiple_of(t * Bb, Bb)             # fwd time t
                off_b = pl.multiple_of((T - 1 - t) * Bb, Bb)   # bwd time T-1-t
                g_f = (gates_scr[pl.ds(off_f, Bb), 0:H4]
                       + jnp.dot(h_f, whhf_ref[...],
                                 preferred_element_type=jnp.float32))
                g_b = (gates_scr[pl.ds(off_b, Bb), H4:H8]
                       + jnp.dot(h_b, whhb_ref[...],
                                 preferred_element_type=jnp.float32))
                h_f, c_f = lstm_cell(g_f, c_f)
                h_b, c_b = lstm_cell(g_b, c_b)
                # TODO(synk): if v5e's single store slot saturates, buffer a
                # few steps of h in vregs and emit one (k*Bb, 2H) slab store.
                seq_scr[pl.ds(off_f, Bb), 0:H] = h_f
                seq_scr[pl.ds(off_b, Bb), H:2 * H] = h_b
                return (h_f, c_f, h_b, c_b)

            z = jnp.zeros((Bb, H), jnp.float32)
            lax.fori_loop(0, T, step, (z, z, z, z), unroll=unroll)

        # ------------------ attention + FC (whole block) ---------------------
        seq = seq_scr[...]                                       # (TB, 2H)
        h1 = jnp.maximum(
            jnp.dot(seq, w1t_ref[...], preferred_element_type=jnp.float32)
            + b1_ref[...], 0.0)                                  # (TB, H)
        # attention scores; scalar bias b2 dropped (softmax shift-invariant)
        s = jnp.sum(h1 * w2_ref[...], axis=1, keepdims=True)     # (TB, 1)

        # Free tile-aligned reshape (Bb % 8 == 0): row r = t*Bb + b -> (t, b).
        # Per-batch softmax over time = leading-axis reductions (pure VPU).
        s3 = s.reshape(T, Bb, 1)
        m = jnp.max(s3, axis=0, keepdims=True)                   # (1, Bb, 1)
        e = jnp.exp(s3 - m)                                      # (T, Bb, 1)
        d = jnp.sum(e, axis=0, keepdims=True)                    # (1, Bb, 1)
        attw3 = e / d                                            # (T, Bb, 1)
        attw_ref[...] = attw3

        # context[b,:] = sum_t attw[t,b] * seq[t,b,:]
        seq3 = seq.reshape(T, Bb, 2 * H)
        ctx = jnp.sum(seq3 * attw3, axis=0)                      # (Bb, 2H)

        # Dropout(p=0.3) -> identity at inference; final FC, lane-dense store.
        out_ref[...] = (
            jnp.dot(ctx, wfc_ref[...], preferred_element_type=jnp.float32)
            + bfc_ref[...])                                      # (Bb, C_pad)

    return kernel


# ------------------------------ forward wrapper -------------------------------
def _full_spec(arr):
    n = arr.ndim
    return pl.BlockSpec(arr.shape, lambda i, n=n: (0,) * n)


def audio_lstm_attention_forward(x_btd, packed, batch_blocks=1):
    """x_btd: (B, T, input_size) batch-first, like the PyTorch module.

    batch_blocks: leading 'parallel' grid axis over batch chunks.  Keep 1 on
    single-TensorCore chips (v5e/v6e); use 2 on v7x (2 TCs/chip) when B >= 16.
    """
    B, T, D = x_btd.shape
    H = packed["hidden_size"]
    C = packed["num_classes"]
    num_layers = len(packed["lstm"])
    C_pad = packed["attn"][3].shape[1]

    Bp = _round_up(B, 8 * batch_blocks)
    Bb = Bp // batch_blocks

    # time-major, batch padded to a sublane multiple: (T, Bp, D)
    x_tm = jnp.transpose(x_btd, (1, 0, 2))
    if Bp != B:
        x_tm = jnp.pad(x_tm, ((0, 0), (0, Bp - B), (0, 0)))

    flat_lstm = [a for layer in packed["lstm"] for a in layer]
    attn = list(packed["attn"])
    operands = [x_tm] + flat_lstm + attn

    unroll = T if T <= 16 else 4          # small partial unroll for long T
    kernel = _make_fused_kernel(T, Bb, H, num_layers, unroll)

    in_specs = ([pl.BlockSpec((T, Bb, D), lambda i: (0, i, 0))]
                + [_full_spec(a) for a in operands[1:]])
    out_specs = (pl.BlockSpec((Bb, C_pad), lambda i: (i, 0)),
                 pl.BlockSpec((T, Bb, 1), lambda i: (0, i, 0)))
    out_shape = (jax.ShapeDtypeStruct((Bp, C_pad), jnp.float32),
                 jax.ShapeDtypeStruct((T, Bp, 1), jnp.float32))

    # explicit scoped-VMEM budget: scratch + (double-buffered) operands/outputs
    scratch_bytes = T * Bb * (2 * H + 8 * H) * 4
    operand_bytes = sum(int(a.size) * a.dtype.itemsize for a in operands)
    out_bytes = (Bp * C_pad + T * Bp) * 4
    need = scratch_bytes + 2 * (operand_bytes + out_bytes) + (4 << 20)
    vmem_limit = int(min(max(need, 32 << 20), 96 << 20))

    out_p, attw_p = pl.pallas_call(
        kernel,
        grid=(batch_blocks,),
        in_specs=in_specs,
        out_specs=out_specs,
        out_shape=out_shape,
        scratch_shapes=[
            pltpu.VMEM((T * Bb, 2 * H), jnp.float32),   # layer output sequence
            pltpu.VMEM((T * Bb, 8 * H), jnp.float32),   # precomputed gates
        ],
        compiler_params=pltpu.CompilerParams(
            dimension_semantics=("parallel",),
            vmem_limit_bytes=vmem_limit),
    )(*operands)

    logits = out_p[:B, :C]
    attw = jnp.transpose(attw_p[:, :B, 0], (1, 0))   # (B, T), tiny XLA transpose
    return logits, attw


# ------------------------------- parameters -----------------------------------
def init_params(key, input_size, hidden_size, num_layers, num_classes):
    """Raw PyTorch-layout parameters (used by the reference and the packer)."""
    keys = iter(jax.random.split(key, 128))

    def u(shape, bound):
        return jax.random.uniform(next(keys), shape, jnp.float32, -bound, bound)

    raw = {"hidden_size": hidden_size, "lstm": []}
    k = 1.0 / float(hidden_size) ** 0.5
    in_dim = input_size
    for _ in range(num_layers):
        layer = {}
        for d in ("fwd", "bwd"):
            layer[d] = (u((4 * hidden_size, in_dim), k),        # W_ih (4H, Din)
                        u((4 * hidden_size, hidden_size), k),   # W_hh (4H, H)
                        u((4 * hidden_size,), k),               # b_ih
                        u((4 * hidden_size,), k))               # b_hh
        raw["lstm"].append(layer)
        in_dim = 2 * hidden_size

    F = 2 * hidden_size
    kf = 1.0 / float(F) ** 0.5
    k2 = 1.0 / float(F // 2) ** 0.5
    raw["attn_fc"] = (u((F // 2, F), kf), u((F // 2,), kf),     # Linear(2H -> H)
                      u((1, F // 2), k2), u((1,), k2),          # Linear(H -> 1)
                      u((num_classes, F), kf), u((num_classes,), kf))  # fc
    return raw


def pack_params(raw):
    """Repack raw PyTorch-layout weights into the fused-kernel layout."""
    H = raw["hidden_size"]
    lstm_packed = []
    for lp in raw["lstm"]:
        wih_f, whh_f, bih_f, bhh_f = lp["fwd"]
        wih_b, whh_b, bih_b, bhh_b = lp["bwd"]
        # columns: [fwd i,f,g,o | bwd i,f,g,o]
        wih = jnp.concatenate([wih_f.T, wih_b.T], axis=1)            # (Din, 8H)
        b = jnp.concatenate([bih_f + bhh_f, bih_b + bhh_b]
                            ).reshape(1, 8 * H)                      # (1, 8H)
        lstm_packed.append((wih, whh_f.T, whh_b.T, b))               # + (H,4H)x2

    w1, b1, w2, b2, wfc, bfc = raw["attn_fc"]
    C = wfc.shape[0]
    C_pad = _round_up(C, 128)
    wfc_pad = jnp.zeros((2 * H, C_pad), jnp.float32).at[:, :C].set(wfc.T)
    bfc_pad = jnp.zeros((1, C_pad), jnp.float32).at[:, :C].set(bfc.reshape(1, C))
    # b2 is intentionally dropped: softmax is invariant to a constant shift.
    attn_packed = (w1.T, b1.reshape(1, -1), w2.reshape(1, -1), wfc_pad, bfc_pad)
    return {"lstm": lstm_packed, "attn": attn_packed,
            "hidden_size": H, "num_classes": C}


# --------------------------- pure-JAX reference -------------------------------
def _sigmoid_ref(x):
    return 1.0 / (1.0 + jnp.exp(-x))


def reference_forward(x_btd, raw):
    B, T, _ = x_btd.shape
    hp = lax.Precision.HIGHEST
    H = raw["hidden_size"]
    seq = x_btd
    for lp in raw["lstm"]:
        outs = []
        for name, reverse in (("fwd", False), ("bwd", True)):
            w_ih, w_hh, b_ih, b_hh = lp[name]
            bias = (b_ih + b_hh).reshape(1, -1)
            h = jnp.zeros((B, H), jnp.float32)
            c = jnp.zeros((B, H), jnp.float32)
            ys = [None] * T
            steps = range(T - 1, -1, -1) if reverse else range(T)
            for t in steps:
                g = (jnp.dot(seq[:, t, :], w_ih.T, precision=hp)
                     + jnp.dot(h, w_hh.T, precision=hp) + bias)
                i = _sigmoid_ref(g[:, :H])
                f = _sigmoid_ref(g[:, H:2 * H])
                gg = jnp.tanh(g[:, 2 * H:3 * H])
                o = _sigmoid_ref(g[:, 3 * H:])
                c = f * c + i * gg
                h = o * jnp.tanh(c)
                ys[t] = h
            outs.append(jnp.stack(ys, axis=1))                 # (B, T, H)
        seq = jnp.concatenate(outs, axis=-1)
    w1, b1, w2, b2, wfc, bfc = raw["attn_fc"]
    h1 = jnp.maximum(jnp.einsum('btf,hf->bth', seq, w1, precision=hp) + b1, 0.0)
    s = jnp.einsum('bth,h->bt', h1, w2[0], precision=hp) + b2[0]
    attw = jax.nn.softmax(s, axis=1)
    ctx = jnp.einsum('bt,btf->bf', attw, seq, precision=hp)
    out = jnp.dot(ctx, wfc.T, precision=hp) + bfc
    return out, attw


if __name__ == "__main__":
    B, T = 2, 8
    input_size, hidden_size, num_layers, num_classes = 16, 32, 2, 4

    key = jax.random.PRNGKey(0)
    kx, kp = jax.random.split(key)
    x = jax.random.normal(kx, (B, T, input_size), jnp.float32)
    raw = init_params(kp, input_size, hidden_size, num_layers, num_classes)
    packed = pack_params(raw)

    out, attw = audio_lstm_attention_forward(x, packed)
    out = jax.block_until_ready(out)
    attw = jax.block_until_ready(attw)

    assert out.shape == (B, num_classes)
    assert attw.shape == (B, T)

    ref_out, ref_attw = reference_forward(x, raw)
    assert jnp.allclose(attw, ref_attw, atol=2e-3, rtol=2e-3), (attw, ref_attw)
    assert jnp.allclose(out, ref_out, atol=5e-3, rtol=5e-3), (out, ref_out)
    assert jnp.allclose(jnp.sum(attw, axis=1), 1.0, atol=1e-3)

    print("KERNEL_OK")
</pallas_src>

<mosaic_0001>
module attributes {stable_mosaic.version = 11 : i64} {
  func.func @kernel(%arg0: i32, %arg1: memref<8x8x16xf32, #tpu.memory_space<vmem>>, %arg2: memref<16x256xf32, #tpu.memory_space<vmem>>, %arg3: memref<32x128xf32, #tpu.memory_space<vmem>>, %arg4: memref<32x128xf32, #tpu.memory_space<vmem>>, %arg5: memref<1x256xf32, #tpu.memory_space<vmem>>, %arg6: memref<64x256xf32, #tpu.memory_space<vmem>>, %arg7: memref<32x128xf32, #tpu.memory_space<vmem>>, %arg8: memref<32x128xf32, #tpu.memory_space<vmem>>, %arg9: memref<1x256xf32, #tpu.memory_space<vmem>>, %arg10: memref<64x32xf32, #tpu.memory_space<vmem>>, %arg11: memref<1x32xf32, #tpu.memory_space<vmem>>, %arg12: memref<1x32xf32, #tpu.memory_space<vmem>>, %arg13: memref<64x128xf32, #tpu.memory_space<vmem>>, %arg14: memref<1x128xf32, #tpu.memory_space<vmem>>, %arg15: memref<8x128xf32, #tpu.memory_space<vmem>>, %arg16: memref<8x8x1xf32, #tpu.memory_space<vmem>>, %arg17: memref<64x64xf32, #tpu.memory_space<vmem>>, %arg18: memref<64x256xf32, #tpu.memory_space<vmem>>) attributes {dimension_semantics = [#tpu.dimension_semantics<parallel>], iteration_bounds = array<i64: 1>, scalar_prefetch = 0 : i64, scratch_operands = 2 : i64, tpu.core_type = #tpu.core_type<tc>, window_params = [{transform_indices = @transform_0, window_bounds = array<i64: 8, 8, 16>}, {pipeline_mode = #tpu.pipeline_mode<synchronous>, transform_indices = @transform_1, window_bounds = array<i64: 16, 256>}, {pipeline_mode = #tpu.pipeline_mode<synchronous>, transform_indices = @transform_2, window_bounds = array<i64: 32, 128>}, {pipeline_mode = #tpu.pipeline_mode<synchronous>, transform_indices = @transform_3, window_bounds = array<i64: 32, 128>}, {pipeline_mode = #tpu.pipeline_mode<synchronous>, transform_indices = @transform_4, window_bounds = array<i64: 1, 256>}, {pipeline_mode = #tpu.pipeline_mode<synchronous>, transform_indices = @transform_5, window_bounds = array<i64: 64, 256>}, {pipeline_mode = #tpu.pipeline_mode<synchronous>, transform_indices = @transform_6, window_bounds = array<i64: 32, 128>}, {pipeline_mode = #tpu.pipeline_mode<synchronous>, transform_indices = @transform_7, window_bounds = array<i64: 32, 128>}, {pipeline_mode = #tpu.pipeline_mode<synchronous>, transform_indices = @transform_8, window_bounds = array<i64: 1, 256>}, {pipeline_mode = #tpu.pipeline_mode<synchronous>, transform_indices = @transform_9, window_bounds = array<i64: 64, 32>}, {pipeline_mode = #tpu.pipeline_mode<synchronous>, transform_indices = @transform_10, window_bounds = array<i64: 1, 32>}, {pipeline_mode = #tpu.pipeline_mode<synchronous>, transform_indices = @transform_11, window_bounds = array<i64: 1, 32>}, {pipeline_mode = #tpu.pipeline_mode<synchronous>, transform_indices = @transform_12, window_bounds = array<i64: 64, 128>}, {pipeline_mode = #tpu.pipeline_mode<synchronous>, transform_indices = @transform_13, window_bounds = array<i64: 1, 128>}, {transform_indices = @transform_14, window_bounds = array<i64: 8, 128>}, {transform_indices = @transform_15, window_bounds = array<i64: 8, 8, 1>}]} {
    %c0 = arith.constant 0 : index
    %c0_0 = arith.constant 0 : index
    %c0_1 = arith.constant 0 : index
    %0 = vector.load %arg1[%c0, %c0_0, %c0_1] : memref<8x8x16xf32, #tpu.memory_space<vmem>>, vector<8x8x16xf32>
    %1 = vector.shape_cast %0 : vector<8x8x16xf32> to vector<64x16xf32>
    %c0_2 = arith.constant 0 : index
    %c0_3 = arith.constant 0 : index
    %2 = vector.load %arg2[%c0_2, %c0_3] : memref<16x256xf32, #tpu.memory_space<vmem>>, vector<16x256xf32>
    %cst = arith.constant dense<0.000000e+00> : vector<64x256xf32>
    %3 = tpu.matmul %1, %2, %cst {dimension_numbers = #tpu.dot_dimension_numbers<[1], [0], [0], [1], [0, 0, 1, 1], [], []>} : vector<64x16xf32>, vector<16x256xf32>, vector<64x256xf32> -> vector<64x256xf32>
    %c0_4 = arith.constant 0 : index
    %c0_5 = arith.constant 0 : index
    %4 = vector.load %arg5[%c0_4, %c0_5] : memref<1x256xf32, #tpu.memory_space<vmem>>, vector<1x256xf32>
    %5 = vector.broadcast %4 : vector<1x256xf32> to vector<64x256xf32>
    %6 = arith.addf %3, %5 : vector<64x256xf32>
    %c0_6 = arith.constant 0 : index
    %c0_7 = arith.constant 0 : index
    %7 = vector.load %arg18[%c0_6, %c0_7] : memref<64x256xf32, #tpu.memory_space<vmem>>, vector<64x256xf32>
    tpu.vector_store %arg18[%c0_6, %c0_7], %6 {strides = array<i32>} : memref<64x256xf32, #tpu.memory_space<vmem>>, vector<64x256xf32>,
    %cst_8 = arith.constant 0.000000e+00 : f32
    %8 = vector.broadcast %cst_8 : f32 to vector<8x32xf32>
    %c0_i32 = arith.constant 0 : i32
    %c8_i32 = arith.constant 8 : i32
    %9 = arith.muli %c0_i32, %c8_i32 : i32
    %10 = tpu.assume_multiple %9, 8 : i32
    %c7_i32 = arith.constant 7 : i32
    %11 = arith.subi %c7_i32, %c0_i32 : i32
    %c8_i32_9 = arith.constant 8 : i32
    %12 = arith.muli %11, %c8_i32_9 : i32
    %13 = tpu.assume_multiple %12, 8 : i32
    %14 = arith.index_cast %10 : i32 to index
    %c0_10 = arith.constant 0 : index
    %15 = vector.load %arg18[%14, %c0_10] : memref<64x256xf32, #tpu.memory_space<vmem>>, vector<8x128xf32>
    %c0_11 = arith.constant 0 : index
    %c0_12 = arith.constant 0 : index
    %16 = vector.load %arg3[%c0_11, %c0_12] : memref<32x128xf32, #tpu.memory_space<vmem>>, vector<32x128xf32>
    %cst_13 = arith.constant dense<0.000000e+00> : vector<8x128xf32>
    %17 = tpu.matmul %8, %16, %cst_13 {dimension_numbers = #tpu.dot_dimension_numbers<[1], [0], [0], [1], [0, 0, 1, 1], [], []>} : vector<8x32xf32>, vector<32x128xf32>, vector<8x128xf32> -> vector<8x128xf32>
    %18 = arith.addf %15, %17 : vector<8x128xf32>
    %19 = arith.index_cast %13 : i32 to index
    %c128 = arith.constant 128 : index
    %20 = vector.load %arg18[%19, %c128] : memref<64x256xf32, #tpu.memory_space<vmem>>, vector<8x128xf32>
    %c0_14 = arith.constant 0 : index
    %c0_15 = arith.constant 0 : index
    %21 = vector.load %arg4[%c0_14, %c0_15] : memref<32x128xf32, #tpu.memory_space<vmem>>, vector<32x128xf32>
    %cst_16 = arith.constant dense<0.000000e+00> : vector<8x128xf32>
    %22 = tpu.matmul %8, %21, %cst_16 {dimension_numbers = #tpu.dot_dimension_numbers<[1], [0], [0], [1], [0, 0, 1, 1], [], []>} : vector<8x32xf32>, vector<32x128xf32>, vector<8x128xf32> -> vector<8x128xf32>
    %23 = arith.addf %20, %22 : vector<8x128xf32>
    %cst_17 = arith.constant 0.000000e+00 : f32
    %24 = vector.broadcast %cst_17 : f32 to vector<8x128xf32>
    %25 = arith.subf %24, %18 : vector<8x128xf32>
    %26 = math.exp %25 : vector<8x128xf32>
    %cst_18 = arith.constant 1.000000e+00 : f32
    %27 = vector.broadcast %cst_18 : f32 to vector<8x128xf32>
    %28 = arith.addf %27, %26 : vector<8x128xf32>
    %cst_19 = arith.constant 1.000000e+00 : f32
    %29 = vector.broadcast %cst_19 : f32 to vector<8x128xf32>
    %30 = arith.divf %29, %28 : vector<8x128xf32>
    %31 = vector.extract_strided_slice %30 {offsets = [0, 0], sizes = [8, 32], strides = [1, 1]} : vector<8x128xf32> to vector<8x32xf32>
    %32 = vector.extract_strided_slice %30 {offsets = [0, 32], sizes = [8, 32], strides = [1, 1]} : vector<8x128xf32> to vector<8x32xf32>
    %33 = vector.extract_strided_slice %18 {offsets = [0, 64], sizes = [8, 32], strides = [1, 1]} : vector<8x128xf32> to vector<8x32xf32>
    %34 = math.tanh %33 : vector<8x32xf32>
    %35 = vector.extract_strided_slice %30 {offsets = [0, 96], sizes = [8, 32], strides = [1, 1]} : vector<8x128xf32> to vector<8x32xf32>
    %36 = arith.mulf %32, %8 : vector<8x32xf32>
    %37 = arith.mulf %31, %34 : vector<8x32xf32>
    %38 = arith.addf %36, %37 : vector<8x32xf32>
    %39 = math.tanh %38 : vector<8x32xf32>
    %40 = arith.mulf %35, %39 : vector<8x32xf32>
    %cst_20 = arith.constant 0.000000e+00 : f32
    %41 = vector.broadcast %cst_20 : f32 to vector<8x128xf32>
    %42 = arith.subf %41, %23 : vector<8x128xf32>
    %43 = math.exp %42 : vector<8x128xf32>
    %cst_21 = arith.constant 1.000000e+00 : f32
    %44 = vector.broadcast %cst_21 : f32 to vector<8x128xf32>
    %45 = arith.addf %44, %43 : vector<8x128xf32>
    %cst_22 = arith.constant 1.000000e+00 : f32
    %46 = vector.broadcast %cst_22 : f32 to vector<8x128xf32>
    %47 = arith.divf %46, %45 : vector<8x128xf32>
    %48 = vector.extract_strided_slice %47 {offsets = [0, 0], sizes = [8, 32], strides = [1, 1]} : vector<8x128xf32> to vector<8x32xf32>
    %49 = vector.extract_strided_slice %47 {offsets = [0, 32], sizes = [8, 32], strides = [1, 1]} : vector<8x128xf32> to vector<8x32xf32>
    %50 = vector.extract_strided_slice %23 {offsets = [0, 64], sizes = [8, 32], strides = [1, 1]} : vector<8x128xf32> to vector<8x32xf32>
    %51 = math.tanh %50 : vector<8x32xf32>
    %52 = vector.extract_strided_slice %47 {offsets = [0, 96], sizes = [8, 32], strides = [1, 1]} : vector<8x128xf32> to vector<8x32xf32>
    %53 = arith.mulf %49, %8 : vector<8x32xf32>
    %54 = arith.mulf %48, %51 : vector<8x32xf32>
    %55 = arith.addf %53, %54 : vector<8x32xf32>
    %56 = math.tanh %55 : vector<8x32xf32>
    %57 = arith.mulf %52, %56 : vector<8x32xf32>
    %58 = arith.index_cast %10 : i32 to index
    %c0_23 = arith.constant 0 : index
    %59 = vector.load %arg17[%58, %c0_23] : memref<64x64xf32, #tpu.memory_space<vmem>>, vector<8x32xf32>
    tpu.vector_store %arg17[%58, %c0_23], %40 {strides = array<i32>} : memref<64x64xf32, #tpu.memory_space<vmem>>, vector<8x32xf32>,
    %60 = arith.index_cast %13 : i32 to index
    %c32 = arith.constant 32 : index
    %61 = vector.load %arg17[%60, %c32] : memref<64x64xf32, #tpu.memory_space<vmem>>, vector<8x32xf32>
    tpu.vector_store %arg17[%60, %c32], %57 {strides = array<i32>} : memref<64x64xf32, #tpu.memory_space<vmem>>, vector<8x32xf32>,
    %c1_i32 = arith.constant 1 : i32
    %c8_i32_24 = arith.constant 8 : i32
    %62 = arith.muli %c1_i32, %c8_i32_24 : i32
    %63 = tpu.assume_multiple %62, 8 : i32
    %c7_i32_25 = arith.constant 7 : i32
    %64 = arith.subi %c7_i32_25, %c1_i32 : i32
    %c8_i32_26 = arith.constant 8 : i32
    %65 = arith.muli %64, %c8_i32_26 : i32
    %66 = tpu.assume_multiple %65, 8 : i32
    %67 = arith.index_cast %63 : i32 to index
    %c0_27 = arith.constant 0 : index
    %68 = vector.load %arg18[%67, %c0_27] : memref<64x256xf32, #tpu.memory_space<vmem>>, vector<8x128xf32>
    %c0_28 = arith.constant 0 : index
    %c0_29 = arith.constant 0 : index
    %69 = vector.load %arg3[%c0_28, %c0_29] : memref<32x128xf32, #tpu.memory_space<vmem>>, vector<32x128xf32>
    %cst_30 = arith.constant dense<0.000000e+00> : vector<8x128xf32>
    %70 = tpu.matmul %40, %69, %cst_30 {dimension_numbers = #tpu.dot_dimension_numbers<[1], [0], [0], [1], [0, 0, 1, 1], [], []>} : vector<8x32xf32>, vector<32x128xf32>, vector<8x128xf32> -> vector<8x128xf32>
    %71 = arith.addf %68, %70 : vector<8x128xf32>
    %72 = arith.index_cast %66 : i32 to index
    %c128_31 = arith.constant 128 : index
    %73 = vector.load %arg18[%72, %c128_31] : memref<64x256xf32, #tpu.memory_space<vmem>>, vector<8x128xf32>
    %c0_32 = arith.constant 0 : index
    %c0_33 = arith.constant 0 : index
    %74 = vector.load %arg4[%c0_32, %c0_33] : memref<32x128xf32, #tpu.memory_space<vmem>>, vector<32x128xf32>
    %cst_34 = arith.constant dense<0.000000e+00> : vector<8x128xf32>
    %75 = tpu.matmul %57, %74, %cst_34 {dimension_numbers = #tpu.dot_dimension_numbers<[1], [0], [0], [1], [0, 0, 1, 1], [], []>} : vector<8x32xf32>, vector<32x128xf32>, vector<8x128xf32> -> vector<8x128xf32>
    %76 = arith.addf %73, %75 : vector<8x128xf32>
    %cst_35 = arith.constant 0.000000e+00 : f32
    %77 = vector.broadcast %cst_35 : f32 to vector<8x128xf32>
    %78 = arith.subf %77, %71 : vector<8x128xf32>
    %79 = math.exp %78 : vector<8x128xf32>
    %cst_36 = arith.constant 1.000000e+00 : f32
    %80 = vector.broadcast %cst_36 : f32 to vector<8x128xf32>
    %81 = arith.addf %80, %79 : vector<8x128xf32>
    %cst_37 = arith.constant 1.000000e+00 : f32
    %82 = vector.broadcast %cst_37 : f32 to vector<8x128xf32>
    %83 = arith.divf %82, %81 : vector<8x128xf32>
    %84 = vector.extract_strided_slice %83 {offsets = [0, 0], sizes = [8, 32], strides = [1, 1]} : vector<8x128xf32> to vector<8x32xf32>
    %85 = vector.extract_strided_slice %83 {offsets = [0, 32], sizes = [8, 32], strides = [1, 1]} : vector<8x128xf32> to vector<8x32xf32>
    %86 = vector.extract_strided_slice %71 {offsets = [0, 64], sizes = [8, 32], strides = [1, 1]} : vector<8x128xf32> to vector<8x32xf32>
    %87 = math.tanh %86 : vector<8x32xf32>
    %88 = vector.extract_strided_slice %83 {offsets = [0, 96], sizes = [8, 32], strides = [1, 1]} : vector<8x128xf32> to vector<8x32xf32>
    %89 = arith.mulf %85, %38 : vector<8x32xf32>
    %90 = arith.mulf %84, %87 : vector<8x32xf32>
    %91 = arith.addf %89, %90 : vector<8x32xf32>
    %92 = math.tanh %91 : vector<8x32xf32>
    %93 = arith.mulf %88, %92 : vector<8x32xf32>
    %cst_38 = arith.constant 0.000000e+00 : f32
    %94 = vector.broadcast %cst_38 : f32 to vector<8x128xf32>
    %95 = arith.subf %94, %76 : vector<8x128xf32>
    %96 = math.exp %95 : vector<8x128xf32>
    %cst_39 = arith.constant 1.000000e+00 : f32
    %97 = vector.broadcast %cst_39 : f32 to vector<8x128xf32>
    %98 = arith.addf %97, %96 : vector<8x128xf32>
    %cst_40 = arith.constant 1.000000e+00 : f32
    %99 = vector.broadcast %cst_40 : f32 to vector<8x128xf32>
    %100 = arith.divf %99, %98 : vector<8x128xf32>
    %101 = vector.extract_strided_slice %100 {offsets = [0, 0], sizes = [8, 32], strides = [1, 1]} : vector<8x128xf32> to vector<8x32xf32>
    %102 = vector.extract_strided_slice %100 {offsets = [0, 32], sizes = [8, 32], strides = [1, 1]} : vector<8x128xf32> to vector<8x32xf32>
    %103 = vector.extract_strided_slice %76 {offsets = [0, 64], sizes = [8, 32], strides = [1, 1]} : vector<8x128xf32> to vector<8x32xf32>
    %104 = math.tanh %103 : vector<8x32xf32>
    %105 = vector.extract_strided_slice %100 {offsets = [0, 96], sizes = [8, 32], strides = [1, 1]} : vector<8x128xf32> to vector<8x32xf32>
    %106 = arith.mulf %102, %55 : vector<8x32xf32>
    %107 = arith.mulf %101, %104 : vector<8x32xf32>
    %108 = arith.addf %106, %107 : vector<8x32xf32>
    %109 = math.tanh %108 : vector<8x32xf32>
    %110 = arith.mulf %105, %109 : vector<8x32xf32>
    %111 = arith.index_cast %63 : i32 to index
    %c0_41 = arith.constant 0 : index
    %112 = vector.load %arg17[%111, %c0_41] : memref<64x64xf32, #tpu.memory_space<vmem>>, vector<8x32xf32>
    tpu.vector_store %arg17[%111, %c0_41], %93 {strides = array<i32>} : memref<64x64xf32, #tpu.memory_space<vmem>>, vector<8x32xf32>,
    %113 = arith.index_cast %66 : i32 to index
    %c32_42 = arith.constant 32 : index
    %114 = vector.load %arg17[%113, %c32_42] : memref<64x64xf32, #tpu.memory_space<vmem>>, vector<8x32xf32>
    tpu.vector_store %arg17[%113, %c32_42], %110 {strides = array<i32>} : memref<64x64xf32, #tpu.memory_space<vmem>>, vector<8x32xf32>,
    %c2_i32 = arith.constant 2 : i32
    %c8_i32_43 = arith.constant 8 : i32
    %115 = arith.muli %c2_i32, %c8_i32_43 : i32
    %116 = tpu.assume_multiple %115, 8 : i32
    %c7_i32_44 = arith.constant 7 : i32
    %117 = arith.subi %c7_i32_44, %c2_i32 : i32
    %c8_i32_45 = arith.constant 8 : i32
    %118 = arith.muli %117, %c8_i32_45 : i32
    %119 = tpu.assume_multiple %118, 8 : i32
    %120 = arith.index_cast %116 : i32 to index
    %c0_46 = arith.constant 0 : index
    %121 = vector.load %arg18[%120, %c0_46] : memref<64x256xf32, #tpu.memory_space<vmem>>, vector<8x128xf32>
    %c0_47 = arith.constant 0 : index
    %c0_48 = arith.constant 0 : index
    %122 = vector.load %arg3[%c0_47, %c0_48] : memref<32x128xf32, #tpu.memory_space<vmem>>, vector<32x128xf32>
    %cst_49 = arith.constant dense<0.000000e+00> : vector<8x128xf32>
    %123 = tpu.matmul %93, %122, %cst_49 {dimension_numbers = #tpu.dot_dimension_numbers<[1], [0], [0], [1], [0, 0, 1, 1], [], []>} : vector<8x32xf32>, vector<32x128xf32>, vector<8x128xf32> -> vector<8x128xf32>
    %124 = arith.addf %121, %123 : vector<8x128xf32>
    %125 = arith.index_cast %119 : i32 to index
    %c128_50 = arith.constant 128 : index
    %126 = vector.load %arg18[%125, %c128_50] : memref<64x256xf32, #tpu.memory_space<vmem>>, vector<8x128xf32>
    %c0_51 = arith.constant 0 : index
    %c0_52 = arith.constant 0 : index
    %127 = vector.load %arg4[%c0_51, %c0_52] : memref<32x128xf32, #tpu.memory_space<vmem>>, vector<32x128xf32>
    %cst_53 = arith.constant dense<0.000000e+00> : vector<8x128xf32>
    %128 = tpu.matmul %110, %127, %cst_53 {dimension_numbers = #tpu.dot_dimension_numbers<[1], [0], [0], [1], [0, 0, 1, 1], [], []>} : vector<8x32xf32>, vector<32x128xf32>, vector<8x128xf32> -> vector<8x128xf32>
    %129 = arith.addf %126, %128 : vector<8x128xf32>
    %cst_54 = arith.constant 0.000000e+00 : f32
    %130 = vector.broadcast %cst_54 : f32 to vector<8x128xf32>
    %131 = arith.subf %130, %124 : vector<8x128xf32>
    %132 = math.exp %131 : vector<8x128xf32>
    %cst_55 = arith.constant 1.000000e+00 : f32
    %133 = vector.broadcast %cst_55 : f32 to vector<8x128xf32>
    %134 = arith.addf %133, %132 : vector<8x128xf32>
    %cst_56 = arith.constant 1.000000e+00 : f32
    %135 = vector.broadcast %cst_56 : f32 to vector<8x128xf32>
    %136 = arith.divf %135, %134 : vector<8x128xf32>
    %137 = vector.extract_strided_slice %136 {offsets = [0, 0], sizes = [8, 32], strides = [1, 1]} : vector<8x128xf32> to vector<8x32xf32>
    %138 = vector.extract_strided_slice %136 {offsets = [0, 32], sizes = [8, 32], strides = [1, 1]} : vector<8x128xf32> to vector<8x32xf32>
    %139 = vector.extract_strided_slice %124 {offsets = [0, 64], sizes = [8, 32], strides = [1, 1]} : vector<8x128xf32> to vector<8x32xf32>
    %140 = math.tanh %139 : vector<8x32xf32>
    %141 = vector.extract_strided_slice %136 {offsets = [0, 96], sizes = [8, 32], strides = [1, 1]} : vector<8x128xf32> to vector<8x32xf32>
    %142 = arith.mulf %138, %91 : vector<8x32xf32>
    %143 = arith.mulf %137, %140 : vector<8x32xf32>
    %144 = arith.addf %142, %143 : vector<8x32xf32>
    %145 = math.tanh %144 : vector<8x32xf32>
    %146 = arith.mulf %141, %145 : vector<8x32xf32>
    %cst_57 = arith.constant 0.000000e+00 : f32
    %147 = vector.broadcast %cst_57 : f32 to vector<8x128xf32>
    %148 = arith.subf %147, %129 : vector<8x128xf32>
    %149 = math.exp %148 : vector<8x128xf32>
    %cst_58 = arith.constant 1.000000e+00 : f32
    %150 = vector.broadcast %cst_58 : f32 to vector<8x128xf32>
    %151 = arith.addf %150, %149 : vector<8x128xf32>
    %cst_59 = arith.constant 1.000000e+00 : f32
    %152 = vector.broadcast %cst_59 : f32 to vector<8x128xf32>
    %153 = arith.divf %152, %151 : vector<8x128xf32>
    %154 = vector.extract_strided_slice %153 {offsets = [0, 0], sizes = [8, 32], strides = [1, 1]} : vector<8x128xf32> to vector<8x32xf32>
    %155 = vector.extract_strided_slice %153 {offsets = [0, 32], sizes = [8, 32], strides = [1, 1]} : vector<8x128xf32> to vector<8x32xf32>
    %156 = vector.extract_strided_slice %129 {offsets = [0, 64], sizes = [8, 32], strides = [1, 1]} : vector<8x128xf32> to vector<8x32xf32>
    %157 = math.tanh %156 : vector<8x32xf32>
    %158 = vector.extract_strided_slice %153 {offsets = [0, 96], sizes = [8, 32], strides = [1, 1]} : vector<8x128xf32> to vector<8x32xf32>
    %159 = arith.mulf %155, %108 : vector<8x32xf32>
    %160 = arith.mulf %154, %157 : vector<8x32xf32>
    %161 = arith.addf %159, %160 : vector<8x32xf32>
    %162 = math.tanh %161 : vector<8x32xf32>
    %163 = arith.mulf %158, %162 : vector<8x32xf32>
    %164 = arith.index_cast %116 : i32 to index
    %c0_60 = arith.constant 0 : index
    %165 = vector.load %arg17[%164, %c0_60] : memref<64x64xf32, #tpu.memory_space<vmem>>, vector<8x32xf32>
    tpu.vector_store %arg17[%164, %c0_60], %146 {strides = array<i32>} : memref<64x64xf32, #tpu.memory_space<vmem>>, vector<8x32xf32>,
    %166 = arith.index_cast %119 : i32 to index
    %c32_61 = arith.constant 32 : index
    %167 = vector.load %arg17[%166, %c32_61] : memref<64x64xf32, #tpu.memory_space<vmem>>, vector<8x32xf32>
    tpu.vector_store %arg17[%166, %c32_61], %163 {strides = array<i32>} : memref<64x64xf32, #tpu.memory_space<vmem>>, vector<8x32xf32>,
    %c3_i32 = arith.constant 3 : i32
    %c8_i32_62 = arith.constant 8 : i32
    %168 = arith.muli %c3_i32, %c8_i32_62 : i32
    %169 = tpu.assume_multiple %168, 8 : i32
    %c7_i32_63 = arith.constant 7 : i32
    %170 = arith.subi %c7_i32_63, %c3_i32 : i32
    %c8_i32_64 = arith.constant 8 : i32
    %171 = arith.muli %170, %c8_i32_64 : i32
    %172 = tpu.assume_multiple %171, 8 : i32
    %173 = arith.index_cast %169 : i32 to index
    %c0_65 = arith.constant 0 : index
    %174 = vector.load %arg18[%173, %c0_65] : memref<64x256xf32, #tpu.memory_space<vmem>>, vector<8x128xf32>
    %c0_66 = arith.constant 0 : index
    %c0_67 = arith.constant 0 : index
    %175 = vector.load %arg3[%c0_66, %c0_67] : memref<32x128xf32, #tpu.memory_space<vmem>>, vector<32x128xf32>
    %cst_68 = arith.constant dense<0.000000e+00> : vector<8x128xf32>
    %176 = tpu.matmul %146, %175, %cst_68 {dimension_numbers = #tpu.dot_dimension_numbers<[1], [0], [0], [1], [0, 0, 1, 1], [], []>} : vector<8x32xf32>, vector<32x128xf32>, vector<8x128xf32> -> vector<8x128xf32>
    %177 = arith.addf %174, %176 : vector<8x128xf32>
    %178 = arith.index_cast %172 : i32 to index
    %c128_69 = arith.constant 128 : index
    %179 = vector.load %arg18[%178, %c128_69] : memref<64x256xf32, #tpu.memory_space<vmem>>, vector<8x128xf32>
    %c0_70 = arith.constant 0 : index
    %c0_71 = arith.constant 0 : index
    %180 = vector.load %arg4[%c0_70, %c0_71] : memref<32x128xf32, #tpu.memory_space<vmem>>, vector<32x128xf32>
    %cst_72 = arith.constant dense<0.000000e+00> : vector<8x128xf32>
    %181 = tpu.matmul %163, %180, %cst_72 {dimension_numbers = #tpu.dot_dimension_numbers<[1], [0], [0], [1], [0, 0, 1, 1], [], []>} : vector<8x32xf32>, vector<32x128xf32>, vector<8x128xf32> -> vector<8x128xf32>
    %182 = arith.addf %179, %181 : vector<8x128xf32>
    %cst_73 = arith.constant 0.000000e+00 : f32
    %183 = vector.broadcast %cst_73 : f32 to vector<8x128xf32>
    %184 = arith.subf %183, %177 : vector<8x128xf32>
    %185 = math.exp %184 : vector<8x128xf32>
    %cst_74 = arith.constant 1.000000e+00 : f32
    %186 = vector.broadcast %cst_74 : f32 to vector<8x128xf32>
    %187 = arith.addf %186, %185 : vector<8x128xf32>
    %cst_75 = arith.constant 1.000000e+00 : f32
    %188 = vector.broadcast %cst_75 : f32 to vector<8x128xf32>
    %189 = arith.divf %188, %187 : vector<8x128xf32>
    %190 = vector.extract_strided_slice %189 {offsets = [0, 0], sizes = [8, 32], strides = [1, 1]} : vector<8x128xf32> to vector<8x32xf32>
    %191 = vector.extract_strided_slice %189 {offsets = [0, 32], sizes = [8, 32], strides = [1, 1]} : vector<8x128xf32> to vector<8x32xf32>
    %192 = vector.extract_strided_slice %177 {offsets = [0, 64], sizes = [8, 32], strides = [1, 1]} : vector<8x128xf32> to vector<8x32xf32>
    %193 = math.tanh %192 : vector<8x32xf32>
    %194 = vector.extract_strided_slice %189 {offsets = [0, 96], sizes = [8, 32], strides = [1, 1]} : vector<8x128xf32> to vector<8x32xf32>
    %195 = arith.mulf %191, %144 : vector<8x32xf32>
    %196 = arith.mulf %190, %193 : vector<8x32xf32>
    %197 = arith.addf %195, %196 : vector<8x32xf32>
    %198 = math.tanh %197 : vector<8x32xf32>
    %199 = arith.mulf %194, %198 : vector<8x32xf32>
    %cst_76 = arith.constant 0.000000e+00 : f32
    %200 = vector.broadcast %cst_76 : f32 to vector<8x128xf32>
    %201 = arith.subf %200, %182 : vector<8x128xf32>
    %202 = math.exp %201 : vector<8x128xf32>
    %cst_77 = arith.constant 1.000000e+00 : f32
    %203 = vector.broadcast %cst_77 : f32 to vector<8x128xf32>
    %204 = arith.addf %203, %202 : vector<8x128xf32>
    %cst_78 = arith.constant 1.000000e+00 : f32
    %205 = vector.broadcast %cst_78 : f32 to vector<8x128xf32>
    %206 = arith.divf %205, %204 : vector<8x128xf32>
    %207 = vector.extract_strided_slice %206 {offsets = [0, 0], sizes = [8, 32], strides = [1, 1]} : vector<8x128xf32> to vector<8x32xf32>
    %208 = vector.extract_strided_slice %206 {offsets = [0, 32], sizes = [8, 32], strides = [1, 1]} : vector<8x128xf32> to vector<8x32xf32>
    %209 = vector.extract_strided_slice %182 {offsets = [0, 64], sizes = [8, 32], strides = [1, 1]} : vector<8x128xf32> to vector<8x32xf32>
    %210 = math.tanh %209 : vector<8x32xf32>
    %211 = vector.extract_strided_slice %206 {offsets = [0, 96], sizes = [8, 32], strides = [1, 1]} : vector<8x128xf32> to vector<8x32xf32>
    %212 = arith.mulf %208, %161 : vector<8x32xf32>
    %213 = arith.mulf %207, %210 : vector<8x32xf32>
    %214 = arith.addf %212, %213 : vector<8x32xf32>
    %215 = math.tanh %214 : vector<8x32xf32>
    %216 = arith.mulf %211, %215 : vector<8x32xf32>
    %217 = arith.index_cast %169 : i32 to index
    %c0_79 = arith.constant 0 : index
    %218 = vector.load %arg17[%217, %c0_79] : memref<64x64xf32, #tpu.memory_space<vmem>>, vector<8x32xf32>
    tpu.vector_store %arg17[%217, %c0_79], %199 {strides = array<i32>} : memref<64x64xf32, #tpu.memory_space<vmem>>, vector<8x32xf32>,
    %219 = arith.index_cast %172 : i32 to index
    %c32_80 = arith.constant 32 : index
    %220 = vector.load %arg17[%219, %c32_80] : memref<64x64xf32, #tpu.memory_space<vmem>>, vector<8x32xf32>
    tpu.vector_store %arg17[%219, %c32_80], %216 {strides = array<i32>} : memref<64x64xf32, #tpu.memory_space<vmem>>, vector<8x32xf32>,
    %c4_i32 = arith.constant 4 : i32
    %c8_i32_81 = arith.constant 8 : i32
    %221 = arith.muli %c4_i32, %c8_i32_81 : i32
    %222 = tpu.assume_multiple %221, 8 : i32
    %c7_i32_82 = arith.constant 7 : i32
    %223 = arith.subi %c7_i32_82, %c4_i32 : i32
    %c8_i32_83 = arith.constant 8 : i32
    %224 = arith.muli %223, %c8_i32_83 : i32
    %225 = tpu.assume_multiple %224, 8 : i32
    %226 = arith.index_cast %222 : i32 to index
    %c0_84 = arith.constant 0 : index
    %227 = vector.load %arg18[%226, %c0_84] : memref<64x256xf32, #tpu.memory_space<vmem>>, vector<8x128xf32>
    %c0_85 = arith.constant 0 : index
    %c0_86 = arith.constant 0 : index
    %228 = vector.load %arg3[%c0_85, %c0_86] : memref<32x128xf32, #tpu.memory_space<vmem>>, vector<32x128xf32>
    %cst_87 = arith.constant dense<0.000000e+00> : vector<8x128xf32>
    %229 = tpu.matmul %199, %228, %cst_87 {dimension_numbers = #tpu.dot_dimension_numbers<[1], [0], [0], [1], [0, 0, 1, 1], [], []>} : vector<8x32xf32>, vector<32x128xf32>, vector<8x128xf32> -> vector<8x128xf32>
    %230 = arith.addf %227, %229 : vector<8x128xf32>
    %231 = arith.index_cast %225 : i32 to index
    %c128_88 = arith.constant 128 : index
    %232 = vector.load %arg18[%231, %c128_88] : memref<64x256xf32, #tpu.memory_space<vmem>>, vector<8x128xf32>
    %c0_89 = arith.constant 0 : index
    %c0_90 = arith.constant 0 : index
    %233 = vector.load %arg4[%c0_89, %c0_90] : memref<32x128xf32, #tpu.memory_space<vmem>>, vector<32x128xf32>
    %cst_91 = arith.constant dense<0.000000e+00> : vector<8x128xf32>
    %234 = tpu.matmul %216, %233, %cst_91 {dimension_numbers = #tpu.dot_dimension_numbers<[1], [0], [0], [1], [0, 0, 1, 1], [], []>} : vector<8x32xf32>, vector<32x128xf32>, vector<8x128xf32> -> vector<8x128xf32>
    %235 = arith.addf %232, %234 : vector<8x128xf32>
    %cst_92 = arith.constant 0.000000e+00 : f32
    %236 = vector.broadcast %cst_92 : f32 to vector<8x128xf32>
    %237 = arith.subf %236, %230 : vector<8x128xf32>
    %238 = math.exp %237 : vector<8x128xf32>
    %cst_93 = arith.constant 1.000000e+00 : f32
    %239 = vector.broadcast %cst_93 : f32 to vector<8x128xf32>
    %240 = arith.addf %239, %238 : vector<8x128xf32>
    %cst_94 = arith.constant 1.000000e+00 : f32
    %241 = vector.broadcast %cst_94 : f32 to vector<8x128xf32>
    %242 = arith.divf %241, %240 : vector<8x128xf32>
    %243 = vector.extract_strided_slice %242 {offsets = [0, 0], sizes = [8, 32], strides = [1, 1]} : vector<8x128xf32> to vector<8x32xf32>
    %244 = vector.extract_strided_slice %242 {offsets = [0, 32], sizes = [8, 32], strides = [1, 1]} : vector<8x128xf32> to vector<8x32xf32>
    %245 = vector.extract_strided_slice %230 {offsets = [0, 64], sizes = [8, 32], strides = [1, 1]} : vector<8x128xf32> to vector<8x32xf32>
    %246 = math.tanh %245 : vector<8x32xf32>
    %247 = vector.extract_strided_slice %242 {offsets = [0, 96], sizes = [8, 32], strides = [1, 1]} : vector<8x128xf32> to vector<8x32xf32>
    %248 = arith.mulf %244, %197 : vector<8x32xf32>
    %249 = arith.mulf %243, %246 : vector<8x32xf32>
    %250 = arith.addf %248, %249 : vector<8x32xf32>
    %251 = math.tanh %250 : vector<8x32xf32>
    %252 = arith.mulf %247, %251 : vector<8x32xf32>
    %cst_95 = arith.constant 0.000000e+00 : f32
    %253 = vector.broadcast %cst_95 : f32 to vector<8x128xf32>
    %254 = arith.subf %253, %235 : vector<8x128xf32>
    %255 = math.exp %254 : vector<8x128xf32>
    %cst_96 = arith.constant 1.000000e+00 : f32
    %256 = vector.broadcast %cst_96 : f32 to vector<8x128xf32>
    %257 = arith.addf %256, %255 : vector<8x128xf32>
    %cst_97 = arith.constant 1.000000e+00 : f32
    %258 = vector.broadcast %cst_97 : f32 to vector<8x128xf32>
    %259 = arith.divf %258, %257 : vector<8x128xf32>
    %260 = vector.extract_strided_slice %259 {offsets = [0, 0], sizes = [8, 32], strides = [1, 1]} : vector<8x128xf32> to vector<8x32xf32>
    %261 = vector.extract_strided_slice %259 {offsets = [0, 32], sizes = [8, 32], strides = [1, 1]} : vector<8x128xf32> to vector<8x32xf32>
    %262 = vector.extract_strided_slice %235 {offsets = [0, 64], sizes = [8, 32], strides = [1, 1]} : vector<8x128xf32> to vector<8x32xf32>
    %263 = math.tanh %262 : vector<8x32xf32>
    %264 = vector.extract_strided_slice %259 {offsets = [0, 96], sizes = [8, 32], strides = [1, 1]} : vector<8x128xf32> to vector<8x32xf32>
    %265 = arith.mulf %261, %214 : vector<8x32xf32>
    %266 = arith.mulf %260, %263 : vector<8x32xf32>
    %267 = arith.addf %265, %266 : vector<8x32xf32>
    %268 = math.tanh %267 : vector<8x32xf32>
    %269 = arith.mulf %264, %268 : vector<8x32xf32>
    %270 = arith.index_cast %222 : i32 to index
    %c0_98 = arith.constant 0 : index
    %271 = vector.load %arg17[%270, %c0_98] : memref<64x64xf32, #tpu.memory_space<vmem>>, vector<8x32xf32>
    tpu.vector_store %arg17[%270, %c0_98], %252 {strides = array<i32>} : memref<64x64xf32, #tpu.memory_space<vmem>>, vector<8x32xf32>,
    %272 = arith.index_cast %225 : i32 to index
    %c32_99 = arith.constant 32 : index
    %273 = vector.load %arg17[%272, %c32_99] : memref<64x64xf32, #tpu.memory_space<vmem>>, vector<8x32xf32>
    tpu.vector_store %arg17[%272, %c32_99], %269 {strides = array<i32>} : memref<64x64xf32, #tpu.memory_space<vmem>>, vector<8x32xf32>,
    %c5_i32 = arith.constant 5 : i32
    %c8_i32_100 = arith.constant 8 : i32
    %274 = arith.muli %c5_i32, %c8_i32_100 : i32
    %275 = tpu.assume_multiple %274, 8 : i32
    %c7_i32_101 = arith.constant 7 : i32
    %276 = arith.subi %c7_i32_101, %c5_i32 : i32
    %c8_i32_102 = arith.constant 8 : i32
    %277 = arith.muli %276, %c8_i32_102 : i32
    %278 = tpu.assume_multiple %277, 8 : i32
    %279 = arith.index_cast %275 : i32 to index
    %c0_103 = arith.constant 0 : index
    %280 = vector.load %arg18[%279, %c0_103] : memref<64x256xf32, #tpu.memory_space<vmem>>, vector<8x128xf32>
    %c0_104 = arith.constant 0 : index
    %c0_105 = arith.constant 0 : index
    %281 = vector.load %arg3[%c0_104, %c0_105] : memref<32x128xf32, #tpu.memory_space<vmem>>, vector<32x128xf32>
    %cst_106 = arith.constant dense<0.000000e+00> : vector<8x128xf32>
    %282 = tpu.matmul %252, %281, %cst_106 {dimension_numbers = #tpu.dot_dimension_numbers<[1], [0], [0], [1], [0, 0, 1, 1], [], []>} : vector<8x32xf32>, vector<32x128xf32>, vector<8x128xf32> -> vector<8x128xf32>
    %283 = arith.addf %280, %282 : vector<8x128xf32>
    %284 = arith.index_cast %278 : i32 to index
    %c128_107 = arith.constant 128 : index
    %285 = vector.load %arg18[%284, %c128_107] : memref<64x256xf32, #tpu.memory_space<vmem>>, vector<8x128xf32>
    %c0_108 = arith.constant 0 : index
    %c0_109 = arith.constant 0 : index
    %286 = vector.load %arg4[%c0_108, %c0_109] : memref<32x128xf32, #tpu.memory_space<vmem>>, vector<32x128xf32>
    %cst_110 = arith.constant dense<0.000000e+00> : vector<8x128xf32>
    %287 = tpu.matmul %269, %286, %cst_110 {dimension_numbers = #tpu.dot_dimension_numbers<[1], [0], [0], [1], [0, 0, 1, 1], [], []>} : vector<8x32xf32>, vector<32x128xf32>, vector<8x128xf32> -> vector<8x128xf32>
    %288 = arith.addf %285, %287 : vector<8x128xf32>
    %cst_111 = arith.constant 0.000000e+00 : f32
    %289 = vector.broadcast %cst_111 : f32 to vector<8x128xf32>
    %290 = arith.subf %289, %283 : vector<8x128xf32>
    %291 = math.exp %290 : vector<8x128xf32>
    %cst_112 = arith.constant 1.000000e+00 : f32
    %292 = vector.broadcast %cst_112 : f32 to vector<8x128xf32>
    %293 = arith.addf %292, %291 : vector<8x128xf32>
    %cst_113 = arith.constant 1.000000e+00 : f32
    %294 = vector.broadcast %cst_113 : f32 to vector<8x128xf32>
    %295 = arith.divf %294, %293 : vector<8x128xf32>
    %296 = vector.extract_strided_slice %295 {offsets = [0, 0], sizes = [8, 32], strides = [1, 1]} : vector<8x128xf32> to vector<8x32xf32>
    %297 = vector.extract_strided_slice %295 {offsets = [0, 32], sizes = [8, 32], strides = [1, 1]} : vector<8x128xf32> to vector<8x32xf32>
    %298 = vector.extract_strided_slice %283 {offsets = [0, 64], sizes = [8, 32], strides = [1, 1]} : vector<8x128xf32> to vector<8x32xf32>
    %299 = math.tanh %298 : vector<8x32xf32>
    %300 = vector.extract_strided_slice %295 {offsets = [0, 96], sizes = [8, 32], strides = [1, 1]} : vector<8x128xf32> to vector<8x32xf32>
    %301 = arith.mulf %297, %250 : vector<8x32xf32>
    %302 = arith.mulf %296, %299 : vector<8x32xf32>
    %303 = arith.addf %301, %302 : vector<8x32xf32>
    %304 = math.tanh %303 : vector<8x32xf32>
    %305 = arith.mulf %300, %304 : vector<8x32xf32>
    %cst_114 = arith.constant 0.000000e+00 : f32
    %306 = vector.broadcast %cst_114 : f32 to vector<8x128xf32>
    %307 = arith.subf %306, %288 : vector<8x128xf32>
    %308 = math.exp %307 : vector<8x128xf32>
    %cst_115 = arith.constant 1.000000e+00 : f32
    %309 = vector.broadcast %cst_115 : f32 to vector<8x128xf32>
    %310 = arith.addf %309, %308 : vector<8x128xf32>
    %cst_116 = arith.constant 1.000000e+00 : f32
    %311 = vector.broadcast %cst_116 : f32 to vector<8x128xf32>
    %312 = arith.divf %311, %310 : vector<8x128xf32>
    %313 = vector.extract_strided_slice %312 {offsets = [0, 0], sizes = [8, 32], strides = [1, 1]} : vector<8x128xf32> to vector<8x32xf32>
    %314 = vector.extract_strided_slice %312 {offsets = [0, 32], sizes = [8, 32], strides = [1, 1]} : vector<8x128xf32> to vector<8x32xf32>
    %315 = vector.extract_strided_slice %288 {offsets = [0, 64], sizes = [8, 32], strides = [1, 1]} : vector<8x128xf32> to vector<8x32xf32>
    %316 = math.tanh %315 : vector<8x32xf32>
    %317 = vector.extract_strided_slice %312 {offsets = [0, 96], sizes = [8, 32], strides = [1, 1]} : vector<8x128xf32> to vector<8x32xf32>
    %318 = arith.mulf %314, %267 : vector<8x32xf32>
    %319 = arith.mulf %313, %316 : vector<8x32xf32>
    %320 = arith.addf %318, %319 : vector<8x32xf32>
    %321 = math.tanh %320 : vector<8x32xf32>
    %322 = arith.mulf %317, %321 : vector<8x32xf32>
    %323 = arith.index_cast %275 : i32 to index
    %c0_117 = arith.constant 0 : index
    %324 = vector.load %arg17[%323, %c0_117] : memref<64x64xf32, #tpu.memory_space<vmem>>, vector<8x32xf32>
    tpu.vector_store %arg17[%323, %c0_117], %305 {strides = array<i32>} : memref<64x64xf32, #tpu.memory_space<vmem>>, vector<8x32xf32>,
    %325 = arith.index_cast %278 : i32 to index
    %c32_118 = arith.constant 32 : index
    %326 = vector.load %arg17[%325, %c32_118] : memref<64x64xf32, #tpu.memory_space<vmem>>, vector<8x32xf32>
    tpu.vector_store %arg17[%325, %c32_118], %322 {strides = array<i32>} : memref<64x64xf32, #tpu.memory_space<vmem>>, vector<8x32xf32>,
    %c6_i32 = arith.constant 6 : i32
    %c8_i32_119 = arith.constant 8 : i32
    %327 = arith.muli %c6_i32, %c8_i32_119 : i32
    %328 = tpu.assume_multiple %327, 8 : i32
    %c7_i32_120 = arith.constant 7 : i32
    %329 = arith.subi %c7_i32_120, %c6_i32 : i32
    %c8_i32_121 = arith.constant 8 : i32
    %330 = arith.muli %329, %c8_i32_121 : i32
    %331 = tpu.assume_multiple %330, 8 : i32
    %332 = arith.index_cast %328 : i32 to index
    %c0_122 = arith.constant 0 : index
    %333 = vector.load %arg18[%332, %c0_122] : memref<64x256xf32, #tpu.memory_space<vmem>>, vector<8x128xf32>
    %c0_123 = arith.constant 0 : index
    %c0_124 = arith.constant 0 : index
    %334 = vector.load %arg3[%c0_123, %c0_124] : memref<32x128xf32, #tpu.memory_space<vmem>>, vector<32x128xf32>
    %cst_125 = arith.constant dense<0.000000e+00> : vector<8x128xf32>
    %335 = tpu.matmul %305, %334, %cst_125 {dimension_numbers = #tpu.dot_dimension_numbers<[1], [0], [0], [1], [0, 0, 1, 1], [], []>} : vector<8x32xf32>, vector<32x128xf32>, vector<8x128xf32> -> vector<8x128xf32>
    %336 = arith.addf %333, %335 : vector<8x128xf32>
    %337 = arith.index_cast %331 : i32 to index
    %c128_126 = arith.constant 128 : index
    %338 = vector.load %arg18[%337, %c128_126] : memref<64x256xf32, #tpu.memory_space<vmem>>, vector<8x128xf32>
    %c0_127 = arith.constant 0 : index
    %c0_128 = arith.constant 0 : index
    %339 = vector.load %arg4[%c0_127, %c0_128] : memref<32x128xf32, #tpu.memory_space<vmem>>, vector<32x128xf32>
    %cst_129 = arith.constant dense<0.000000e+00> : vector<8x128xf32>
    %340 = tpu.matmul %322, %339, %cst_129 {dimension_numbers = #tpu.dot_dimension_numbers<[1], [0], [0], [1], [0, 0, 1, 1], [], []>} : vector<8x32xf32>, vector<32x128xf32>, vector<8x128xf32> -> vector<8x128xf32>
    %341 = arith.addf %338, %340 : vector<8x128xf32>
    %cst_130 = arith.constant 0.000000e+00 : f32
    %342 = vector.broadcast %cst_130 : f32 to vector<8x128xf32>
    %343 = arith.subf %342, %336 : vector<8x128xf32>
    %344 = math.exp %343 : vector<8x128xf32>
    %cst_131 = arith.constant 1.000000e+00 : f32
    %345 = vector.broadcast %cst_131 : f32 to vector<8x128xf32>
    %346 = arith.addf %345, %344 : vector<8x128xf32>
    %cst_132 = arith.constant 1.000000e+00 : f32
    %347 = vector.broadcast %cst_132 : f32 to vector<8x128xf32>
    %348 = arith.divf %347, %346 : vector<8x128xf32>
    %349 = vector.extract_strided_slice %348 {offsets = [0, 0], sizes = [8, 32], strides = [1, 1]} : vector<8x128xf32> to vector<8x32xf32>
    %350 = vector.extract_strided_slice %348 {offsets = [0, 32], sizes = [8, 32], strides = [1, 1]} : vector<8x128xf32> to vector<8x32xf32>
    %351 = vector.extract_strided_slice %336 {offsets = [0, 64], sizes = [8, 32], strides = [1, 1]} : vector<8x128xf32> to vector<8x32xf32>
    %352 = math.tanh %351 : vector<8x32xf32>
    %353 = vector.extract_strided_slice %348 {offsets = [0, 96], sizes = [8, 32], strides = [1, 1]} : vector<8x128xf32> to vector<8x32xf32>
    %354 = arith.mulf %350, %303 : vector<8x32xf32>
    %355 = arith.mulf %349, %352 : vector<8x32xf32>
    %356 = arith.addf %354, %355 : vector<8x32xf32>
    %357 = math.tanh %356 : vector<8x32xf32>
    %358 = arith.mulf %353, %357 : vector<8x32xf32>
    %cst_133 = arith.constant 0.000000e+00 : f32
    %359 = vector.broadcast %cst_133 : f32 to vector<8x128xf32>
    %360 = arith.subf %359, %341 : vector<8x128xf32>
    %361 = math.exp %360 : vector<8x128xf32>
    %cst_134 = arith.constant 1.000000e+00 : f32
    %362 = vector.broadcast %cst_134 : f32 to vector<8x128xf32>
    %363 = arith.addf %362, %361 : vector<8x128xf32>
    %cst_135 = arith.constant 1.000000e+00 : f32
    %364 = vector.broadcast %cst_135 : f32 to vector<8x128xf32>
    %365 = arith.divf %364, %363 : vector<8x128xf32>
    %366 = vector.extract_strided_slice %365 {offsets = [0, 0], sizes = [8, 32], strides = [1, 1]} : vector<8x128xf32> to vector<8x32xf32>
    %367 = vector.extract_strided_slice %365 {offsets = [0, 32], sizes = [8, 32], strides = [1, 1]} : vector<8x128xf32> to vector<8x32xf32>
    %368 = vector.extract_strided_slice %341 {offsets = [0, 64], sizes = [8, 32], strides = [1, 1]} : vector<8x128xf32> to vector<8x32xf32>
    %369 = math.tanh %368 : vector<8x32xf32>
    %370 = vector.extract_strided_slice %365 {offsets = [0, 96], sizes = [8, 32], strides = [1, 1]} : vector<8x128xf32> to vector<8x32xf32>
    %371 = arith.mulf %367, %320 : vector<8x32xf32>
    %372 = arith.mulf %366, %369 : vector<8x32xf32>
    %373 = arith.addf %371, %372 : vector<8x32xf32>
    %374 = math.tanh %373 : vector<8x32xf32>
    %375 = arith.mulf %370, %374 : vector<8x32xf32>
    %376 = arith.index_cast %328 : i32 to index
    %c0_136 = arith.constant 0 : index
    %377 = vector.load %arg17[%376, %c0_136] : memref<64x64xf32, #tpu.memory_space<vmem>>, vector<8x32xf32>
    tpu.vector_store %arg17[%376, %c0_136], %358 {strides = array<i32>} : memref<64x64xf32, #tpu.memory_space<vmem>>, vector<8x32xf32>,
    %378 = arith.index_cast %331 : i32 to index
    %c32_137 = arith.constant 32 : index
    %379 = vector.load %arg17[%378, %c32_137] : memref<64x64xf32, #tpu.memory_space<vmem>>, vector<8x32xf32>
    tpu.vector_store %arg17[%378, %c32_137], %375 {strides = array<i32>} : memref<64x64xf32, #tpu.memory_space<vmem>>, vector<8x32xf32>,
    %c7_i32_138 = arith.constant 7 : i32
    %c8_i32_139 = arith.constant 8 : i32
    %380 = arith.muli %c7_i32_138, %c8_i32_139 : i32
    %381 = tpu.assume_multiple %380, 8 : i32
    %c7_i32_140 = arith.constant 7 : i32
    %382 = arith.subi %c7_i32_140, %c7_i32_138 : i32
    %c8_i32_141 = arith.constant 8 : i32
    %383 = arith.muli %382, %c8_i32_141 : i32
    %384 = tpu.assume_multiple %383, 8 : i32
    %385 = arith.index_cast %381 : i32 to index
    %c0_142 = arith.constant 0 : index
    %386 = vector.load %arg18[%385, %c0_142] : memref<64x256xf32, #tpu.memory_space<vmem>>, vector<8x128xf32>
    %c0_143 = arith.constant 0 : index
    %c0_144 = arith.constant 0 : index
    %387 = vector.load %arg3[%c0_143, %c0_144] : memref<32x128xf32, #tpu.memory_space<vmem>>, vector<32x128xf32>
    %cst_145 = arith.constant dense<0.000000e+00> : vector<8x128xf32>
    %388 = tpu.matmul %358, %387, %cst_145 {dimension_numbers = #tpu.dot_dimension_numbers<[1], [0], [0], [1], [0, 0, 1, 1], [], []>} : vector<8x32xf32>, vector<32x128xf32>, vector<8x128xf32> -> vector<8x128xf32>
    %389 = arith.addf %386, %388 : vector<8x128xf32>
    %390 = arith.index_cast %384 : i32 to index
    %c128_146 = arith.constant 128 : index
    %391 = vector.load %arg18[%390, %c128_146] : memref<64x256xf32, #tpu.memory_space<vmem>>, vector<8x128xf32>
    %c0_147 = arith.constant 0 : index
    %c0_148 = arith.constant 0 : index
    %392 = vector.load %arg4[%c0_147, %c0_148] : memref<32x128xf32, #tpu.memory_space<vmem>>, vector<32x128xf32>
    %cst_149 = arith.constant dense<0.000000e+00> : vector<8x128xf32>
    %393 = tpu.matmul %375, %392, %cst_149 {dimension_numbers = #tpu.dot_dimension_numbers<[1], [0], [0], [1], [0, 0, 1, 1], [], []>} : vector<8x32xf32>, vector<32x128xf32>, vector<8x128xf32> -> vector<8x128xf32>
    %394 = arith.addf %391, %393 : vector<8x128xf32>
    %cst_150 = arith.constant 0.000000e+00 : f32
    %395 = vector.broadcast %cst_150 : f32 to vector<8x128xf32>
    %396 = arith.subf %395, %389 : vector<8x128xf32>
    %397 = math.exp %396 : vector<8x128xf32>
    %cst_151 = arith.constant 1.000000e+00 : f32
    %398 = vector.broadcast %cst_151 : f32 to vector<8x128xf32>
    %399 = arith.addf %398, %397 : vector<8x128xf32>
    %cst_152 = arith.constant 1.000000e+00 : f32
    %400 = vector.broadcast %cst_152 : f32 to vector<8x128xf32>
    %401 = arith.divf %400, %399 : vector<8x128xf32>
    %402 = vector.extract_strided_slice %401 {offsets = [0, 0], sizes = [8, 32], strides = [1, 1]} : vector<8x128xf32> to vector<8x32xf32>
    %403 = vector.extract_strided_slice %401 {offsets = [0, 32], sizes = [8, 32], strides = [1, 1]} : vector<8x128xf32> to vector<8x32xf32>
    %404 = vector.extract_strided_slice %389 {offsets = [0, 64], sizes = [8, 32], strides = [1, 1]} : vector<8x128xf32> to vector<8x32xf32>
    %405 = math.tanh %404 : vector<8x32xf32>
    %406 = vector.extract_strided_slice %401 {offsets = [0, 96], sizes = [8, 32], strides = [1, 1]} : vector<8x128xf32> to vector<8x32xf32>
    %407 = arith.mulf %403, %356 : vector<8x32xf32>
    %408 = arith.mulf %402, %405 : vector<8x32xf32>
    %409 = arith.addf %407, %408 : vector<8x32xf32>
    %410 = math.tanh %409 : vector<8x32xf32>
    %411 = arith.mulf %406, %410 : vector<8x32xf32>
    %cst_153 = arith.constant 0.000000e+00 : f32
    %412 = vector.broadcast %cst_153 : f32 to vector<8x128xf32>
    %413 = arith.subf %412, %394 : vector<8x128xf32>
    %414 = math.exp %413 : vector<8x128xf32>
    %cst_154 = arith.constant 1.000000e+00 : f32
    %415 = vector.broadcast %cst_154 : f32 to vector<8x128xf32>
    %416 = arith.addf %415, %414 : vector<8x128xf32>
    %cst_155 = arith.constant 1.000000e+00 : f32
    %417 = vector.broadcast %cst_155 : f32 to vector<8x128xf32>
    %418 = arith.divf %417, %416 : vector<8x128xf32>
    %419 = vector.extract_strided_slice %418 {offsets = [0, 0], sizes = [8, 32], strides = [1, 1]} : vector<8x128xf32> to vector<8x32xf32>
    %420 = vector.extract_strided_slice %418 {offsets = [0, 32], sizes = [8, 32], strides = [1, 1]} : vector<8x128xf32> to vector<8x32xf32>
    %421 = vector.extract_strided_slice %394 {offsets = [0, 64], sizes = [8, 32], strides = [1, 1]} : vector<8x128xf32> to vector<8x32xf32>
    %422 = math.tanh %421 : vector<8x32xf32>
    %423 = vector.extract_strided_slice %418 {offsets = [0, 96], sizes = [8, 32], strides = [1, 1]} : vector<8x128xf32> to vector<8x32xf32>
    %424 = arith.mulf %420, %373 : vector<8x32xf32>
    %425 = arith.mulf %419, %422 : vector<8x32xf32>
    %426 = arith.addf %424, %425 : vector<8x32xf32>
    %427 = math.tanh %426 : vector<8x32xf32>
    %428 = arith.mulf %423, %427 : vector<8x32xf32>
    %429 = arith.index_cast %381 : i32 to index
    %c0_156 = arith.constant 0 : index
    %430 = vector.load %arg17[%429, %c0_156] : memref<64x64xf32, #tpu.memory_space<vmem>>, vector<8x32xf32>
    tpu.vector_store %arg17[%429, %c0_156], %411 {strides = array<i32>} : memref<64x64xf32, #tpu.memory_space<vmem>>, vector<8x32xf32>,
    %431 = arith.index_cast %384 : i32 to index
    %c32_157 = arith.constant 32 : index
    %432 = vector.load %arg17[%431, %c32_157] : memref<64x64xf32, #tpu.memory_space<vmem>>, vector<8x32xf32>
    tpu.vector_store %arg17[%431, %c32_157], %428 {strides = array<i32>} : memref<64x64xf32, #tpu.memory_space<vmem>>, vector<8x32xf32>,
    %c8_i32_158 = arith.constant 8 : i32
    %c0_159 = arith.constant 0 : index
    %c0_160 = arith.constant 0 : index
    %433 = vector.load %arg17[%c0_159, %c0_160] : memref<64x64xf32, #tpu.memory_space<vmem>>, vector<64x64xf32>
    %c0_161 = arith.constant 0 : index
    %c0_162 = arith.constant 0 : index
    %434 = vector.load %arg6[%c0_161, %c0_162] : memref<64x256xf32, #tpu.memory_space<vmem>>, vector<64x256xf32>
    %cst_163 = arith.constant dense<0.000000e+00> : vector<64x256xf32>
    %435 = tpu.matmul %433, %434, %cst_163 {dimension_numbers = #tpu.dot_dimension_numbers<[1], [0], [0], [1], [0, 0, 1, 1], [], []>} : vector<64x64xf32>, vector<64x256xf32>, vector<64x256xf32> -> vector<64x256xf32>
    %c0_164 = arith.constant 0 : index
    %c0_165 = arith.constant 0 : index
    %436 = vector.load %arg9[%c0_164, %c0_165] : memref<1x256xf32, #tpu.memory_space<vmem>>, vector<1x256xf32>
    %437 = vector.broadcast %436 : vector<1x256xf32> to vector<64x256xf32>
    %438 = arith.addf %435, %437 : vector<64x256xf32>
    %c0_166 = arith.constant 0 : index
    %c0_167 = arith.constant 0 : index
    %439 = vector.load %arg18[%c0_166, %c0_167] : memref<64x256xf32, #tpu.memory_space<vmem>>, vector<64x256xf32>
    tpu.vector_store %arg18[%c0_166, %c0_167], %438 {strides = array<i32>} : memref<64x256xf32, #tpu.memory_space<vmem>>, vector<64x256xf32>,
    %cst_168 = arith.constant 0.000000e+00 : f32
    %440 = vector.broadcast %cst_168 : f32 to vector<8x32xf32>
    %c0_i32_169 = arith.constant 0 : i32
    %c8_i32_170 = arith.constant 8 : i32
    %441 = arith.muli %c0_i32_169, %c8_i32_170 : i32
    %442 = tpu.assume_multiple %441, 8 : i32
    %c7_i32_171 = arith.constant 7 : i32
    %443 = arith.subi %c7_i32_171, %c0_i32_169 : i32
    %c8_i32_172 = arith.constant 8 : i32
    %444 = arith.muli %443, %c8_i32_172 : i32
    %445 = tpu.assume_multiple %444, 8 : i32
    %446 = arith.index_cast %442 : i32 to index
    %c0_173 = arith.constant 0 : index
    %447 = vector.load %arg18[%446, %c0_173] : memref<64x256xf32, #tpu.memory_space<vmem>>, vector<8x128xf32>
    %c0_174 = arith.constant 0 : index
    %c0_175 = arith.constant 0 : index
    %448 = vector.load %arg7[%c0_174, %c0_175] : memref<32x128xf32, #tpu.memory_space<vmem>>, vector<32x128xf32>
    %cst_176 = arith.constant dense<0.000000e+00> : vector<8x128xf32>
    %449 = tpu.matmul %440, %448, %cst_176 {dimension_numbers = #tpu.dot_dimension_numbers<[1], [0], [0], [1], [0, 0, 1, 1], [], []>} : vector<8x32xf32>, vector<32x128xf32>, vector<8x128xf32> -> vector<8x128xf32>
    %450 = arith.addf %447, %449 : vector<8x128xf32>
    %451 = arith.index_cast %445 : i32 to index
    %c128_177 = arith.constant 128 : index
    %452 = vector.load %arg18[%451, %c128_177] : memref<64x256xf32, #tpu.memory_space<vmem>>, vector<8x128xf32>
    %c0_178 = arith.constant 0 : index
    %c0_179 = arith.constant 0 : index
    %453 = vector.load %arg8[%c0_178, %c0_179] : memref<32x128xf32, #tpu.memory_space<vmem>>, vector<32x128xf32>
    %cst_180 = arith.constant dense<0.000000e+00> : vector<8x128xf32>
    %454 = tpu.matmul %440, %453, %cst_180 {dimension_numbers = #tpu.dot_dimension_numbers<[1], [0], [0], [1], [0, 0, 1, 1], [], []>} : vector<8x32xf32>, vector<32x128xf32>, vector<8x128xf32> -> vector<8x128xf32>
    %455 = arith.addf %452, %454 : vector<8x128xf32>
    %cst_181 = arith.constant 0.000000e+00 : f32
    %456 = vector.broadcast %cst_181 : f32 to vector<8x128xf32>
    %457 = arith.subf %456, %450 : vector<8x128xf32>
    %458 = math.exp %457 : vector<8x128xf32>
    %cst_182 = arith.constant 1.000000e+00 : f32
    %459 = vector.broadcast %cst_182 : f32 to vector<8x128xf32>
    %460 = arith.addf %459, %458 : vector<8x128xf32>
    %cst_183 = arith.constant 1.000000e+00 : f32
    %461 = vector.broadcast %cst_183 : f32 to vector<8x128xf32>
    %462 = arith.divf %461, %460 : vector<8x128xf32>
    %463 = vector.extract_strided_slice %462 {offsets = [0, 0], sizes = [8, 32], strides = [1, 1]} : vector<8x128xf32> to vector<8x32xf32>
    %464 = vector.extract_strided_slice %462 {offsets = [0, 32], sizes = [8, 32], strides = [1, 1]} : vector<8x128xf32> to vector<8x32xf32>
    %465 = vector.extract_strided_slice %450 {offsets = [0, 64], sizes = [8, 32], strides = [1, 1]} : vector<8x128xf32> to vector<8x32xf32>
    %466 = math.tanh %465 : vector<8x32xf32>
    %467 = vector.extract_strided_slice %462 {offsets = [0, 96], sizes = [8, 32], strides = [1, 1]} : vector<8x128xf32> to vector<8x32xf32>
    %468 = arith.mulf %464, %440 : vector<8x32xf32>
    %469 = arith.mulf %463, %466 : vector<8x32xf32>
    %470 = arith.addf %468, %469 : vector<8x32xf32>
    %471 = math.tanh %470 : vector<8x32xf32>
    %472 = arith.mulf %467, %471 : vector<8x32xf32>
    %cst_184 = arith.constant 0.000000e+00 : f32
    %473 = vector.broadcast %cst_184 : f32 to vector<8x128xf32>
    %474 = arith.subf %473, %455 : vector<8x128xf32>
    %475 = math.exp %474 : vector<8x128xf32>
    %cst_185 = arith.constant 1.000000e+00 : f32
    %476 = vector.broadcast %cst_185 : f32 to vector<8x128xf32>
    %477 = arith.addf %476, %475 : vector<8x128xf32>
    %cst_186 = arith.constant 1.000000e+00 : f32
    %478 = vector.broadcast %cst_186 : f32 to vector<8x128xf32>
    %479 = arith.divf %478, %477 : vector<8x128xf32>
    %480 = vector.extract_strided_slice %479 {offsets = [0, 0], sizes = [8, 32], strides = [1, 1]} : vector<8x128xf32> to vector<8x32xf32>
    %481 = vector.extract_strided_slice %479 {offsets = [0, 32], sizes = [8, 32], strides = [1, 1]} : vector<8x128xf32> to vector<8x32xf32>
    %482 = vector.extract_strided_slice %455 {offsets = [0, 64], sizes = [8, 32], strides = [1, 1]} : vector<8x128xf32> to vector<8x32xf32>
    %483 = math.tanh %482 : vector<8x32xf32>
    %484 = vector.extract_strided_slice %479 {offsets = [0, 96], sizes = [8, 32], strides = [1, 1]} : vector<8x128xf32> to vector<8x32xf32>
    %485 = arith.mulf %481, %440 : vector<8x32xf32>
    %486 = arith.mulf %480, %483 : vector<8x32xf32>
    %487 = arith.addf %485, %486 : vector<8x32xf32>
    %488 = math.tanh %487 : vector<8x32xf32>
    %489 = arith.mulf %484, %488 : vector<8x32xf32>
    %490 = arith.index_cast %442 : i32 to index
    %c0_187 = arith.constant 0 : index
    %491 = vector.load %arg17[%490, %c0_187] : memref<64x64xf32, #tpu.memory_space<vmem>>, vector<8x32xf32>
    tpu.vector_store %arg17[%490, %c0_187], %472 {strides = array<i32>} : memref<64x64xf32, #tpu.memory_space<vmem>>, vector<8x32xf32>,
    %492 = arith.index_cast %445 : i32 to index
    %c32_188 = arith.constant 32 : index
    %493 = vector.load %arg17[%492, %c32_188] : memref<64x64xf32, #tpu.memory_space<vmem>>, vector<8x32xf32>
    tpu.vector_store %arg17[%492, %c32_188], %489 {strides = array<i32>} : memref<64x64xf32, #tpu.memory_space<vmem>>, vector<8x32xf32>,
    %c1_i32_189 = arith.constant 1 : i32
    %c8_i32_190 = arith.constant 8 : i32
    %494 = arith.muli %c1_i32_189, %c8_i32_190 : i32
    %495 = tpu.assume_multiple %494, 8 : i32
    %c7_i32_191 = arith.constant 7 : i32
    %496 = arith.subi %c7_i32_191, %c1_i32_189 : i32
    %c8_i32_192 = arith.constant 8 : i32
    %497 = arith.muli %496, %c8_i32_192 : i32
    %498 = tpu.assume_multiple %497, 8 : i32
    %499 = arith.index_cast %495 : i32 to index
    %c0_193 = arith.constant 0 : index
    %500 = vector.load %arg18[%499, %c0_193] : memref<64x256xf32, #tpu.memory_space<vmem>>, vector<8x128xf32>
    %c0_194 = arith.constant 0 : index
    %c0_195 = arith.constant 0 : index
    %501 = vector.load %arg7[%c0_194, %c0_195] : memref<32x128xf32, #tpu.memory_space<vmem>>, vector<32x128xf32>
    %cst_196 = arith.constant dense<0.000000e+00> : vector<8x128xf32>
    %502 = tpu.matmul %472, %501, %cst_196 {dimension_numbers = #tpu.dot_dimension_numbers<[1], [0], [0], [1], [0, 0, 1, 1], [], []>} : vector<8x32xf32>, vector<32x128xf32>, vector<8x128xf32> -> vector<8x128xf32>
    %503 = arith.addf %500, %502 : vector<8x128xf32>
    %504 = arith.index_cast %498 : i32 to index
    %c128_197 = arith.constant 128 : index
    %505 = vector.load %arg18[%504, %c128_197] : memref<64x256xf32, #tpu.memory_space<vmem>>, vector<8x128xf32>
    %c0_198 = arith.constant 0 : index
    %c0_199 = arith.constant 0 : index
    %506 = vector.load %arg8[%c0_198, %c0_199] : memref<32x128xf32, #tpu.memory_space<vmem>>, vector<32x128xf32>
    %cst_200 = arith.constant dense<0.000000e+00> : vector<8x128xf32>
    %507 = tpu.matmul %489, %506, %cst_200 {dimension_numbers = #tpu.dot_dimension_numbers<[1], [0], [0], [1], [0, 0, 1, 1], [], []>} : vector<8x32xf32>, vector<32x128xf32>, vector<8x128xf32> -> vector<8x128xf32>
    %508 = arith.addf %505, %507 : vector<8x128xf32>
    %cst_201 = arith.constant 0.000000e+00 : f32
    %509 = vector.broadcast %cst_201 : f32 to vector<8x128xf32>
    %510 = arith.subf %509, %503 : vector<8x128xf32>
    %511 = math.exp %510 : vector<8x128xf32>
    %cst_202 = arith.constant 1.000000e+00 : f32
    %512 = vector.broadcast %cst_202 : f32 to vector<8x128xf32>
    %513 = arith.addf %512, %511 : vector<8x128xf32>
    %cst_203 = arith.constant 1.000000e+00 : f32
    %514 = vector.broadcast %cst_203 : f32 to vector<8x128xf32>
    %515 = arith.divf %514, %513 : vector<8x128xf32>
    %516 = vector.extract_strided_slice %515 {offsets = [0, 0], sizes = [8, 32], strides = [1, 1]} : vector<8x128xf32> to vector<8x32xf32>
    %517 = vector.extract_strided_slice %515 {offsets = [0, 32], sizes = [8, 32], strides = [1, 1]} : vector<8x128xf32> to vector<8x32xf32>
    %518 = vector.extract_strided_slice %503 {offsets = [0, 64], sizes = [8, 32], strides = [1, 1]} : vector<8x128xf32> to vector<8x32xf32>
    %519 = math.tanh %518 : vector<8x32xf32>
    %520 = vector.extract_strided_slice %515 {offsets = [0, 96], sizes = [8, 32], strides = [1, 1]} : vector<8x128xf32> to vector<8x32xf32>
    %521 = arith.mulf %517, %470 : vector<8x32xf32>
    %522 = arith.mulf %516, %519 : vector<8x32xf32>
    %523 = arith.addf %521, %522 : vector<8x32xf32>
    %524 = math.tanh %523 : vector<8x32xf32>
    %525 = arith.mulf %520, %524 : vector<8x32xf32>
    %cst_204 = arith.constant 0.000000e+00 : f32
    %526 = vector.broadcast %cst_204 : f32 to vector<8x128xf32>
    %527 = arith.subf %526, %508 : vector<8x128xf32>
    %528 = math.exp %527 : vector<8x128xf32>
    %cst_205 = arith.constant 1.000000e+00 : f32
    %529 = vector.broadcast %cst_205 : f32 to vector<8x128xf32>
    %530 = arith.addf %529, %528 : vector<8x128xf32>
    %cst_206 = arith.constant 1.000000e+00 : f32
    %531 = vector.broadcast %cst_206 : f32 to vector<8x128xf32>
    %532 = arith.divf %531, %530 : vector<8x128xf32>
    %533 = vector.extract_strided_slice %532 {offsets = [0, 0], sizes = [8, 32], strides = [1, 1]} : vector<8x128xf32> to vector<8x32xf32>
    %534 = vector.extract_strided_slice %532 {offsets = [0, 32], sizes = [8, 32], strides = [1, 1]} : vector<8x128xf32> to vector<8x32xf32>
    %535 = vector.extract_strided_slice %508 {offsets = [0, 64], sizes = [8, 32], strides = [1, 1]} : vector<8x128xf32> to vector<8x32xf32>
    %536 = math.tanh %535 : vector<8x32xf32>
    %537 = vector.extract_strided_slice %532 {offsets = [0, 96], sizes = [8, 32], strides = [1, 1]} : vector<8x128xf32> to vector<8x32xf32>
    %538 = arith.mulf %534, %487 : vector<8x32xf32>
    %539 = arith.mulf %533, %536 : vector<8x32xf32>
    %540 = arith.addf %538, %539 : vector<8x32xf32>
    %541 = math.tanh %540 : vector<8x32xf32>
    %542 = arith.mulf %537, %541 : vector<8x32xf32>
    %543 = arith.index_cast %495 : i32 to index
    %c0_207 = arith.constant 0 : index
    %544 = vector.load %arg17[%543, %c0_207] : memref<64x64xf32, #tpu.memory_space<vmem>>, vector<8x32xf32>
    tpu.vector_store %arg17[%543, %c0_207], %525 {strides = array<i32>} : memref<64x64xf32, #tpu.memory_space<vmem>>, vector<8x32xf32>,
    %545 = arith.index_cast %498 : i32 to index
    %c32_208 = arith.constant 32 : index
    %546 = vector.load %arg17[%545, %c32_208] : memref<64x64xf32, #tpu.memory_space<vmem>>, vector<8x32xf32>
    tpu.vector_store %arg17[%545, %c32_208], %542 {strides = array<i32>} : memref<64x64xf32, #tpu.memory_space<vmem>>, vector<8x32xf32>,
    %c2_i32_209 = arith.constant 2 : i32
    %c8_i32_210 = arith.constant 8 : i32
    %547 = arith.muli %c2_i32_209, %c8_i32_210 : i32
    %548 = tpu.assume_multiple %547, 8 : i32
    %c7_i32_211 = arith.constant 7 : i32
    %549 = arith.subi %c7_i32_211, %c2_i32_209 : i32
    %c8_i32_212 = arith.constant 8 : i32
    %550 = arith.muli %549, %c8_i32_212 : i32
    %551 = tpu.assume_multiple %550, 8 : i32
    %552 = arith.index_cast %548 : i32 to index
    %c0_213 = arith.constant 0 : index
    %553 = vector.load %arg18[%552, %c0_213] : memref<64x256xf32, #tpu.memory_space<vmem>>, vector<8x128xf32>
    %c0_214 = arith.constant 0 : index
    %c0_215 = arith.constant 0 : index
    %554 = vector.load %arg7[%c0_214, %c0_215] : memref<32x128xf32, #tpu.memory_space<vmem>>, vector<32x128xf32>
    %cst_216 = arith.constant dense<0.000000e+00> : vector<8x128xf32>
    %555 = tpu.matmul %525, %554, %cst_216 {dimension_numbers = #tpu.dot_dimension_numbers<[1], [0], [0], [1], [0, 0, 1, 1], [], []>} : vector<8x32xf32>, vector<32x128xf32>, vector<8x128xf32> -> vector<8x128xf32>
    %556 = arith.addf %553, %555 : vector<8x128xf32>
    %557 = arith.index_cast %551 : i32 to index
    %c128_217 = arith.constant 128 : index
    %558 = vector.load %arg18[%557, %c128_217] : memref<64x256xf32, #tpu.memory_space<vmem>>, vector<8x128xf32>
    %c0_218 = arith.constant 0 : index
    %c0_219 = arith.constant 0 : index
    %559 = vector.load %arg8[%c0_218, %c0_219] : memref<32x128xf32, #tpu.memory_space<vmem>>, vector<32x128xf32>
    %cst_220 = arith.constant dense<0.000000e+00> : vector<8x128xf32>
    %560 = tpu.matmul %542, %559, %cst_220 {dimension_numbers = #tpu.dot_dimension_numbers<[1], [0], [0], [1], [0, 0, 1, 1], [], []>} : vector<8x32xf32>, vector<32x128xf32>, vector<8x128xf32> -> vector<8x128xf32>
    %561 = arith.addf %558, %560 : vector<8x128xf32>
    %cst_221 = arith.constant 0.000000e+00 : f32
    %562 = vector.broadcast %cst_221 : f32 to vector<8x128xf32>
    %563 = arith.subf %562, %556 : vector<8x128xf32>
    %564 = math.exp %563 : vector<8x128xf32>
    %cst_222 = arith.constant 1.000000e+00 : f32
    %565 = vector.broadcast %cst_222 : f32 to vector<8x128xf32>
    %566 = arith.addf %565, %564 : vector<8x128xf32>
    %cst_223 = arith.constant 1.000000e+00 : f32
    %567 = vector.broadcast %cst_223 : f32 to vector<8x128xf32>
    %568 = arith.divf %567, %566 : vector<8x128xf32>
    %569 = vector.extract_strided_slice %568 {offsets = [0, 0], sizes = [8, 32], strides = [1, 1]} : vector<8x128xf32> to vector<8x32xf32>
    %570 = vector.extract_strided_slice %568 {offsets = [0, 32], sizes = [8, 32], strides = [1, 1]} : vector<8x128xf32> to vector<8x32xf32>
    %571 = vector.extract_strided_slice %556 {offsets = [0, 64], sizes = [8, 32], strides = [1, 1]} : vector<8x128xf32> to vector<8x32xf32>
    %572 = math.tanh %571 : vector<8x32xf32>
    %573 = vector.extract_strided_slice %568 {offsets = [0, 96], sizes = [8, 32], strides = [1, 1]} : vector<8x128xf32> to vector<8x32xf32>
    %574 = arith.mulf %570, %523 : vector<8x32xf32>
    %575 = arith.mulf %569, %572 : vector<8x32xf32>
    %576 = arith.addf %574, %575 : vector<8x32xf32>
    %577 = math.tanh %576 : vector<8x32xf32>
    %578 = arith.mulf %573, %577 : vector<8x32xf32>
    %cst_224 = arith.constant 0.000000e+00 : f32
    %579 = vector.broadcast %cst_224 : f32 to vector<8x128xf32>
    %580 = arith.subf %579, %561 : vector<8x128xf32>
    %581 = math.exp %580 : vector<8x128xf32>
    %cst_225 = arith.constant 1.000000e+00 : f32
    %582 = vector.broadcast %cst_225 : f32 to vector<8x128xf32>
    %583 = arith.addf %582, %581 : vector<8x128xf32>
    %cst_226 = arith.constant 1.000000e+00 : f32
    %584 = vector.broadcast %cst_226 : f32 to vector<8x128xf32>
    %585 = arith.divf %584, %583 : vector<8x128xf32>
    %586 = vector.extract_strided_slice %585 {offsets = [0, 0], sizes = [8, 32], strides = [1, 1]} : vector<8x128xf32> to vector<8x32xf32>
    %587 = vector.extract_strided_slice %585 {offsets = [0, 32], sizes = [8, 32], strides = [1, 1]} : vector<8x128xf32> to vector<8x32xf32>
    %588 = vector.extract_strided_slice %561 {offsets = [0, 64], sizes = [8, 32], strides = [1, 1]} : vector<8x128xf32> to vector<8x32xf32>
    %589 = math.tanh %588 : vector<8x32xf32>
    %590 = vector.extract_strided_slice %585 {offsets = [0, 96], sizes = [8, 32], strides = [1, 1]} : vector<8x128xf32> to vector<8x32xf32>
    %591 = arith.mulf %587, %540 : vector<8x32xf32>
    %592 = arith.mulf %586, %589 : vector<8x32xf32>
    %593 = arith.addf %591, %592 : vector<8x32xf32>
    %594 = math.tanh %593 : vector<8x32xf32>
    %595 = arith.mulf %590, %594 : vector<8x32xf32>
    %596 = arith.index_cast %548 : i32 to index
    %c0_227 = arith.constant 0 : index
    %597 = vector.load %arg17[%596, %c0_227] : memref<64x64xf32, #tpu.memory_space<vmem>>, vector<8x32xf32>
    tpu.vector_store %arg17[%596, %c0_227], %578 {strides = array<i32>} : memref<64x64xf32, #tpu.memory_space<vmem>>, vector<8x32xf32>,
    %598 = arith.index_cast %551 : i32 to index
    %c32_228 = arith.constant 32 : index
    %599 = vector.load %arg17[%598, %c32_228] : memref<64x64xf32, #tpu.memory_space<vmem>>, vector<8x32xf32>
    tpu.vector_store %arg17[%598, %c32_228], %595 {strides = array<i32>} : memref<64x64xf32, #tpu.memory_space<vmem>>, vector<8x32xf32>,
    %c3_i32_229 = arith.constant 3 : i32
    %c8_i32_230 = arith.constant 8 : i32
    %600 = arith.muli %c3_i32_229, %c8_i32_230 : i32
    %601 = tpu.assume_multiple %600, 8 : i32
    %c7_i32_231 = arith.constant 7 : i32
    %602 = arith.subi %c7_i32_231, %c3_i32_229 : i32
    %c8_i32_232 = arith.constant 8 : i32
    %603 = arith.muli %602, %c8_i32_232 : i32
    %604 = tpu.assume_multiple %603, 8 : i32
    %605 = arith.index_cast %601 : i32 to index
    %c0_233 = arith.constant 0 : index
    %606 = vector.load %arg18[%605, %c0_233] : memref<64x256xf32, #tpu.memory_space<vmem>>, vector<8x128xf32>
    %c0_234 = arith.constant 0 : index
    %c0_235 = arith.constant 0 : index
    %607 = vector.load %arg7[%c0_234, %c0_235] : memref<32x128xf32, #tpu.memory_space<vmem>>, vector<32x128xf32>
    %cst_236 = arith.constant dense<0.000000e+00> : vector<8x128xf32>
    %608 = tpu.matmul %578, %607, %cst_236 {dimension_numbers = #tpu.dot_dimension_numbers<[1], [0], [0], [1], [0, 0, 1, 1], [], []>} : vector<8x32xf32>, vector<32x128xf32>, vector<8x128xf32> -> vector<8x128xf32>
    %609 = arith.addf %606, %608 : vector<8x128xf32>
    %610 = arith.index_cast %604 : i32 to index
    %c128_237 = arith.constant 128 : index
    %611 = vector.load %arg18[%610, %c128_237] : memref<64x256xf32, #tpu.memory_space<vmem>>, vector<8x128xf32>
    %c0_238 = arith.constant 0 : index
    %c0_239 = arith.constant 0 : index
    %612 = vector.load %arg8[%c0_238, %c0_239] : memref<32x128xf32, #tpu.memory_space<vmem>>, vector<32x128xf32>
    %cst_240 = arith.constant dense<0.000000e+00> : vector<8x128xf32>
    %613 = tpu.matmul %595, %612, %cst_240 {dimension_numbers = #tpu.dot_dimension_numbers<[1], [0], [0], [1], [0, 0, 1, 1], [], []>} : vector<8x32xf32>, vector<32x128xf32>, vector<8x128xf32> -> vector<8x128xf32>
    %614 = arith.addf %611, %613 : vector<8x128xf32>
    %cst_241 = arith.constant 0.000000e+00 : f32
    %615 = vector.broadcast %cst_241 : f32 to vector<8x128xf32>
    %616 = arith.subf %615, %609 : vector<8x128xf32>
    %617 = math.exp %616 : vector<8x128xf32>
    %cst_242 = arith.constant 1.000000e+00 : f32
    %618 = vector.broadcast %cst_242 : f32 to vector<8x128xf32>
    %619 = arith.addf %618, %617 : vector<8x128xf32>
    %cst_243 = arith.constant 1.000000e+00 : f32
    %620 = vector.broadcast %cst_243 : f32 to vector<8x128xf32>
    %621 = arith.divf %620, %619 : vector<8x128xf32>
    %622 = vector.extract_strided_slice %621 {offsets = [0, 0], sizes = [8, 32], strides = [1, 1]} : vector<8x128xf32> to vector<8x32xf32>
    %623 = vector.extract_strided_slice %621 {offsets = [0, 32], sizes = [8, 32], strides = [1, 1]} : vector<8x128xf32> to vector<8x32xf32>
    %624 = vector.extract_strided_slice %609 {offsets = [0, 64], sizes = [8, 32], strides = [1, 1]} : vector<8x128xf32> to vector<8x32xf32>
    %625 = math.tanh %624 : vector<8x32xf32>
    %626 = vector.extract_strided_slice %621 {offsets = [0, 96], sizes = [8, 32], strides = [1, 1]} : vector<8x128xf32> to vector<8x32xf32>
    %627 = arith.mulf %623, %576 : vector<8x32xf32>
    %628 = arith.mulf %622, %625 : vector<8x32xf32>
    %629 = arith.addf %627, %628 : vector<8x32xf32>
    %630 = math.tanh %629 : vector<8x32xf32>
    %631 = arith.mulf %626, %630 : vector<8x32xf32>
    %cst_244 = arith.constant 0.000000e+00 : f32
    %632 = vector.broadcast %cst_244 : f32 to vector<8x128xf32>
    %633 = arith.subf %632, %614 : vector<8x128xf32>
    %634 = math.exp %633 : vector<8x128xf32>
    %cst_245 = arith.constant 1.000000e+00 : f32
    %635 = vector.broadcast %cst_245 : f32 to vector<8x128xf32>
    %636 = arith.addf %635, %634 : vector<8x128xf32>
    %cst_246 = arith.constant 1.000000e+00 : f32
    %637 = vector.broadcast %cst_246 : f32 to vector<8x128xf32>
    %638 = arith.divf %637, %636 : vector<8x128xf32>
    %639 = vector.extract_strided_slice %638 {offsets = [0, 0], sizes = [8, 32], strides = [1, 1]} : vector<8x128xf32> to vector<8x32xf32>
    %640 = vector.extract_strided_slice %638 {offsets = [0, 32], sizes = [8, 32], strides = [1, 1]} : vector<8x128xf32> to vector<8x32xf32>
    %641 = vector.extract_strided_slice %614 {offsets = [0, 64], sizes = [8, 32], strides = [1, 1]} : vector<8x128xf32> to vector<8x32xf32>
    %642 = math.tanh %641 : vector<8x32xf32>
    %643 = vector.extract_strided_slice %638 {offsets = [0, 96], sizes = [8, 32], strides = [1, 1]} : vector<8x128xf32> to vector<8x32xf32>
    %644 = arith.mulf %640, %593 : vector<8x32xf32>
    %645 = arith.mulf %639, %642 : vector<8x32xf32>
    %646 = arith.addf %644, %645 : vector<8x32xf32>
    %647 = math.tanh %646 : vector<8x32xf32>
    %648 = arith.mulf %643, %647 : vector<8x32xf32>
    %649 = arith.index_cast %601 : i32 to index
    %c0_247 = arith.constant 0 : index
    %650 = vector.load %arg17[%649, %c0_247] : memref<64x64xf32, #tpu.memory_space<vmem>>, vector<8x32xf32>
    tpu.vector_store %arg17[%649, %c0_247], %631 {strides = array<i32>} : memref<64x64xf32, #tpu.memory_space<vmem>>, vector<8x32xf32>,
    %651 = arith.index_cast %604 : i32 to index
    %c32_248 = arith.constant 32 : index
    %652 = vector.load %arg17[%651, %c32_248] : memref<64x64xf32, #tpu.memory_space<vmem>>, vector<8x32xf32>
    tpu.vector_store %arg17[%651, %c32_248], %648 {strides = array<i32>} : memref<64x64xf32, #tpu.memory_space<vmem>>, vector<8x32xf32>,
    %c4_i32_249 = arith.constant 4 : i32
    %c8_i32_250 = arith.constant 8 : i32
    %653 = arith.muli %c4_i32_249, %c8_i32_250 : i32
    %654 = tpu.assume_multiple %653, 8 : i32
    %c7_i32_251 = arith.constant 7 : i32
    %655 = arith.subi %c7_i32_251, %c4_i32_249 : i32
    %c8_i32_252 = arith.constant 8 : i32
    %656 = arith.muli %655, %c8_i32_252 : i32
    %657 = tpu.assume_multiple %656, 8 : i32
    %658 = arith.index_cast %654 : i32 to index
    %c0_253 = arith.constant 0 : index
    %659 = vector.load %arg18[%658, %c0_253] : memref<64x256xf32, #tpu.memory_space<vmem>>, vector<8x128xf32>
    %c0_254 = arith.constant 0 : index
    %c0_255 = arith.constant 0 : index
    %660 = vector.load %arg7[%c0_254, %c0_255] : memref<32x128xf32, #tpu.memory_space<vmem>>, vector<32x128xf32>
    %cst_256 = arith.constant dense<0.000000e+00> : vector<8x128xf32>
    %661 = tpu.matmul %631, %660, %cst_256 {dimension_numbers = #tpu.dot_dimension_numbers<[1], [0], [0], [1], [0, 0, 1, 1], [], []>} : vector<8x32xf32>, vector<32x128xf32>, vector<8x128xf32> -> vector<8x128xf32>
    %662 = arith.addf %659, %661 : vector<8x128xf32>
    %663 = arith.index_cast %657 : i32 to index
    %c128_257 = arith.constant 128 : index
    %664 = vector.load %arg18[%663, %c128_257] : memref<64x256xf32, #tpu.memory_space<vmem>>, vector<8x128xf32>
    %c0_258 = arith.constant 0 : index
    %c0_259 = arith.constant 0 : index
    %665 = vector.load %arg8[%c0_258, %c0_259] : memref<32x128xf32, #tpu.memory_space<vmem>>, vector<32x128xf32>
    %cst_260 = arith.constant dense<0.000000e+00> : vector<8x128xf32>
    %666 = tpu.matmul %648, %665, %cst_260 {dimension_numbers = #tpu.dot_dimension_numbers<[1], [0], [0], [1], [0, 0, 1, 1], [], []>} : vector<8x32xf32>, vector<32x128xf32>, vector<8x128xf32> -> vector<8x128xf32>
    %667 = arith.addf %664, %666 : vector<8x128xf32>
    %cst_261 = arith.constant 0.000000e+00 : f32
    %668 = vector.broadcast %cst_261 : f32 to vector<8x128xf32>
    %669 = arith.subf %668, %662 : vector<8x128xf32>
    %670 = math.exp %669 : vector<8x128xf32>
    %cst_262 = arith.constant 1.000000e+00 : f32
    %671 = vector.broadcast %cst_262 : f32 to vector<8x128xf32>
    %672 = arith.addf %671, %670 : vector<8x128xf32>
    %cst_263 = arith.constant 1.000000e+00 : f32
    %673 = vector.broadcast %cst_263 : f32 to vector<8x128xf32>
    %674 = arith.divf %673, %672 : vector<8x128xf32>
    %675 = vector.extract_strided_slice %674 {offsets = [0, 0], sizes = [8, 32], strides = [1, 1]} : vector<8x128xf32> to vector<8x32xf32>
    %676 = vector.extract_strided_slice %674 {offsets = [0, 32], sizes = [8, 32], strides = [1, 1]} : vector<8x128xf32> to vector<8x32xf32>
    %677 = vector.extract_strided_slice %662 {offsets = [0, 64], sizes = [8, 32], strides = [1, 1]} : vector<8x128xf32> to vector<8x32xf32>
    %678 = math.tanh %677 : vector<8x32xf32>
    %679 = vector.extract_strided_slice %674 {offsets = [0, 96], sizes = [8, 32], strides = [1, 1]} : vector<8x128xf32> to vector<8x32xf32>
    %680 = arith.mulf %676, %629 : vector<8x32xf32>
    %681 = arith.mulf %675, %678 : vector<8x32xf32>
    %682 = arith.addf %680, %681 : vector<8x32xf32>
    %683 = math.tanh %682 : vector<8x32xf32>
    %684 = arith.mulf %679, %683 : vector<8x32xf32>
    %cst_264 = arith.constant 0.000000e+00 : f32
    %685 = vector.broadcast %cst_264 : f32 to vector<8x128xf32>
    %686 = arith.subf %685, %667 : vector<8x128xf32>
    %687 = math.exp %686 : vector<8x128xf32>
    %cst_265 = arith.constant 1.000000e+00 : f32
    %688 = vector.broadcast %cst_265 : f32 to vector<8x128xf32>
    %689 = arith.addf %688, %687 : vector<8x128xf32>
    %cst_266 = arith.constant 1.000000e+00 : f32
    %690 = vector.broadcast %cst_266 : f32 to vector<8x128xf32>
    %691 = arith.divf %690, %689 : vector<8x128xf32>
    %692 = vector.extract_strided_slice %691 {offsets = [0, 0], sizes = [8, 32], strides = [1, 1]} : vector<8x128xf32> to vector<8x32xf32>
    %693 = vector.extract_strided_slice %691 {offsets = [0, 32], sizes = [8, 32], strides = [1, 1]} : vector<8x128xf32> to vector<8x32xf32>
    %694 = vector.extract_strided_slice %667 {offsets = [0, 64], sizes = [8, 32], strides = [1, 1]} : vector<8x128xf32> to vector<8x32xf32>
    %695 = math.tanh %694 : vector<8x32xf32>
    %696 = vector.extract_strided_slice %691 {offsets = [0, 96], sizes = [8, 32], strides = [1, 1]} : vector<8x128xf32> to vector<8x32xf32>
    %697 = arith.mulf %693, %646 : vector<8x32xf32>
    %698 = arith.mulf %692, %695 : vector<8x32xf32>
    %699 = arith.addf %697, %698 : vector<8x32xf32>
    %700 = math.tanh %699 : vector<8x32xf32>
    %701 = arith.mulf %696, %700 : vector<8x32xf32>
    %702 = arith.index_cast %654 : i32 to index
    %c0_267 = arith.constant 0 : index
    %703 = vector.load %arg17[%702, %c0_267] : memref<64x64xf32, #tpu.memory_space<vmem>>, vector<8x32xf32>
    tpu.vector_store %arg17[%702, %c0_267], %684 {strides = array<i32>} : memref<64x64xf32, #tpu.memory_space<vmem>>, vector<8x32xf32>,
    %704 = arith.index_cast %657 : i32 to index
    %c32_268 = arith.constant 32 : index
    %705 = vector.load %arg17[%704, %c32_268] : memref<64x64xf32, #tpu.memory_space<vmem>>, vector<8x32xf32>
    tpu.vector_store %arg17[%704, %c32_268], %701 {strides = array<i32>} : memref<64x64xf32, #tpu.memory_space<vmem>>, vector<8x32xf32>,
    %c5_i32_269 = arith.constant 5 : i32
    %c8_i32_270 = arith.constant 8 : i32
    %706 = arith.muli %c5_i32_269, %c8_i32_270 : i32
    %707 = tpu.assume_multiple %706, 8 : i32
    %c7_i32_271 = arith.constant 7 : i32
    %708 = arith.subi %c7_i32_271, %c5_i32_269 : i32
    %c8_i32_272 = arith.constant 8 : i32
    %709 = arith.muli %708, %c8_i32_272 : i32
    %710 = tpu.assume_multiple %709, 8 : i32
    %711 = arith.index_cast %707 : i32 to index
    %c0_273 = arith.constant 0 : index
    %712 = vector.load %arg18[%711, %c0_273] : memref<64x256xf32, #tpu.memory_space<vmem>>, vector<8x128xf32>
    %c0_274 = arith.constant 0 : index
    %c0_275 = arith.constant 0 : index
    %713 = vector.load %arg7[%c0_274, %c0_275] : memref<32x128xf32, #tpu.memory_space<vmem>>, vector<32x128xf32>
    %cst_276 = arith.constant dense<0.000000e+00> : vector<8x128xf32>
    %714 = tpu.matmul %684, %713, %cst_276 {dimension_numbers = #tpu.dot_dimension_numbers<[1], [0], [0], [1], [0, 0, 1, 1], [], []>} : vector<8x32xf32>, vector<32x128xf32>, vector<8x128xf32> -> vector<8x128xf32>
    %715 = arith.addf %712, %714 : vector<8x128xf32>
    %716 = arith.index_cast %710 : i32 to index
    %c128_277 = arith.constant 128 : index
    %717 = vector.load %arg18[%716, %c128_277] : memref<64x256xf32, #tpu.memory_space<vmem>>, vector<8x128xf32>
    %c0_278 = arith.constant 0 : index
    %c0_279 = arith.constant 0 : index
    %718 = vector.load %arg8[%c0_278, %c0_279] : memref<32x128xf32, #tpu.memory_space<vmem>>, vector<32x128xf32>
    %cst_280 = arith.constant dense<0.000000e+00> : vector<8x128xf32>
    %719 = tpu.matmul %701, %718, %cst_280 {dimension_numbers = #tpu.dot_dimension_numbers<[1], [0], [0], [1], [0, 0, 1, 1], [], []>} : vector<8x32xf32>, vector<32x128xf32>, vector<8x128xf32> -> vector<8x128xf32>
    %720 = arith.addf %717, %719 : vector<8x128xf32>
    %cst_281 = arith.constant 0.000000e+00 : f32
    %721 = vector.broadcast %cst_281 : f32 to vector<8x128xf32>
    %722 = arith.subf %721, %715 : vector<8x128xf32>
    %723 = math.exp %722 : vector<8x128xf32>
    %cst_282 = arith.constant 1.000000e+00 : f32
    %724 = vector.broadcast %cst_282 : f32 to vector<8x128xf32>
    %725 = arith.addf %724, %723 : vector<8x128xf32>
    %cst_283 = arith.constant 1.000000e+00 : f32
    %726 = vector.broadcast %cst_283 : f32 to vector<8x128xf32>
    %727 = arith.divf %726, %725 : vector<8x128xf32>
    %728 = vector.extract_strided_slice %727 {offsets = [0, 0], sizes = [8, 32], strides = [1, 1]} : vector<8x128xf32> to vector<8x32xf32>
    %729 = vector.extract_strided_slice %727 {offsets = [0, 32], sizes = [8, 32], strides = [1, 1]} : vector<8x128xf32> to vector<8x32xf32>
    %730 = vector.extract_strided_slice %715 {offsets = [0, 64], sizes = [8, 32], strides = [1, 1]} : vector<8x128xf32> to vector<8x32xf32>
    %731 = math.tanh %730 : vector<8x32xf32>
    %732 = vector.extract_strided_slice %727 {offsets = [0, 96], sizes = [8, 32], strides = [1, 1]} : vector<8x128xf32> to vector<8x32xf32>
    %733 = arith.mulf %729, %682 : vector<8x32xf32>
    %734 = arith.mulf %728, %731 : vector<8x32xf32>
    %735 = arith.addf %733, %734 : vector<8x32xf32>
    %736 = math.tanh %735 : vector<8x32xf32>
    %737 = arith.mulf %732, %736 : vector<8x32xf32>
    %cst_284 = arith.constant 0.000000e+00 : f32
    %738 = vector.broadcast %cst_284 : f32 to vector<8x128xf32>
    %739 = arith.subf %738, %720 : vector<8x128xf32>
    %740 = math.exp %739 : vector<8x128xf32>
    %cst_285 = arith.constant 1.000000e+00 : f32
    %741 = vector.broadcast %cst_285 : f32 to vector<8x128xf32>
    %742 = arith.addf %741, %740 : vector<8x128xf32>
    %cst_286 = arith.constant 1.000000e+00 : f32
    %743 = vector.broadcast %cst_286 : f32 to vector<8x128xf32>
    %744 = arith.divf %743, %742 : vector<8x128xf32>
    %745 = vector.extract_strided_slice %744 {offsets = [0, 0], sizes = [8, 32], strides = [1, 1]} : vector<8x128xf32> to vector<8x32xf32>
    %746 = vector.extract_strided_slice %744 {offsets = [0, 32], sizes = [8, 32], strides = [1, 1]} : vector<8x128xf32> to vector<8x32xf32>
    %747 = vector.extract_strided_slice %720 {offsets = [0, 64], sizes = [8, 32], strides = [1, 1]} : vector<8x128xf32> to vector<8x32xf32>
    %748 = math.tanh %747 : vector<8x32xf32>
    %749 = vector.extract_strided_slice %744 {offsets = [0, 96], sizes = [8, 32], strides = [1, 1]} : vector<8x128xf32> to vector<8x32xf32>
    %750 = arith.mulf %746, %699 : vector<8x32xf32>
    %751 = arith.mulf %745, %748 : vector<8x32xf32>
    %752 = arith.addf %750, %751 : vector<8x32xf32>
    %753 = math.tanh %752 : vector<8x32xf32>
    %754 = arith.mulf %749, %753 : vector<8x32xf32>
    %755 = arith.index_cast %707 : i32 to index
    %c0_287 = arith.constant 0 : index
    %756 = vector.load %arg17[%755, %c0_287] : memref<64x64xf32, #tpu.memory_space<vmem>>, vector<8x32xf32>
    tpu.vector_store %arg17[%755, %c0_287], %737 {strides = array<i32>} : memref<64x64xf32, #tpu.memory_space<vmem>>, vector<8x32xf32>,
    %757 = arith.index_cast %710 : i32 to index
    %c32_288 = arith.constant 32 : index
    %758 = vector.load %arg17[%757, %c32_288] : memref<64x64xf32, #tpu.memory_space<vmem>>, vector<8x32xf32>
    tpu.vector_store %arg17[%757, %c32_288], %754 {strides = array<i32>} : memref<64x64xf32, #tpu.memory_space<vmem>>, vector<8x32xf32>,
    %c6_i32_289 = arith.constant 6 : i32
    %c8_i32_290 = arith.constant 8 : i32
    %759 = arith.muli %c6_i32_289, %c8_i32_290 : i32
    %760 = tpu.assume_multiple %759, 8 : i32
    %c7_i32_291 = arith.constant 7 : i32
    %761 = arith.subi %c7_i32_291, %c6_i32_289 : i32
    %c8_i32_292 = arith.constant 8 : i32
    %762 = arith.muli %761, %c8_i32_292 : i32
    %763 = tpu.assume_multiple %762, 8 : i32
    %764 = arith.index_cast %760 : i32 to index
    %c0_293 = arith.constant 0 : index
    %765 = vector.load %arg18[%764, %c0_293] : memref<64x256xf32, #tpu.memory_space<vmem>>, vector<8x128xf32>
    %c0_294 = arith.constant 0 : index
    %c0_295 = arith.constant 0 : index
    %766 = vector.load %arg7[%c0_294, %c0_295] : memref<32x128xf32, #tpu.memory_space<vmem>>, vector<32x128xf32>
    %cst_296 = arith.constant dense<0.000000e+00> : vector<8x128xf32>
    %767 = tpu.matmul %737, %766, %cst_296 {dimension_numbers = #tpu.dot_dimension_numbers<[1], [0], [0], [1], [0, 0, 1, 1], [], []>} : vector<8x32xf32>, vector<32x128xf32>, vector<8x128xf32> -> vector<8x128xf32>
    %768 = arith.addf %765, %767 : vector<8x128xf32>
    %769 = arith.index_cast %763 : i32 to index
    %c128_297 = arith.constant 128 : index
    %770 = vector.load %arg18[%769, %c128_297] : memref<64x256xf32, #tpu.memory_space<vmem>>, vector<8x128xf32>
    %c0_298 = arith.constant 0 : index
    %c0_299 = arith.constant 0 : index
    %771 = vector.load %arg8[%c0_298, %c0_299] : memref<32x128xf32, #tpu.memory_space<vmem>>, vector<32x128xf32>
    %cst_300 = arith.constant dense<0.000000e+00> : vector<8x128xf32>
    %772 = tpu.matmul %754, %771, %cst_300 {dimension_numbers = #tpu.dot_dimension_numbers<[1], [0], [0], [1], [0, 0, 1, 1], [], []>} : vector<8x32xf32>, vector<32x128xf32>, vector<8x128xf32> -> vector<8x128xf32>
    %773 = arith.addf %770, %772 : vector<8x128xf32>
    %cst_301 = arith.constant 0.000000e+00 : f32
    %774 = vector.broadcast %cst_301 : f32 to vector<8x128xf32>
    %775 = arith.subf %774, %768 : vector<8x128xf32>
    %776 = math.exp %775 : vector<8x128xf32>
    %cst_302 = arith.constant 1.000000e+00 : f32
    %777 = vector.broadcast %cst_302 : f32 to vector<8x128xf32>
    %778 = arith.addf %777, %776 : vector<8x128xf32>
    %cst_303 = arith.constant 1.000000e+00 : f32
    %779 = vector.broadcast %cst_303 : f32 to vector<8x128xf32>
    %780 = arith.divf %779, %778 : vector<8x128xf32>
    %781 = vector.extract_strided_slice %780 {offsets = [0, 0], sizes = [8, 32], strides = [1, 1]} : vector<8x128xf32> to vector<8x32xf32>
    %782 = vector.extract_strided_slice %780 {offsets = [0, 32], sizes = [8, 32], strides = [1, 1]} : vector<8x128xf32> to vector<8x32xf32>
    %783 = vector.extract_strided_slice %768 {offsets = [0, 64], sizes = [8, 32], strides = [1, 1]} : vector<8x128xf32> to vector<8x32xf32>
    %784 = math.tanh %783 : vector<8x32xf32>
    %785 = vector.extract_strided_slice %780 {offsets = [0, 96], sizes = [8, 32], strides = [1, 1]} : vector<8x128xf32> to vector<8x32xf32>
    %786 = arith.mulf %782, %735 : vector<8x32xf32>
    %787 = arith.mulf %781, %784 : vector<8x32xf32>
    %788 = arith.addf %786, %787 : vector<8x32xf32>
    %789 = math.tanh %788 : vector<8x32xf32>
    %790 = arith.mulf %785, %789 : vector<8x32xf32>
    %cst_304 = arith.constant 0.000000e+00 : f32
    %791 = vector.broadcast %cst_304 : f32 to vector<8x128xf32>
    %792 = arith.subf %791, %773 : vector<8x128xf32>
    %793 = math.exp %792 : vector<8x128xf32>
    %cst_305 = arith.constant 1.000000e+00 : f32
    %794 = vector.broadcast %cst_305 : f32 to vector<8x128xf32>
    %795 = arith.addf %794, %793 : vector<8x128xf32>
    %cst_306 = arith.constant 1.000000e+00 : f32
    %796 = vector.broadcast %cst_306 : f32 to vector<8x128xf32>
    %797 = arith.divf %796, %795 : vector<8x128xf32>
    %798 = vector.extract_strided_slice %797 {offsets = [0, 0], sizes = [8, 32], strides = [1, 1]} : vector<8x128xf32> to vector<8x32xf32>
    %799 = vector.extract_strided_slice %797 {offsets = [0, 32], sizes = [8, 32], strides = [1, 1]} : vector<8x128xf32> to vector<8x32xf32>
    %800 = vector.extract_strided_slice %773 {offsets = [0, 64], sizes = [8, 32], strides = [1, 1]} : vector<8x128xf32> to vector<8x32xf32>
    %801 = math.tanh %800 : vector<8x32xf32>
    %802 = vector.extract_strided_slice %797 {offsets = [0, 96], sizes = [8, 32], strides = [1, 1]} : vector<8x128xf32> to vector<8x32xf32>
    %803 = arith.mulf %799, %752 : vector<8x32xf32>
    %804 = arith.mulf %798, %801 : vector<8x32xf32>
    %805 = arith.addf %803, %804 : vector<8x32xf32>
    %806 = math.tanh %805 : vector<8x32xf32>
    %807 = arith.mulf %802, %806 : vector<8x32xf32>
    %808 = arith.index_cast %760 : i32 to index
    %c0_307 = arith.constant 0 : index
    %809 = vector.load %arg17[%808, %c0_307] : memref<64x64xf32, #tpu.memory_space<vmem>>, vector<8x32xf32>
    tpu.vector_store %arg17[%808, %c0_307], %790 {strides = array<i32>} : memref<64x64xf32, #tpu.memory_space<vmem>>, vector<8x32xf32>,
    %810 = arith.index_cast %763 : i32 to index
    %c32_308 = arith.constant 32 : index
    %811 = vector.load %arg17[%810, %c32_308] : memref<64x64xf32, #tpu.memory_space<vmem>>, vector<8x32xf32>
    tpu.vector_store %arg17[%810, %c32_308], %807 {strides = array<i32>} : memref<64x64xf32, #tpu.memory_space<vmem>>, vector<8x32xf32>,
    %c7_i32_309 = arith.constant 7 : i32
    %c8_i32_310 = arith.constant 8 : i32
    %812 = arith.muli %c7_i32_309, %c8_i32_310 : i32
    %813 = tpu.assume_multiple %812, 8 : i32
    %c7_i32_311 = arith.constant 7 : i32
    %814 = arith.subi %c7_i32_311, %c7_i32_309 : i32
    %c8_i32_312 = arith.constant 8 : i32
    %815 = arith.muli %814, %c8_i32_312 : i32
    %816 = tpu.assume_multiple %815, 8 : i32
    %817 = arith.index_cast %813 : i32 to index
    %c0_313 = arith.constant 0 : index
    %818 = vector.load %arg18[%817, %c0_313] : memref<64x256xf32, #tpu.memory_space<vmem>>, vector<8x128xf32>
    %c0_314 = arith.constant 0 : index
    %c0_315 = arith.constant 0 : index
    %819 = vector.load %arg7[%c0_314, %c0_315] : memref<32x128xf32, #tpu.memory_space<vmem>>, vector<32x128xf32>
    %cst_316 = arith.constant dense<0.000000e+00> : vector<8x128xf32>
    %820 = tpu.matmul %790, %819, %cst_316 {dimension_numbers = #tpu.dot_dimension_numbers<[1], [0], [0], [1], [0, 0, 1, 1], [], []>} : vector<8x32xf32>, vector<32x128xf32>, vector<8x128xf32> -> vector<8x128xf32>
    %821 = arith.addf %818, %820 : vector<8x128xf32>
    %822 = arith.index_cast %816 : i32 to index
    %c128_317 = arith.constant 128 : index
    %823 = vector.load %arg18[%822, %c128_317] : memref<64x256xf32, #tpu.memory_space<vmem>>, vector<8x128xf32>
    %c0_318 = arith.constant 0 : index
    %c0_319 = arith.constant 0 : index
    %824 = vector.load %arg8[%c0_318, %c0_319] : memref<32x128xf32, #tpu.memory_space<vmem>>, vector<32x128xf32>
    %cst_320 = arith.constant dense<0.000000e+00> : vector<8x128xf32>
    %825 = tpu.matmul %807, %824, %cst_320 {dimension_numbers = #tpu.dot_dimension_numbers<[1], [0], [0], [1], [0, 0, 1, 1], [], []>} : vector<8x32xf32>, vector<32x128xf32>, vector<8x128xf32> -> vector<8x128xf32>
    %826 = arith.addf %823, %825 : vector<8x128xf32>
    %cst_321 = arith.constant 0.000000e+00 : f32
    %827 = vector.broadcast %cst_321 : f32 to vector<8x128xf32>
    %828 = arith.subf %827, %821 : vector<8x128xf32>
    %829 = math.exp %828 : vector<8x128xf32>
    %cst_322 = arith.constant 1.000000e+00 : f32
    %830 = vector.broadcast %cst_322 : f32 to vector<8x128xf32>
    %831 = arith.addf %830, %829 : vector<8x128xf32>
    %cst_323 = arith.constant 1.000000e+00 : f32
    %832 = vector.broadcast %cst_323 : f32 to vector<8x128xf32>
    %833 = arith.divf %832, %831 : vector<8x128xf32>
    %834 = vector.extract_strided_slice %833 {offsets = [0, 0], sizes = [8, 32], strides = [1, 1]} : vector<8x128xf32> to vector<8x32xf32>
    %835 = vector.extract_strided_slice %833 {offsets = [0, 32], sizes = [8, 32], strides = [1, 1]} : vector<8x128xf32> to vector<8x32xf32>
    %836 = vector.extract_strided_slice %821 {offsets = [0, 64], sizes = [8, 32], strides = [1, 1]} : vector<8x128xf32> to vector<8x32xf32>
    %837 = math.tanh %836 : vector<8x32xf32>
    %838 = vector.extract_strided_slice %833 {offsets = [0, 96], sizes = [8, 32], strides = [1, 1]} : vector<8x128xf32> to vector<8x32xf32>
    %839 = arith.mulf %835, %788 : vector<8x32xf32>
    %840 = arith.mulf %834, %837 : vector<8x32xf32>
    %841 = arith.addf %839, %840 : vector<8x32xf32>
    %842 = math.tanh %841 : vector<8x32xf32>
    %843 = arith.mulf %838, %842 : vector<8x32xf32>
    %cst_324 = arith.constant 0.000000e+00 : f32
    %844 = vector.broadcast %cst_324 : f32 to vector<8x128xf32>
    %845 = arith.subf %844, %826 : vector<8x128xf32>
    %846 = math.exp %845 : vector<8x128xf32>
    %cst_325 = arith.constant 1.000000e+00 : f32
    %847 = vector.broadcast %cst_325 : f32 to vector<8x128xf32>
    %848 = arith.addf %847, %846 : vector<8x128xf32>
    %cst_326 = arith.constant 1.000000e+00 : f32
    %849 = vector.broadcast %cst_326 : f32 to vector<8x128xf32>
    %850 = arith.divf %849, %848 : vector<8x128xf32>
    %851 = vector.extract_strided_slice %850 {offsets = [0, 0], sizes = [8, 32], strides = [1, 1]} : vector<8x128xf32> to vector<8x32xf32>
    %852 = vector.extract_strided_slice %850 {offsets = [0, 32], sizes = [8, 32], strides = [1, 1]} : vector<8x128xf32> to vector<8x32xf32>
    %853 = vector.extract_strided_slice %826 {offsets = [0, 64], sizes = [8, 32], strides = [1, 1]} : vector<8x128xf32> to vector<8x32xf32>
    %854 = math.tanh %853 : vector<8x32xf32>
    %855 = vector.extract_strided_slice %850 {offsets = [0, 96], sizes = [8, 32], strides = [1, 1]} : vector<8x128xf32> to vector<8x32xf32>
    %856 = arith.mulf %852, %805 : vector<8x32xf32>
    %857 = arith.mulf %851, %854 : vector<8x32xf32>
    %858 = arith.addf %856, %857 : vector<8x32xf32>
    %859 = math.tanh %858 : vector<8x32xf32>
    %860 = arith.mulf %855, %859 : vector<8x32xf32>
    %861 = arith.index_cast %813 : i32 to index
    %c0_327 = arith.constant 0 : index
    %862 = vector.load %arg17[%861, %c0_327] : memref<64x64xf32, #tpu.memory_space<vmem>>, vector<8x32xf32>
    tpu.vector_store %arg17[%861, %c0_327], %843 {strides = array<i32>} : memref<64x64xf32, #tpu.memory_space<vmem>>, vector<8x32xf32>,
    %863 = arith.index_cast %816 : i32 to index
    %c32_328 = arith.constant 32 : index
    %864 = vector.load %arg17[%863, %c32_328] : memref<64x64xf32, #tpu.memory_space<vmem>>, vector<8x32xf32>
    tpu.vector_store %arg17[%863, %c32_328], %860 {strides = array<i32>} : memref<64x64xf32, #tpu.memory_space<vmem>>, vector<8x32xf32>,
    %c8_i32_329 = arith.constant 8 : i32
    %c0_330 = arith.constant 0 : index
    %c0_331 = arith.constant 0 : index
    %865 = vector.load %arg17[%c0_330, %c0_331] : memref<64x64xf32, #tpu.memory_space<vmem>>, vector<64x64xf32>
    %c0_332 = arith.constant 0 : index
    %c0_333 = arith.constant 0 : index
    %866 = vector.load %arg10[%c0_332, %c0_333] : memref<64x32xf32, #tpu.memory_space<vmem>>, vector<64x32xf32>
    %cst_334 = arith.constant dense<0.000000e+00> : vector<64x32xf32>
    %867 = tpu.matmul %865, %866, %cst_334 {dimension_numbers = #tpu.dot_dimension_numbers<[1], [0], [0], [1], [0, 0, 1, 1], [], []>} : vector<64x64xf32>, vector<64x32xf32>, vector<64x32xf32> -> vector<64x32xf32>
    %c0_335 = arith.constant 0 : index
    %c0_336 = arith.constant 0 : index
    %868 = vector.load %arg11[%c0_335, %c0_336] : memref<1x32xf32, #tpu.memory_space<vmem>>, vector<1x32xf32>
    %869 = vector.broadcast %868 : vector<1x32xf32> to vector<64x32xf32>
    %870 = arith.addf %867, %869 : vector<64x32xf32>
    %cst_337 = arith.constant 0.000000e+00 : f32
    %871 = vector.broadcast %cst_337 : f32 to vector<64x32xf32>
    %872 = arith.maximumf %870, %871 : vector<64x32xf32>
    %c0_338 = arith.constant 0 : index
    %c0_339 = arith.constant 0 : index
    %873 = vector.load %arg12[%c0_338, %c0_339] : memref<1x32xf32, #tpu.memory_space<vmem>>, vector<1x32xf32>
    %874 = vector.broadcast %873 : vector<1x32xf32> to vector<64x32xf32>
    %875 = arith.mulf %872, %874 : vector<64x32xf32>
    %cst_340 = arith.constant dense<0.000000e+00> : vector<64xf32>
    %876 = vector.multi_reduction <add>, %875, %cst_340 [1] : vector<64x32xf32> to vector<64xf32>
    %877 = vector.shape_cast %876 : vector<64xf32> to vector<64x1xf32>
    %878 = vector.shape_cast %877 : vector<64x1xf32> to vector<8x8x1xf32>
    %cst_341 = arith.constant dense<0xFF800000> : vector<8x1xf32>
    %879 = vector.multi_reduction <maximumf>, %878, %cst_341 [0] : vector<8x8x1xf32> to vector<8x1xf32>
    %880 = vector.shape_cast %879 : vector<8x1xf32> to vector<1x8x1xf32>
    %881 = vector.broadcast %880 : vector<1x8x1xf32> to vector<8x8x1xf32>
    %882 = arith.subf %878, %881 : vector<8x8x1xf32>
    %883 = math.exp %882 : vector<8x8x1xf32>
    %cst_342 = arith.constant dense<0.000000e+00> : vector<8x1xf32>
    %884 = vector.multi_reduction <add>, %883, %cst_342 [0] : vector<8x8x1xf32> to vector<8x1xf32>
    %885 = vector.shape_cast %884 : vector<8x1xf32> to vector<1x8x1xf32>
    %886 = vector.broadcast %885 : vector<1x8x1xf32> to vector<8x8x1xf32>
    %887 = arith.divf %883, %886 : vector<8x8x1xf32>
    %c0_343 = arith.constant 0 : index
    %c0_344 = arith.constant 0 : index
    %c0_345 = arith.constant 0 : index
    %888 = vector.load %arg16[%c0_343, %c0_344, %c0_345] : memref<8x8x1xf32, #tpu.memory_space<vmem>>, vector<8x8x1xf32>
    tpu.vector_store %arg16[%c0_343, %c0_344, %c0_345], %887 {strides = array<i32>} : memref<8x8x1xf32, #tpu.memory_space<vmem>>, vector<8x8x1xf32>,
    %889 = vector.shape_cast %865 : vector<64x64xf32> to vector<8x8x64xf32>
    %890 = vector.broadcast %887 : vector<8x8x1xf32> to vector<8x8x64xf32>
    %891 = arith.mulf %889, %890 : vector<8x8x64xf32>
    %cst_346 = arith.constant dense<0.000000e+00> : vector<8x64xf32>
    %892 = vector.multi_reduction <add>, %891, %cst_346 [0] : vector<8x8x64xf32> to vector<8x64xf32>
    %c0_347 = arith.constant 0 : index
    %c0_348 = arith.constant 0 : index
    %893 = vector.load %arg13[%c0_347, %c0_348] : memref<64x128xf32, #tpu.memory_space<vmem>>, vector<64x128xf32>
    %cst_349 = arith.constant dense<0.000000e+00> : vector<8x128xf32>
    %894 = tpu.matmul %892, %893, %cst_349 {dimension_numbers = #tpu.dot_dimension_numbers<[1], [0], [0], [1], [0, 0, 1, 1], [], []>} : vector<8x64xf32>, vector<64x128xf32>, vector<8x128xf32> -> vector<8x128xf32>
    %c0_350 = arith.constant 0 : index
    %c0_351 = arith.constant 0 : index
    %895 = vector.load %arg14[%c0_350, %c0_351] : memref<1x128xf32, #tpu.memory_space<vmem>>, vector<1x128xf32>
    %896 = vector.broadcast %895 : vector<1x128xf32> to vector<8x128xf32>
    %897 = arith.addf %894, %896 : vector<8x128xf32>
    %c0_352 = arith.constant 0 : index
    %c0_353 = arith.constant 0 : index
    %898 = vector.load %arg15[%c0_352, %c0_353] : memref<8x128xf32, #tpu.memory_space<vmem>>, vector<8x128xf32>
    tpu.vector_store %arg15[%c0_352, %c0_353], %897 {strides = array<i32>} : memref<8x128xf32, #tpu.memory_space<vmem>>, vector<8x128xf32>,
    return
  }
  func.func @transform_0(%arg0: i32) -> (i32, i32, i32) {
    %c0_i32 = arith.constant 0 : i32
    %c0_i32_0 = arith.constant 0 : i32
    %c0_i32_1 = arith.constant 0 : i32
    return %c0_i32, %arg0, %c0_i32_0 : i32, i32, i32
  }
  func.func @transform_1(%arg0: i32) -> (i32, i32) {
    %c0_i32 = arith.constant 0 : i32
    %c0_i32_0 = arith.constant 0 : i32
    %c0_i32_1 = arith.constant 0 : i32
    return %c0_i32, %c0_i32_0 : i32, i32
  }
  func.func @transform_2(%arg0: i32) -> (i32, i32) {
    %c0_i32 = arith.constant 0 : i32
    %c0_i32_0 = arith.constant 0 : i32
    %c0_i32_1 = arith.constant 0 : i32
    return %c0_i32, %c0_i32_0 : i32, i32
  }
  func.func @transform_3(%arg0: i32) -> (i32, i32) {
    %c0_i32 = arith.constant 0 : i32
    %c0_i32_0 = arith.constant 0 : i32
    %c0_i32_1 = arith.constant 0 : i32
    return %c0_i32, %c0_i32_0 : i32, i32
  }
  func.func @transform_4(%arg0: i32) -> (i32, i32) {
    %c0_i32 = arith.constant 0 : i32
    %c0_i32_0 = arith.constant 0 : i32
    %c0_i32_1 = arith.constant 0 : i32
    return %c0_i32, %c0_i32_0 : i32, i32
  }
  func.func @transform_5(%arg0: i32) -> (i32, i32) {
    %c0_i32 = arith.constant 0 : i32
    %c0_i32_0 = arith.constant 0 : i32
    %c0_i32_1 = arith.constant 0 : i32
    return %c0_i32, %c0_i32_0 : i32, i32
  }
  func.func @transform_6(%arg0: i32) -> (i32, i32) {
    %c0_i32 = arith.constant 0 : i32
    %c0_i32_0 = arith.constant 0 : i32
    %c0_i32_1 = arith.constant 0 : i32
    return %c0_i32, %c0_i32_0 : i32, i32
  }
  func.func @transform_7(%arg0: i32) -> (i32, i32) {
    %c0_i32 = arith.constant 0 : i32
    %c0_i32_0 = arith.constant 0 : i32
    %c0_i32_1 = arith.constant 0 : i32
    return %c0_i32, %c0_i32_0 : i32, i32
  }
  func.func @transform_8(%arg0: i32) -> (i32, i32) {
    %c0_i32 = arith.constant 0 : i32
    %c0_i32_0 = arith.constant 0 : i32
    %c0_i32_1 = arith.constant 0 : i32
    return %c0_i32, %c0_i32_0 : i32, i32
  }
  func.func @transform_9(%arg0: i32) -> (i32, i32) {
    %c0_i32 = arith.constant 0 : i32
    %c0_i32_0 = arith.constant 0 : i32
    %c0_i32_1 = arith.constant 0 : i32
    return %c0_i32, %c0_i32_0 : i32, i32
  }
  func.func @transform_10(%arg0: i32) -> (i32, i32) {
    %c0_i32 = arith.constant 0 : i32
    %c0_i32_0 = arith.constant 0 : i32
    %c0_i32_1 = arith.constant 0 : i32
    return %c0_i32, %c0_i32_0 : i32, i32
  }
  func.func @transform_11(%arg0: i32) -> (i32, i32) {
    %c0_i32 = arith.constant 0 : i32
    %c0_i32_0 = arith.constant 0 : i32
    %c0_i32_1 = arith.constant 0 : i32
    return %c0_i32, %c0_i32_0 : i32, i32
  }
  func.func @transform_12(%arg0: i32) -> (i32, i32) {
    %c0_i32 = arith.constant 0 : i32
    %c0_i32_0 = arith.constant 0 : i32
    %c0_i32_1 = arith.constant 0 : i32
    return %c0_i32, %c0_i32_0 : i32, i32
  }
  func.func @transform_13(%arg0: i32) -> (i32, i32) {
    %c0_i32 = arith.constant 0 : i32
    %c0_i32_0 = arith.constant 0 : i32
    %c0_i32_1 = arith.constant 0 : i32
    return %c0_i32, %c0_i32_0 : i32, i32
  }
  func.func @transform_14(%arg0: i32) -> (i32, i32) {
    %c0_i32 = arith.constant 0 : i32
    %c0_i32_0 = arith.constant 0 : i32
    return %arg0, %c0_i32 : i32, i32
  }
  func.func @transform_15(%arg0: i32) -> (i32, i32, i32) {
    %c0_i32 = arith.constant 0 : i32
    %c0_i32_0 = arith.constant 0 : i32
    %c0_i32_1 = arith.constant 0 : i32
    return %c0_i32, %arg0, %c0_i32_0 : i32, i32, i32
  }
}

</mosaic_0001>

<bundles_post_ra>
// kernel: tpu_custom_call.1
= control target key start
LH: loop header
LB: loop body
LE: loop exit
PB: predicated region body
PF: predicated region fallthrough
CT: control target
= control target key end

     0   :  { %s6835_s0 = inlined_call_operand.vmem [shape: f32[8,8,16], index: 0, kind: input, shape index: {}]   ;;  %s6836_s1 = inlined_call_operand.hbm [shape: f32[16,256], index: 1, kind: input, shape index: {}]   ;;  %s6837_s2 = inlined_call_operand.hbm [shape: f32[32,128], index: 2, kind: input, shape index: {}]   ;;  %s6838_s3 = inlined_call_operand.hbm [shape: f32[32,128], index: 3, kind: input, shape index: {}]   ;;  %s6839_s4 = inlined_call_operand.vmem [shape: f32[1,256], index: 4, kind: input, shape index: {}]   ;;  %s6840_s5 = inlined_call_operand.hbm [shape: f32[64,256], index: 5, kind: input, shape index: {}]   ;;  %s6841_s6 = inlined_call_operand.hbm [shape: f32[32,128], index: 6, kind: input, shape index: {}]   ;;  %s6842_s7 = inlined_call_operand.hbm [shape: f32[32,128], index: 7, kind: input, shape index: {}]   ;;  %s6843_s8 = inlined_call_operand.hbm [shape: f32[1,256], index: 8, kind: input, shape index: {}]   ;;  %s6844_s9 = inlined_call_operand.vmem [shape: f32[64,32], index: 9, kind: input, shape index: {}]   ;;  %s6845_s10 = inlined_call_operand.vmem [shape: f32[1,32], index: 10, kind: input, shape index: {}]   ;;  %s6846_s11 = inlined_call_operand.vmem [shape: f32[1,32], index: 11, kind: input, shape index: {}]   ;;  %s6847_s12 = inlined_call_operand.vmem [shape: f32[64,128], index: 12, kind: input, shape index: {}]   ;;  %s6848_s13 = inlined_call_operand.vmem [shape: f32[1,128], index: 13, kind: input, shape index: {}]   ;;  %s6849_s14 = inlined_call_operand.hbm [shape: f32[8,128], index: 14, kind: output, shape index: {0}]   ;;  %s6850_s15 = inlined_call_operand.vmem [shape: f32[8,8,1], index: 15, kind: output, shape index: {1}]  }
   0x1   :  { %6852 = sst [smem:[#allocation22_spill]] %s6849_s14 }
   0x2   :  { %21 = vsyncpa [#allocation5], 0 }
   0x3   :  { %22 = vsyncpa [#allocation8], 0 }
   0x4   :  { %23 = vsyncpa [#allocation11], 0 }
   0x5   :  { %24 = vsyncpa [#allocation14], 0 }
   0x6   :  { %25 = vsyncpa [#allocation6], 0  ;;  %s5744_s18 = smov [#allocation7]   ;;  %s5558_s22 = scalar_lea.hbm %s6837_s2, 512 }
   0x7   :  { %s45_s19 = sshll.u32 %s5744_s18, 4  ;;  %p5559_p0 = scmp.ne.s32.totalorder %s6837_s2, %s5558_s22  ;;  %s46_s19 = int_to_ptr.vmem [resolvable:$true] %s45_s19 }
   0x8   :  { %p5562_p1 = scmp.lt.u32.totalorder %s5558_s22, %s6837_s2 }
   0xa   :  { %p5564_p2 = pnand %p5562_p1, %p5559_p0 }
   0xc   :  { %5567 = shalt.err (!%p5564_p2)
}
   0xd   :  { %s5568_s27 = scalar_lea.vmem %s46_s19, 512  ;;  %p5573_p4 = scmp.lt.s32.totalorder %s46_s19, %s46_s19 }
   0xe   :  { %p5569_p3 = scmp.ne.s32.totalorder %s46_s19, %s5568_s27  ;;  %p5574_p5 = scmp.lt.s32.totalorder %s5568_s27, %s5568_s27 }
  0x10   :  { %p5575_p6 = por %p5574_p5, %p5573_p4 }
  0x12   :  { %p5576_p7 = pnand %p5575_p6, %p5569_p3 }
  0x14   :  { %5579 = shalt.err (!%p5576_p7)
}
  0x15   :  { %s5745_s28 = smov 128   ;;  %s5746_s29 = smov 8  }
  0x16   :  { %51 = dma.hbm_to_vmem [thread:$0]  %s6837_s2, 512, %s46_s19, [#allocation8], %s5745_s28, %s5745_s28, %s5746_s29  }
  0x17   :  { %s5747_s17 = smov [#allocation10]   ;;  %s5748_s20 = smov [#allocation13]  }
  0x18   :  { %s71_s18 = sshll.u32 %s5747_s17, 4  ;;  %s95_s21 = sshll.u32 %s5748_s20, 4  ;;  %s72_s18 = int_to_ptr.vmem [resolvable:$true] %s71_s18  ;;  %s96_s21 = int_to_ptr.vmem [resolvable:$true] %s95_s21 }
  0x19   :  { %s5580_s24 = scalar_lea.hbm %s6840_s5, 2048 }
  0x1a   :  { %p5581_p8 = scmp.ne.s32.totalorder %s6840_s5, %s5580_s24  ;;  %p5584_p9 = scmp.lt.u32.totalorder %s5580_s24, %s6840_s5 }
  0x1c   :  { %p5586_p10 = pnand %p5584_p9, %p5581_p8 }
  0x1e   :  { %5589 = shalt.err (!%p5586_p10)
}
  0x1f   :  { %s5590_s2 = scalar_lea.vmem %s72_s18, 2048  ;;  %p5595_p12 = scmp.lt.s32.totalorder %s72_s18, %s72_s18 }
  0x20   :  { %p5591_p11 = scmp.ne.s32.totalorder %s72_s18, %s5590_s2  ;;  %p5596_p13 = scmp.lt.s32.totalorder %s5590_s2, %s5590_s2 }
  0x22   :  { %p5597_p0 = por %p5596_p13, %p5595_p12 }
  0x24   :  { %p5598_p1 = pnand %p5597_p0, %p5591_p11 }
  0x26   :  { %5601 = shalt.err (!%p5598_p1)
}
  0x27   :  { %s5749_s19 = smov 256   ;;  %s5750_s30 = smov 16  }
  0x28   :  { %77 = dma.hbm_to_vmem [thread:$0]  %s6840_s5, 2048, %s72_s18, [#allocation11], %s5749_s19, %s5749_s19, %s5750_s30  }
  0x29   :  { %s5602_s22 = scalar_lea.hbm %s6842_s7, 512 }
  0x2a   :  { %p5603_p2 = scmp.ne.s32.totalorder %s6842_s7, %s5602_s22  ;;  %p5606_p3 = scmp.lt.u32.totalorder %s5602_s22, %s6842_s7 }
  0x2c   :  { %p5608_p4 = pnand %p5606_p3, %p5603_p2 }
  0x2e   :  { %5611 = shalt.err (!%p5608_p4)
}
  0x2f   :  { %s5612_s27 = scalar_lea.vmem %s96_s21, 512  ;;  %p5617_p6 = scmp.lt.s32.totalorder %s96_s21, %s96_s21 }
  0x30   :  { %p5613_p5 = scmp.ne.s32.totalorder %s96_s21, %s5612_s27  ;;  %p5618_p7 = scmp.lt.s32.totalorder %s5612_s27, %s5612_s27 }
  0x32   :  { %p5619_p8 = por %p5618_p7, %p5617_p6 }
  0x34   :  { %p5620_p9 = pnand %p5619_p8, %p5613_p5 }
  0x36   :  { %5623 = shalt.err (!%p5620_p9)
}
  0x37   :  { %101 = dma.hbm_to_vmem [thread:$0]  %s6842_s7, 512, %s96_s21, [#allocation14], %s5745_s28, %s5745_s28, %s5746_s29  }
  0x38   :  { %s5751_s2 = smov [#allocation4]   ;;  %s5752_s17 = smov [#allocation9]  }
  0x39   :  { %s33_s16 = sshll.u32 %s5751_s2, 4  ;;  %s57_s14 = sshll.u32 %s5752_s17, 4  ;;  %s34_s16 = int_to_ptr.vmem [resolvable:$true] %s33_s16  ;;  %s58_s14 = int_to_ptr.vmem [resolvable:$true] %s57_s14 }
  0x3a   :  { %s5624_s23 = scalar_lea.hbm %s6836_s1, 512 }
  0x3b   :  { %p5625_p10 = scmp.ne.s32.totalorder %s6836_s1, %s5624_s23  ;;  %p5628_p11 = scmp.lt.u32.totalorder %s5624_s23, %s6836_s1 }
  0x3d   :  { %p5630_p12 = pnand %p5628_p11, %p5625_p10 }
  0x3f   :  { %5633 = shalt.err (!%p5630_p12)
}
  0x40   :  { %s5634_s7 = scalar_lea.vmem %s34_s16, 512  ;;  %p5639_p0 = scmp.lt.s32.totalorder %s34_s16, %s34_s16 }
  0x41   :  { %p5635_p13 = scmp.ne.s32.totalorder %s34_s16, %s5634_s7  ;;  %p5640_p1 = scmp.lt.s32.totalorder %s5634_s7, %s5634_s7 }
  0x43   :  { %p5641_p2 = por %p5640_p1, %p5639_p0 }
  0x45   :  { %p5642_p3 = pnand %p5641_p2, %p5635_p13 }
  0x47   :  { %5645 = shalt.err (!%p5642_p3)
}
  0x48   :  { %39 = dma.hbm_to_vmem [thread:$0]  %s6836_s1, 512, %s34_s16, [#allocation5], %s5749_s19, %s5749_s19, %s5750_s30  }
  0x49   :  { %s5646_s17 = scalar_lea.hbm %s6838_s3, 512 }
  0x4a   :  { %p5647_p4 = scmp.ne.s32.totalorder %s6838_s3, %s5646_s17  ;;  %p5650_p5 = scmp.lt.u32.totalorder %s5646_s17, %s6838_s3 }
  0x4c   :  { %p5652_p6 = pnand %p5650_p5, %p5647_p4 }
  0x4e   :  { %5655 = shalt.err (!%p5652_p6)
}
  0x4f   :  { %s5656_s25 = scalar_lea.vmem %s58_s14, 512  ;;  %p5661_p8 = scmp.lt.s32.totalorder %s58_s14, %s58_s14 }
  0x50   :  { %p5657_p7 = scmp.ne.s32.totalorder %s58_s14, %s5656_s25  ;;  %p5662_p9 = scmp.lt.s32.totalorder %s5656_s25, %s5656_s25 }
  0x52   :  { %p5663_p10 = por %p5662_p9, %p5661_p8 }
  0x54   :  { %p5664_p11 = pnand %p5663_p10, %p5657_p7 }
  0x56   :  { %5667 = shalt.err (!%p5664_p11)
}
  0x57   :  { %63 = dma.hbm_to_vmem [thread:$0]  %s6838_s3, 512, %s58_s14, [#allocation8], %s5745_s28, %s5745_s28, %s5746_s29  }
  0x58   :  { %s5753_s30 = smov [#allocation12]   ;;  %s5754_s26 = smov [#allocation15]  }
  0x59   :  { %s83_s16 = sshll.u32 %s5753_s30, 4  ;;  %s108_s27 = sshll.u32 %s5754_s26, 4  ;;  %s84_s16 = int_to_ptr.vmem [resolvable:$true] %s83_s16  ;;  %s109_s27 = int_to_ptr.vmem [resolvable:$true] %s108_s27 }
  0x5a   :  { %s5668_s5 = scalar_lea.hbm %s6841_s6, 512 }
  0x5b   :  { %p5669_p12 = scmp.ne.s32.totalorder %s6841_s6, %s5668_s5  ;;  %p5672_p13 = scmp.lt.u32.totalorder %s5668_s5, %s6841_s6 }
  0x5d   :  { %p5674_p0 = pnand %p5672_p13, %p5669_p12 }
  0x5f   :  { %5677 = shalt.err (!%p5674_p0)
}
  0x60   :  { %s5678_s3 = scalar_lea.vmem %s84_s16, 512  ;;  %p5683_p2 = scmp.lt.s32.totalorder %s84_s16, %s84_s16 }
  0x61   :  { %p5679_p1 = scmp.ne.s32.totalorder %s84_s16, %s5678_s3  ;;  %p5684_p3 = scmp.lt.s32.totalorder %s5678_s3, %s5678_s3 }
  0x63   :  { %p5685_p4 = por %p5684_p3, %p5683_p2 }
  0x65   :  { %p5686_p5 = pnand %p5685_p4, %p5679_p1 }
  0x67   :  { %5689 = shalt.err (!%p5686_p5)
}
  0x68   :  { %89 = dma.hbm_to_vmem [thread:$0]  %s6841_s6, 512, %s84_s16, [#allocation11], %s5745_s28, %s5745_s28, %s5746_s29  }
  0x69   :  { %s5690_s25 = scalar_lea.hbm %s6843_s8, 32 }
  0x6a   :  { %p5691_p6 = scmp.ne.s32.totalorder %s6843_s8, %s5690_s25  ;;  %p5694_p7 = scmp.lt.u32.totalorder %s5690_s25, %s6843_s8 }
  0x6c   :  { %p5696_p8 = pnand %p5694_p7, %p5691_p6 }
  0x6e   :  { %5699 = shalt.err (!%p5696_p8)
}
  0x6f   :  { %s5700_s7 = scalar_lea.vmem %s109_s27, 32  ;;  %p5705_p10 = scmp.lt.s32.totalorder %s109_s27, %s109_s27 }
  0x70   :  { %p5701_p9 = scmp.ne.s32.totalorder %s109_s27, %s5700_s7  ;;  %p5706_p11 = scmp.lt.s32.totalorder %s5700_s7, %s5700_s7 }
  0x72   :  { %p5707_p12 = por %p5706_p11, %p5705_p10 }
  0x74   :  { %p5708_p13 = pnand %p5707_p12, %p5701_p9 }
  0x76   :  { %5711 = shalt.err (!%p5708_p13)
}
  0x77   :  { %111 = dma.hbm_to_vmem [thread:$0]  %s6843_s8, 32, %s109_s27, [#allocation14]  }
  0x78   :  { %5734 = dma.done.wait [#allocation5], 512  }
  0x79   :  { %5735 = vsyncadd [#allocation5], 4294966784 }
  0x7a   :  { %5736 = dma.done.wait [#allocation8], 1024  }
  0x7b   :  { %5737 = vsyncadd [#allocation8], 4294966272 }
  0x7c   :  { %5738 = dma.done.wait [#allocation11], 2560  }
  0x7d   :  { %5739 = vsyncadd [#allocation11], 4294964736 }
  0x7e   :  { %5740 = dma.done.wait [#allocation14], 544  }
  0x7f   :  { %5741 = vsyncadd [#allocation14], 4294966752  ;;  %v5755_v0 = vmov 0.0|0.0   ;;  %v5756_v1 = vmov 0.0   ;;  %vm5757_vm0 = vmmov 0   ;;  %v152_v2 = vld [vmem:[#allocation4 + $0x8] sm:$0xff]  ;;  %v157_v28 = vlaneseq }
  0x80   :  { %5031 = vmatprep.subr.bf16.mxu1 %v5755_v0  ;;  %256 = vmatprep.mubr.f32.mxu0 %v5756_v1  ;;  %v154_v3 = vld [vmem:[#allocation4 + $0x18] sm:$0xff]  ;;  %v325_v4 = vld [vmem:[#allocation7] sm:$0xff]  ;;  %v326_v6 = vld [vmem:[#allocation7 + $0x8] sm:$0xff]  ;;  %vm167_vm1 = vcmask 130048   ;;  %vm329_vm2 = vcmask 261120   ;;  %vm541_vm3 = vcmask 523520  }
  0x81   :  { %4636 = vmatprep.mubr.msk.f32.mxu1 %vm5757_vm0, %v5756_v1  ;;  %v5027_v5 = vpack.c.bf16 %v154_v3, %v152_v2  ;;  %v151_v7 = vld [vmem:[#allocation4] sm:$0xff]  ;;  %v153_v8 = vld [vmem:[#allocation4 + $0x10] sm:$0xff]  ;;  %v5947_v9 = vpack.c.bf16 %v326_v6, %v325_v4  ;;  %v328_v12 = vld [vmem:[#allocation7 + $0x18] sm:$0xff]  ;;  %v6019_v29 = vshrl.u32 %v157_v28, 7  ;;  %vm2115_vm4 = vcmask 523264   ;;  %s5760_s1 = smov [#allocation16]  }
  0x82   :  { %v5029_v10 = vpack.c.bf16 %v153_v8, %v151_v7  ;;  %v327_v11 = vld [vmem:[#allocation7 + $0x10] sm:$0xff]  ;;  %v143_v13 = vld [vmem:[%s6835_s0] sm:$0xff]  ;;  %v409_v16 = vld [vmem:[#allocation9 + $0x8] sm:$0xff]  ;;  %vm4237_vm5 = vcmask 7168   ;;  %s4364_s19 = sshll.u32 %s5760_s1, 4  ;;  %s4365_s19 = int_to_ptr.vmem [resolvable:$true] %s4364_s19 }
  0x83   :  { %5028 = vmatprep.subr.bf16.mxu0 %v5027_v5  ;;  %5033 = vmatpush3.bf16.msra.mxu1 %v5947_v9  ;;  %v5953_v14 = vpack.c.bf16 %v328_v12, %v327_v11  ;;  %v408_v15 = vld [vmem:[#allocation9] sm:$0xff]  ;;  %v144_v17 = vld [vmem:[%s6835_s0 + $0x8] sm:$0xff]  ;;  %v410_v19 = vld [vmem:[#allocation9 + $0x10] sm:$0xff]  ;;  %v159_v30 = vsub.s32 0, %v6019_v29  ;;  %v163_v32 = vsub.s32 1, %v6019_v29  ;;  %p5717_p1 = scmp.lt.s32.totalorder %s4365_s19, %s4365_s19 }
  0x84   :  { %5030 = vmatpush1.bf16.msra.mxu0 %v5029_v10  ;;  %5034 = vmatprep.subr.bf16.mxu1 %v5755_v0  ;;  %v5963_v18 = vpack.c.bf16 %v409_v16, %v408_v15  ;;  %v411_v20 = vld [vmem:[#allocation9 + $0x18] sm:$0xff]  ;;  %v145_v21 = vld [vmem:[%s6835_s0 + $0x10] sm:$0xff]  ;;  %v147_v24 = vld [vmem:[%s6835_s0 + $0x20] sm:$0xff] }
  0x85   :  { %5055 = vmatprep.subr.bf16.mxu0 %v5755_v0  ;;  %v5975_v22 = vpack.c.bf16 %v411_v20, %v410_v19  ;;  %v146_v23 = vld [vmem:[%s6835_s0 + $0x18] sm:$0xff]  ;;  %v148_v25 = vld [vmem:[%s6835_s0 + $0x28] sm:$0xff]  ;;  %v149_v26 = vld [vmem:[%s6835_s0 + $0x30] sm:$0xff] }
  0x86   :  { %v150_v27 = vld [vmem:[%s6835_s0 + $0x38] sm:$0xff]  ;;  %v155_v31 = vld [vmem:[%s6839_s4] sm:$0x3]  ;;  %s5758_s0 = smov 64   ;;  %s5759_s4 = smov 32  }
  0x87   :  { %4387 = vmatmul.mubr.msk.f32.vlgmr.msra.gmra.mrb[0].mxu0 %vm167_vm1, %v143_v13  ;;  %5036 = vmatpush3.bf16.msra.mxu1 %v5953_v14  ;;  %v160_v33 = vrot.slane %v155_v31, %v159_v30  ;;  %v164_v34 = vrot.slane %v155_v31, %v163_v32 }
  0x88   :  { %262 = vmatprep.mubr.f32.mxu0 %v5756_v1  ;;  %5037 = vmatprep.subr.bf16.mxu1 %v5755_v0 }
  0x89   :  { %5057 = vmatpush3.bf16.msra.mxu0 %v5947_v9 }
  0x8a   :  { %5058 = vmatprep.subr.bf16.mxu0 %v5755_v0  ;;  %4637 = vmatmul.mubr.f32.vlgmr.msra.gmra.mrb[0].mxu1 %v5756_v1 }
  0x8b   :  { %4388 = vmatmul.mubr.msk.f32.gmra.mrb[2].mxu0 %vm167_vm1, %v144_v17  ;;  %5039 = vmatpush3.bf16.msra.mxu1 %v5963_v18 }
  0x8c   :  { %268 = vmatprep.mubr.f32.mxu0 %v5756_v1  ;;  %5040 = vmatprep.subr.bf16.mxu1 %v5755_v0 }
  0x8d   :  { %4647 = vmatprep.mubr.msk.f32.mxu1 %vm5757_vm0, %v5756_v1  ;;  %5060 = vmatpush3.bf16.msra.mxu0 %v5953_v14 }
  0x8e   :  { %5067 = vmatprep.subr.bf16.mxu0 %v5755_v0 }
  0x8f   :  { %4389 = vmatmul.mubr.msk.f32.gmra.mrb[4].mxu0 %vm167_vm1, %v145_v21  ;;  %5042 = vmatpush3.bf16.msra.mxu1 %v5975_v22 }
  0x90   :  { %274 = vmatprep.mubr.f32.mxu0 %v5756_v1  ;;  %5043 = vmatprep.subr.bf16.mxu1 %v5755_v0 }
  0x92   :  { %4648 = vmatmul.mubr.f32.vlgmr.msra.gmra.mrb[2].mxu1 %v5756_v1 }
  0x93   :  { %4390 = vmatmul.mubr.msk.f32.gmra.mrb[6].mxu0 %vm167_vm1, %v146_v23  ;;  %5045 = vmatpush3.bf16.msra.mxu1 %v5947_v9 }
  0x94   :  { %280 = vmatprep.mubr.f32.mxu0 %v5756_v1  ;;  %5046 = vmatprep.subr.bf16.mxu1 %v5755_v0 }
  0x95   :  { %4658 = vmatprep.mubr.msk.f32.mxu1 %vm5757_vm0, %v5756_v1 }
  0x97   :  { %4391 = vmatmul.mubr.msk.f32.gmra.mrb[8].mxu0 %vm167_vm1, %v147_v24  ;;  %5048 = vmatpush3.bf16.msra.mxu1 %v5953_v14 }
  0x98   :  { %286 = vmatprep.mubr.f32.mxu0 %v5756_v1  ;;  %5049 = vmatprep.subr.bf16.mxu1 %v5755_v0 }
  0x9b   :  { %4392 = vmatmul.mubr.msk.f32.gmra.mrb[10].mxu0 %vm167_vm1, %v148_v25 }
  0x9c   :  { %292 = vmatprep.mubr.f32.mxu0 %v5756_v1 }
  0x9f   :  { %4393 = vmatmul.mubr.msk.f32.gmra.mrb[12].mxu0 %vm167_vm1, %v149_v26 }
  0xa0   :  { %298 = vmatprep.mubr.f32.mxu0 %v5756_v1 }
  0xa3   :  { %4394 = vmatmul.mubr.msk.f32.gmra.mrb[14].mxu0 %vm167_vm1, %v150_v27 }
  0xa4   :  { %4680 = vmatprep.mubr.msk.f32.mxu0 %vm5757_vm0, %v5756_v1 }
 0x15a   :  { %v258_v35 = vpop.f32.mrb[0].mxu0 }
 0x15b   :  { %v259_v36 = vadd.f32 %v258_v35, %v160_v33  ;;  %v260_v37 = vpop.f32.mrb[1].mxu0 }
 0x15c   :  { %v6030_v38 = vadd.f32 %v260_v37, %v164_v34 }
 0x15d   :  { %v399_v39 = vpop.f32.mrb[0].mxu1 }
 0x15e   :  { %v264_v40 = vpop.f32.mrb[2].mxu0  ;;  %v403_v41 = vadd.f32 %v399_v39, %v259_v36  ;;  %v4638_v44 = vpop.f32.mrb[1].mxu1 }
 0x15f   :  { %v6032_v42 = vadd.f32 %v264_v40, %v160_v33  ;;  %v266_v43 = vpop.f32.mrb[3].mxu0 }
 0x160   :  { %v6034_v45 = vadd.f32 %v266_v43, %v164_v34  ;;  %5284 = vtanh.f32 %v403_v41  ;;  %v483_v15 = vsub.f32 0.0, %v403_v41 }
 0x162   :  { %v270_v46 = vpop.f32.mrb[4].mxu0  ;;  %v484_v16 = vmul.f32 1.442695, %v483_v15 }
 0x163   :  { %v6036_v47 = vadd.f32 %v270_v46, %v160_v33  ;;  %v272_v48 = vpop.f32.mrb[5].mxu0 }
 0x164   :  { %v6038_v49 = vadd.f32 %v272_v48, %v164_v34 }
 0x165   :  { %v478_v51 = vpop.f32.mrb[2].mxu1 }
 0x166   :  { %v276_v50 = vpop.f32.mrb[6].mxu0  ;;  %v4649_v54 = vpop.f32.mrb[3].mxu1 }
 0x167   :  { %v6040_v52 = vadd.f32 %v276_v50, %v160_v33  ;;  %v278_v53 = vpop.f32.mrb[7].mxu0 }
 0x168   :  { %v6042_v55 = vadd.f32 %v278_v53, %v164_v34 }
 0x16a   :  { %v282_v56 = vpop.f32.mrb[8].mxu0  ;;  %v5285_v57 = vpop.eup %5284 }
 0x16b   :  { %v6044_v58 = vadd.f32 %v282_v56, %v160_v33  ;;  %v284_v59 = vpop.f32.mrb[9].mxu0  ;;  %492 = vrot.lane.b32.xlu0 %v5285_v57, %s5758_s0 }
 0x16c   :  { %v6046_v60 = vadd.f32 %v284_v59, %v164_v34 }
 0x16e   :  { %v288_v61 = vpop.f32.mrb[10].mxu0 }
 0x16f   :  { %v6049_v62 = vadd.f32 %v288_v61, %v160_v33  ;;  %v290_v63 = vpop.f32.mrb[11].mxu0 }
 0x170   :  { %v6051_v2 = vadd.f32 %v290_v63, %v164_v34 }
 0x172   :  { %v294_v3 = vpop.f32.mrb[12].mxu0 }
 0x173   :  { %v6053_v4 = vadd.f32 %v294_v3, %v160_v33  ;;  %v296_v5 = vpop.f32.mrb[13].mxu0 }
 0x174   :  { %v6055_v6 = vadd.f32 %v296_v5, %v164_v34 }
 0x176   :  { %v300_v7 = vpop.f32.mrb[14].mxu0 }
 0x177   :  { %v6057_v8 = vadd.f32 %v300_v7, %v160_v33  ;;  %v302_v10 = vpop.f32.mrb[15].mxu0 }
 0x178   :  { %v303_v11 = vadd.f32 %v302_v10, %v164_v34 }
 0x17a   :  { %v482_v12 = vadd.f32 %v478_v51, %v303_v11 }
 0x17c   :  { %5286 = vtanh.f32 %v482_v12  ;;  %v507_v20 = vsub.f32 0.0, %v482_v12 }
 0x17d   :  { %5288 = vpow2.f32 %v484_v16 }
 0x17e   :  { %v508_v21 = vmul.f32 1.442695, %v507_v20 }
 0x186   :  { %v5287_v13 = vpop.eup %5286 }
 0x187   :  { %516 = vrot.lane.b32.xlu0 %v5287_v13, %s5758_s0  ;;  %v5289_v17 = vpop.eup %5288 }
 0x188   :  { %v486_v19 = vadd.f32 1.0, %v5289_v17 }
 0x18a   :  { %5290 = vrcp.f32 %v486_v19 }
 0x18b   :  { %5292 = vpow2.f32 %v508_v21 }
 0x194   :  { %v5291_v23 = vpop.eup %5290 }
 0x195   :  { %v5293_v26 = vpop.eup %5292  ;;  %v490_v34 = vmul.f32 0.0, %v5291_v23 }
 0x196   :  { %v510_v27 = vadd.f32 1.0, %v5293_v26 }
 0x198   :  { %5294 = vrcp.f32 %v510_v27 }
 0x1a2   :  { %v5295_v28 = vpop.eup %5294 }
 0x1a3   :  { %v514_v39 = vmul.f32 0.0, %v5295_v28 }
 0x1dd   :  { %v493_v24 = vpop.permute.xlu0 %492 }
 0x1de   :  { %v495_v25 = vmul.f32 %v5291_v23, %v493_v24 }
 0x1e0   :  { %497 = vrot.lane.b32.xlu1 %v495_v25, %s5759_s4 }
 0x1f9   :  { %v517_v31 = vpop.permute.xlu0 %516 }
 0x1fa   :  { %v519_v33 = vmul.f32 %v5295_v28, %v517_v31 }
 0x1fc   :  { %521 = vrot.lane.b32.xlu1 %v519_v33, %s5759_s4 }
 0x252   :  { %v498_v35 = vpop.permute.xlu1 %497 }
 0x253   :  { %v6062_v36 = vadd.f32 %v498_v35, %v490_v34 }
 0x255   :  { %5296 = vtanh.f32 %v6062_v36 }
 0x25f   :  { %v5297_v37 = vpop.eup %5296 }
 0x260   :  { %503 = vrot.lane.b32.xlu0 %v5297_v37, %s5758_s0 }
 0x26e   :  { %v522_v40 = vpop.permute.xlu1 %521 }
 0x26f   :  { %v6066_v41 = vadd.f32 %v522_v40, %v514_v39 }
 0x271   :  { %5298 = vtanh.f32 %v6066_v41 }
 0x27b   :  { %v5299_v43 = vpop.eup %5298 }
 0x27c   :  { %527 = vrot.lane.b32.xlu1 %v5299_v43, %s5758_s0 }
 0x2d2   :  { %v504_v44 = vpop.permute.xlu0 %503 }
 0x2d3   :  { %v506_v46 = vmul.f32 %v5291_v23, %v504_v44 }
 0x2d5   :  { %532 = vrot.lane.b32.xlu0 %v506_v46, %s5759_s4 }
 0x2ee   :  { %v528_v48 = vpop.permute.xlu1 %527 }
 0x2ef   :  { %v6071_v50 = vmul.f32 %v5295_v28, %v528_v48 }
 0x2f1   :  { %632 = vrot.lane.b32.xlu1 %v6071_v50, %s5759_s4 }
 0x347   :  { %v533_v51 = vpop.permute.xlu0 %532 }
 0x348   :  { %535 = vst.msk [vmem:[#allocation2] sm:$0xff] %vm329_vm2, %v533_v51  ;;  %4659 = vmatmul.mubr.msk.f32.vlgmr.msra.gmra.mrb[4].mxu1 %vm329_vm2, %v533_v51 }
 0x349   :  { %5051 = vmatpush3.bf16.msra.mxu1 %v5963_v18  ;;  %4669 = vmatprep.mubr.msk.f32.mxu1 %vm5757_vm0, %v5756_v1 }
 0x34a   :  { %5052 = vmatprep.subr.bf16.mxu1 %v5755_v0 }
 0x34d   :  { %5054 = vmatpush3.bf16.msra.mxu1 %v5975_v22 }
 0x34e   :  { %5061 = vmatprep.subr.bf16.mxu1 %v5755_v0 }
 0x363   :  { %v633_v53 = vpop.permute.xlu1 %632 }
 0x364   :  { %4670 = vmatmul.mubr.msk.f32.vlgmr.msra.gmra.mrb[6].mxu1 %vm329_vm2, %v633_v53 }
 0x365   :  { %5063 = vmatpush3.bf16.msra.mxu1 %v5963_v18  ;;  %4691 = vmatprep.mubr.msk.f32.mxu1 %vm5757_vm0, %v5756_v1 }
 0x366   :  { %5064 = vmatprep.subr.bf16.mxu1 %v5755_v0 }
 0x369   :  { %5066 = vmatpush3.bf16.msra.mxu1 %v5975_v22 }
 0x36a   :  { %5073 = vmatprep.subr.bf16.mxu1 %v5755_v0 }
 0x41b   :  { %v619_v54 = vpop.f32.mrb[4].mxu1 }
 0x41c   :  { %v623_v56 = vadd.f32 %v619_v54, %v6032_v42  ;;  %v4660_v57 = vpop.f32.mrb[5].mxu1 }
 0x41e   :  { %5300 = vtanh.f32 %v623_v56  ;;  %v707_v7 = vsub.f32 0.0, %v623_v56 }
 0x420   :  { %v708_v10 = vmul.f32 1.442695, %v707_v7 }
 0x428   :  { %v5301_v59 = vpop.eup %5300 }
 0x429   :  { %716 = vrot.lane.b32.xlu1 %v5301_v59, %s5758_s0 }
 0x437   :  { %v702_v61 = vpop.f32.mrb[6].mxu1 }
 0x438   :  { %v706_v63 = vadd.f32 %v702_v61, %v6055_v6  ;;  %v4671_v3 = vpop.f32.mrb[7].mxu1 }
 0x43a   :  { %5302 = vtanh.f32 %v706_v63  ;;  %v731_v42 = vsub.f32 0.0, %v706_v63 }
 0x43b   :  { %5304 = vpow2.f32 %v708_v10 }
 0x43c   :  { %v732_v13 = vmul.f32 1.442695, %v731_v42 }
 0x444   :  { %v5303_v5 = vpop.eup %5302 }
 0x445   :  { %740 = vrot.lane.b32.xlu0 %v5303_v5, %s5758_s0  ;;  %v5305_v11 = vpop.eup %5304 }
 0x446   :  { %v710_v12 = vadd.f32 1.0, %v5305_v11 }
 0x448   :  { %5306 = vrcp.f32 %v710_v12 }
 0x449   :  { %5308 = vpow2.f32 %v732_v13 }
 0x452   :  { %v5307_v15 = vpop.eup %5306 }
 0x453   :  { %v5309_v6 = vpop.eup %5308  ;;  %v714_v24 = vmul.f32 %v5307_v15, %v6062_v36 }
 0x454   :  { %v734_v19 = vadd.f32 1.0, %v5309_v6 }
 0x456   :  { %5310 = vrcp.f32 %v734_v19 }
 0x460   :  { %v5311_v20 = vpop.eup %5310 }
 0x461   :  { %v738_v28 = vmul.f32 %v5311_v20, %v6066_v41 }
 0x49b   :  { %v717_v16 = vpop.permute.xlu1 %716 }
 0x49c   :  { %v719_v17 = vmul.f32 %v5307_v15, %v717_v16 }
 0x49e   :  { %721 = vrot.lane.b32.xlu1 %v719_v17, %s5759_s4 }
 0x4b7   :  { %v741_v21 = vpop.permute.xlu0 %740 }
 0x4b8   :  { %v743_v23 = vmul.f32 %v5311_v20, %v741_v21 }
 0x4ba   :  { %745 = vrot.lane.b32.xlu0 %v743_v23, %s5759_s4 }
 0x510   :  { %v722_v25 = vpop.permute.xlu1 %721 }
 0x511   :  { %v6097_v26 = vadd.f32 %v722_v25, %v714_v24 }
 0x513   :  { %5312 = vtanh.f32 %v6097_v26 }
 0x51d   :  { %v5313_v27 = vpop.eup %5312 }
 0x51e   :  { %727 = vrot.lane.b32.xlu1 %v5313_v27, %s5758_s0 }
 0x52c   :  { %v746_v31 = vpop.permute.xlu0 %745 }
 0x52d   :  { %v6102_v33 = vadd.f32 %v746_v31, %v738_v28 }
 0x52f   :  { %5314 = vtanh.f32 %v6102_v33 }
 0x539   :  { %v5315_v34 = vpop.eup %5314 }
 0x53a   :  { %751 = vrot.lane.b32.xlu0 %v5315_v34, %s5758_s0 }
 0x590   :  { %v728_v35 = vpop.permute.xlu1 %727 }
 0x591   :  { %v730_v36 = vmul.f32 %v5307_v15, %v728_v35 }
 0x593   :  { %756 = vrot.lane.b32.xlu1 %v730_v36, %s5759_s4 }
 0x5ac   :  { %v752_v37 = vpop.permute.xlu0 %751 }
 0x5ad   :  { %v6107_v39 = vmul.f32 %v5311_v20, %v752_v37 }
 0x5af   :  { %856 = vrot.lane.b32.xlu0 %v6107_v39, %s5759_s4 }
 0x605   :  { %v757_v40 = vpop.permute.xlu1 %756 }
 0x606   :  { %760 = vst.msk [vmem:[#allocation2 + $0x8] sm:$0xff] %vm329_vm2, %v757_v40  ;;  %4681 = vmatmul.mubr.msk.f32.vlgmr.msra.gmra.mrb[16].mxu0 %vm329_vm2, %v757_v40 }
 0x607   :  { %5069 = vmatpush3.bf16.msra.mxu0 %v5947_v9  ;;  %4702 = vmatprep.mubr.msk.f32.mxu0 %vm5757_vm0, %v5756_v1 }
 0x608   :  { %5070 = vmatprep.subr.bf16.mxu0 %v5755_v0 }
 0x60b   :  { %5072 = vmatpush3.bf16.msra.mxu0 %v5953_v14 }
 0x60c   :  { %5079 = vmatprep.subr.bf16.mxu0 %v5755_v0 }
 0x621   :  { %v857_v41 = vpop.permute.xlu0 %856 }
 0x622   :  { %4692 = vmatmul.mubr.msk.f32.vlgmr.msra.gmra.mrb[8].mxu1 %vm329_vm2, %v857_v41 }
 0x623   :  { %5075 = vmatpush3.bf16.msra.mxu1 %v5963_v18  ;;  %4713 = vmatprep.mubr.msk.f32.mxu1 %vm5757_vm0, %v5756_v1 }
 0x624   :  { %5076 = vmatprep.subr.bf16.mxu1 %v5755_v0 }
 0x627   :  { %5078 = vmatpush3.bf16.msra.mxu1 %v5975_v22 }
 0x628   :  { %5085 = vmatprep.subr.bf16.mxu1 %v5755_v0 }
 0x6d9   :  { %v843_v43 = vpop.f32.mrb[16].mxu0 }
 0x6da   :  { %v847_v44 = vadd.f32 %v843_v43, %v6036_v47  ;;  %v4682_v46 = vpop.f32.mrb[17].mxu0 }
 0x6dc   :  { %5316 = vtanh.f32 %v847_v44  ;;  %v931_v57 = vsub.f32 0.0, %v847_v44 }
 0x6de   :  { %v932_v59 = vmul.f32 1.442695, %v931_v57 }
 0x6e6   :  { %v5317_v48 = vpop.eup %5316 }
 0x6e7   :  { %940 = vrot.lane.b32.xlu1 %v5317_v48, %s5758_s0 }
 0x6f5   :  { %v926_v51 = vpop.f32.mrb[8].mxu1 }
 0x6f6   :  { %v930_v53 = vadd.f32 %v926_v51, %v6051_v2  ;;  %v4693_v54 = vpop.f32.mrb[9].mxu1 }
 0x6f8   :  { %5318 = vtanh.f32 %v930_v53  ;;  %v955_v47 = vsub.f32 0.0, %v930_v53 }
 0x6f9   :  { %5320 = vpow2.f32 %v932_v59 }
 0x6fa   :  { %v956_v3 = vmul.f32 1.442695, %v955_v47 }
 0x702   :  { %v5319_v56 = vpop.eup %5318 }
 0x703   :  { %964 = vrot.lane.b32.xlu0 %v5319_v56, %s5758_s0  ;;  %v5321_v61 = vpop.eup %5320 }
 0x704   :  { %v934_v63 = vadd.f32 1.0, %v5321_v61 }
 0x706   :  { %5322 = vrcp.f32 %v934_v63 }
 0x707   :  { %5324 = vpow2.f32 %v956_v3 }
 0x710   :  { %v5323_v5 = vpop.eup %5322 }
 0x711   :  { %v5325_v2 = vpop.eup %5324  ;;  %v938_v15 = vmul.f32 %v5323_v5, %v6097_v26 }
 0x712   :  { %v958_v11 = vadd.f32 1.0, %v5325_v2 }
 0x714   :  { %5326 = vrcp.f32 %v958_v11 }
 0x71e   :  { %v5327_v12 = vpop.eup %5326 }
 0x71f   :  { %v962_v19 = vmul.f32 %v5327_v12, %v6102_v33 }
 0x759   :  { %v941_v7 = vpop.permute.xlu1 %940 }
 0x75a   :  { %v943_v10 = vmul.f32 %v5323_v5, %v941_v7 }
 0x75c   :  { %945 = vrot.lane.b32.xlu1 %v943_v10, %s5759_s4 }
 0x775   :  { %v965_v42 = vpop.permute.xlu0 %964 }
 0x776   :  { %v967_v13 = vmul.f32 %v5327_v12, %v965_v42 }
 0x778   :  { %969 = vrot.lane.b32.xlu0 %v967_v13, %s5759_s4 }
 0x7ce   :  { %v946_v16 = vpop.permute.xlu1 %945 }
 0x7cf   :  { %v6133_v17 = vadd.f32 %v946_v16, %v938_v15 }
 0x7d1   :  { %5328 = vtanh.f32 %v6133_v17 }
 0x7db   :  { %v5329_v6 = vpop.eup %5328 }
 0x7dc   :  { %951 = vrot.lane.b32.xlu1 %v5329_v6, %s5758_s0 }
 0x7ea   :  { %v970_v20 = vpop.permute.xlu0 %969 }
 0x7eb   :  { %v6138_v21 = vadd.f32 %v970_v20, %v962_v19 }
 0x7ed   :  { %5330 = vtanh.f32 %v6138_v21 }
 0x7f7   :  { %v5331_v23 = vpop.eup %5330 }
 0x7f8   :  { %975 = vrot.lane.b32.xlu0 %v5331_v23, %s5758_s0 }
 0x84e   :  { %v952_v24 = vpop.permute.xlu1 %951 }
 0x84f   :  { %v954_v25 = vmul.f32 %v5323_v5, %v952_v24 }
 0x851   :  { %980 = vrot.lane.b32.xlu1 %v954_v25, %s5759_s4 }
 0x86a   :  { %v976_v26 = vpop.permute.xlu0 %975 }
 0x86b   :  { %v6143_v27 = vmul.f32 %v5327_v12, %v976_v26 }
 0x86d   :  { %1080 = vrot.lane.b32.xlu0 %v6143_v27, %s5759_s4 }
 0x8c3   :  { %v981_v28 = vpop.permute.xlu1 %980 }
 0x8c4   :  { %984 = vst.msk [vmem:[#allocation2 + $0x10] sm:$0xff] %vm329_vm2, %v981_v28  ;;  %4703 = vmatmul.mubr.msk.f32.vlgmr.msra.gmra.mrb[18].mxu0 %vm329_vm2, %v981_v28 }
 0x8c5   :  { %5081 = vmatpush3.bf16.msra.mxu0 %v5947_v9  ;;  %4724 = vmatprep.mubr.msk.f32.mxu0 %vm5757_vm0, %v5756_v1 }
 0x8c6   :  { %5082 = vmatprep.subr.bf16.mxu0 %v5755_v0 }
 0x8c9   :  { %5084 = vmatpush3.bf16.msra.mxu0 %v5953_v14 }
 0x8ca   :  { %5091 = vmatprep.subr.bf16.mxu0 %v5755_v0 }
 0x8df   :  { %v1081_v31 = vpop.permute.xlu0 %1080 }
 0x8e0   :  { %4714 = vmatmul.mubr.msk.f32.vlgmr.msra.gmra.mrb[10].mxu1 %vm329_vm2, %v1081_v31 }
 0x8e1   :  { %5087 = vmatpush3.bf16.msra.mxu1 %v5963_v18  ;;  %4735 = vmatprep.mubr.msk.f32.mxu1 %vm5757_vm0, %v5756_v1 }
 0x8e2   :  { %5088 = vmatprep.subr.bf16.mxu1 %v5755_v0 }
 0x8e5   :  { %5090 = vmatpush3.bf16.msra.mxu1 %v5975_v22 }
 0x8e6   :  { %5097 = vmatprep.subr.bf16.mxu1 %v5755_v0 }
 0x997   :  { %v1067_v33 = vpop.f32.mrb[18].mxu0 }
 0x998   :  { %v1071_v34 = vadd.f32 %v1067_v33, %v6040_v52  ;;  %v4704_v35 = vpop.f32.mrb[19].mxu0 }
 0x99a   :  { %5332 = vtanh.f32 %v1071_v34  ;;  %v1155_v44 = vsub.f32 0.0, %v1071_v34 }
 0x99c   :  { %v1156_v46 = vmul.f32 1.442695, %v1155_v44 }
 0x9a4   :  { %v5333_v36 = vpop.eup %5332 }
 0x9a5   :  { %1164 = vrot.lane.b32.xlu1 %v5333_v36, %s5758_s0 }
 0x9b3   :  { %v1150_v37 = vpop.f32.mrb[10].mxu1 }
 0x9b4   :  { %v1154_v40 = vadd.f32 %v1150_v37, %v6046_v60  ;;  %v4715_v41 = vpop.f32.mrb[11].mxu1 }
 0x9b6   :  { %5334 = vtanh.f32 %v1154_v40  ;;  %v1179_v52 = vsub.f32 0.0, %v1154_v40 }
 0x9b7   :  { %5336 = vpow2.f32 %v1156_v46 }
 0x9b8   :  { %v1180_v53 = vmul.f32 1.442695, %v1179_v52 }
 0x9c0   :  { %v5335_v43 = vpop.eup %5334 }
 0x9c1   :  { %1188 = vrot.lane.b32.xlu0 %v5335_v43, %s5758_s0  ;;  %v5337_v48 = vpop.eup %5336 }
 0x9c2   :  { %v1158_v51 = vadd.f32 1.0, %v5337_v48 }
 0x9c4   :  { %5338 = vrcp.f32 %v1158_v51 }
 0x9c5   :  { %5340 = vpow2.f32 %v1180_v53 }
 0x9ce   :  { %v5339_v54 = vpop.eup %5338 }
 0x9cf   :  { %v5341_v60 = vpop.eup %5340  ;;  %v1162_v3 = vmul.f32 %v5339_v54, %v6133_v17 }
 0x9d0   :  { %v1182_v59 = vadd.f32 1.0, %v5341_v60 }
 0x9d2   :  { %5342 = vrcp.f32 %v1182_v59 }
 0x9dc   :  { %v5343_v61 = vpop.eup %5342 }
 0x9dd   :  { %v1186_v2 = vmul.f32 %v5343_v61, %v6138_v21 }
 0xa17   :  { %v1165_v56 = vpop.permute.xlu1 %1164 }
 0xa18   :  { %v1167_v57 = vmul.f32 %v5339_v54, %v1165_v56 }
 0xa1a   :  { %1169 = vrot.lane.b32.xlu1 %v1167_v57, %s5759_s4 }
 0xa33   :  { %v1189_v63 = vpop.permute.xlu0 %1188 }
 0xa34   :  { %v1191_v47 = vmul.f32 %v5343_v61, %v1189_v63 }
 0xa36   :  { %1193 = vrot.lane.b32.xlu0 %v1191_v47, %s5759_s4 }
 0xa8c   :  { %v1170_v5 = vpop.permute.xlu1 %1169 }
 0xa8d   :  { %v6169_v7 = vadd.f32 %v1170_v5, %v1162_v3 }
 0xa8f   :  { %5344 = vtanh.f32 %v6169_v7 }
 0xa99   :  { %v5345_v10 = vpop.eup %5344 }
 0xa9a   :  { %1175 = vrot.lane.b32.xlu1 %v5345_v10, %s5758_s0 }
 0xaa8   :  { %v1194_v11 = vpop.permute.xlu0 %1193 }
 0xaa9   :  { %v6174_v12 = vadd.f32 %v1194_v11, %v1186_v2 }
 0xaab   :  { %5346 = vtanh.f32 %v6174_v12 }
 0xab5   :  { %v5347_v42 = vpop.eup %5346 }
 0xab6   :  { %1199 = vrot.lane.b32.xlu0 %v5347_v42, %s5758_s0 }
 0xb0c   :  { %v1176_v13 = vpop.permute.xlu1 %1175 }
 0xb0d   :  { %v1178_v15 = vmul.f32 %v5339_v54, %v1176_v13 }
 0xb0f   :  { %1204 = vrot.lane.b32.xlu1 %v1178_v15, %s5759_s4 }
 0xb28   :  { %v1200_v16 = vpop.permute.xlu0 %1199 }
 0xb29   :  { %v6179_v17 = vmul.f32 %v5343_v61, %v1200_v16 }
 0xb2b   :  { %1298 = vrot.lane.b32.xlu0 %v6179_v17, %s5759_s4 }
 0xb81   :  { %v1205_v6 = vpop.permute.xlu1 %1204 }
 0xb82   :  { %1208 = vst.msk [vmem:[#allocation2 + $0x18] sm:$0xff] %vm329_vm2, %v1205_v6  ;;  %4725 = vmatmul.mubr.msk.f32.vlgmr.msra.gmra.mrb[20].mxu0 %vm329_vm2, %v1205_v6 }
 0xb83   :  { %5093 = vmatpush3.bf16.msra.mxu0 %v5947_v9  ;;  %4746 = vmatprep.mubr.msk.f32.mxu0 %vm5757_vm0, %v5756_v1 }
 0xb84   :  { %5094 = vmatprep.subr.bf16.mxu0 %v5755_v0 }
 0xb87   :  { %5096 = vmatpush3.bf16.msra.mxu0 %v5953_v14 }
 0xb88   :  { %5103 = vmatprep.subr.bf16.mxu0 %v5755_v0 }
 0xb9d   :  { %v1299_v19 = vpop.permute.xlu0 %1298 }
 0xb9e   :  { %4736 = vmatmul.mubr.msk.f32.vlgmr.msra.gmra.mrb[12].mxu1 %vm329_vm2, %v1299_v19 }
 0xb9f   :  { %5099 = vmatpush3.bf16.msra.mxu1 %v5963_v18  ;;  %4757 = vmatprep.mubr.msk.f32.mxu1 %vm5757_vm0, %v5756_v1 }
 0xba0   :  { %5100 = vmatprep.subr.bf16.mxu1 %v5755_v0 }
 0xba3   :  { %5102 = vmatpush3.bf16.msra.mxu1 %v5975_v22 }
 0xba4   :  { %5109 = vmatprep.subr.bf16.mxu1 %v5755_v0 }
 0xc55   :  { %v1288_v20 = vpop.f32.mrb[20].mxu0 }
 0xc56   :  { %v1292_v21 = vadd.f32 %v1288_v20, %v6044_v58  ;;  %v4726_v23 = vpop.f32.mrb[21].mxu0 }
 0xc58   :  { %5348 = vtanh.f32 %v1292_v21  ;;  %v1373_v33 = vsub.f32 0.0, %v1292_v21 }
 0xc5a   :  { %v1374_v34 = vmul.f32 1.442695, %v1373_v33 }
 0xc62   :  { %v5349_v24 = vpop.eup %5348 }
 0xc63   :  { %1382 = vrot.lane.b32.xlu1 %v5349_v24, %s5758_s0 }
 0xc71   :  { %v1368_v25 = vpop.f32.mrb[12].mxu1 }
 0xc72   :  { %v1372_v26 = vadd.f32 %v1368_v25, %v6042_v55  ;;  %v4737_v28 = vpop.f32.mrb[13].mxu1 }
 0xc74   :  { %5350 = vtanh.f32 %v1372_v26  ;;  %v1397_v58 = vsub.f32 0.0, %v1372_v26 }
 0xc75   :  { %5352 = vpow2.f32 %v1374_v34 }
 0xc76   :  { %v1398_v37 = vmul.f32 1.442695, %v1397_v58 }
 0xc7e   :  { %v5351_v31 = vpop.eup %5350 }
 0xc7f   :  { %1406 = vrot.lane.b32.xlu0 %v5351_v31, %s5758_s0  ;;  %v5353_v35 = vpop.eup %5352 }
 0xc80   :  { %v1376_v36 = vadd.f32 1.0, %v5353_v35 }
 0xc82   :  { %5354 = vrcp.f32 %v1376_v36 }
 0xc83   :  { %5356 = vpow2.f32 %v1398_v37 }
 0xc8c   :  { %v5355_v40 = vpop.eup %5354 }
 0xc8d   :  { %v5357_v55 = vpop.eup %5356  ;;  %v1380_v52 = vmul.f32 %v5355_v40, %v6169_v7 }
 0xc8e   :  { %v1400_v44 = vadd.f32 1.0, %v5357_v55 }
 0xc90   :  { %5358 = vrcp.f32 %v1400_v44 }
 0xc9a   :  { %v5359_v46 = vpop.eup %5358 }
 0xc9b   :  { %v1404_v57 = vmul.f32 %v5359_v46, %v6174_v12 }
 0xcd5   :  { %v1383_v41 = vpop.permute.xlu1 %1382 }
 0xcd6   :  { %v1385_v43 = vmul.f32 %v5355_v40, %v1383_v41 }
 0xcd8   :  { %1387 = vrot.lane.b32.xlu1 %v1385_v43, %s5759_s4 }
 0xcf1   :  { %v1407_v48 = vpop.permute.xlu0 %1406 }
 0xcf2   :  { %v1409_v51 = vmul.f32 %v5359_v46, %v1407_v48 }
 0xcf4   :  { %1411 = vrot.lane.b32.xlu0 %v1409_v51, %s5759_s4 }
 0xd4a   :  { %v1388_v53 = vpop.permute.xlu1 %1387 }
 0xd4b   :  { %v1390_v54 = vadd.f32 %v1388_v53, %v1380_v52 }
 0xd4d   :  { %5360 = vtanh.f32 %v1390_v54 }
 0xd57   :  { %v5361_v56 = vpop.eup %5360 }
 0xd58   :  { %1393 = vrot.lane.b32.xlu1 %v5361_v56, %s5758_s0 }
 0xd66   :  { %v1412_v60 = vpop.permute.xlu0 %1411 }
 0xd67   :  { %v1414_v59 = vadd.f32 %v1412_v60, %v1404_v57 }
 0xd69   :  { %5362 = vtanh.f32 %v1414_v59 }
 0xd73   :  { %v5363_v61 = vpop.eup %5362 }
 0xd74   :  { %1417 = vrot.lane.b32.xlu0 %v5363_v61, %s5758_s0 }
 0xdca   :  { %v1394_v63 = vpop.permute.xlu1 %1393 }
 0xdcb   :  { %v1396_v47 = vmul.f32 %v5355_v40, %v1394_v63 }
 0xdcd   :  { %1422 = vrot.lane.b32.xlu1 %v1396_v47, %s5759_s4 }
 0xde6   :  { %v1418_v3 = vpop.permute.xlu0 %1417 }
 0xde7   :  { %v6209_v5 = vmul.f32 %v5359_v46, %v1418_v3 }
 0xde9   :  { %1514 = vrot.lane.b32.xlu0 %v6209_v5, %s5759_s4 }
 0xe3f   :  { %v6213_v7 = vpop.permute.xlu1 %1422 }
 0xe40   :  { %4747 = vmatmul.mubr.msk.f32.vlgmr.msra.gmra.mrb[22].mxu0 %vm329_vm2, %v6213_v7 }
 0xe41   :  { %5105 = vmatpush3.bf16.msra.mxu0 %v5947_v9  ;;  %4768 = vmatprep.mubr.msk.f32.mxu0 %vm5757_vm0, %v5756_v1 }
 0xe42   :  { %5106 = vmatprep.subr.bf16.mxu0 %v5755_v0 }
 0xe45   :  { %5108 = vmatpush3.bf16.msra.mxu0 %v5953_v14 }
 0xe46   :  { %5115 = vmatprep.subr.bf16.mxu0 %v5755_v0 }
 0xe5b   :  { %v1515_v10 = vpop.permute.xlu0 %1514 }
 0xe5c   :  { %4758 = vmatmul.mubr.msk.f32.vlgmr.msra.gmra.mrb[14].mxu1 %vm329_vm2, %v1515_v10 }
 0xe5d   :  { %5111 = vmatpush3.bf16.msra.mxu1 %v5963_v18  ;;  %4779 = vmatprep.mubr.msk.f32.mxu1 %vm5757_vm0, %v5756_v1 }
 0xe5e   :  { %5112 = vmatprep.subr.bf16.mxu1 %v5755_v0 }
 0xe61   :  { %5114 = vmatpush3.bf16.msra.mxu1 %v5975_v22 }
 0xe62   :  { %5121 = vmatprep.subr.bf16.mxu1 %v5755_v0 }
 0xf13   :  { %v1504_v9 = vpop.f32.mrb[22].mxu0 }
 0xf14   :  { %v1508_v2 = vadd.f32 %v1504_v9, %v6049_v62  ;;  %v4748_v14 = vpop.f32.mrb[23].mxu0 }
 0xf16   :  { %5364 = vtanh.f32 %v1508_v2  ;;  %v1589_v15 = vsub.f32 0.0, %v1508_v2 }
 0xf18   :  { %v1590_v22 = vmul.f32 1.442695, %v1589_v15 }
 0xf20   :  { %v5365_v11 = vpop.eup %5364 }
 0xf21   :  { %1598 = vrot.lane.b32.xlu1 %v5365_v11, %s5758_s0 }
 0xf2f   :  { %v1584_v12 = vpop.f32.mrb[14].mxu1 }
 0xf30   :  { %v1588_v18 = vadd.f32 %v1584_v12, %v6038_v49  ;;  %v4759_v42 = vpop.f32.mrb[15].mxu1 }
 0xf32   :  { %5366 = vtanh.f32 %v1588_v18  ;;  %v1613_v62 = vsub.f32 0.0, %v1588_v18 }
 0xf33   :  { %5368 = vpow2.f32 %v1590_v22 }
 0xf34   :  { %v1614_v19 = vmul.f32 1.442695, %v1613_v62 }
 0xf3c   :  { %v5367_v13 = vpop.eup %5366 }
 0xf3d   :  { %1622 = vrot.lane.b32.xlu0 %v5367_v13, %s5758_s0  ;;  %v5369_v16 = vpop.eup %5368 }
 0xf3e   :  { %v1592_v6 = vadd.f32 1.0, %v5369_v16 }
 0xf40   :  { %5370 = vrcp.f32 %v1592_v6 }
 0xf41   :  { %5372 = vpow2.f32 %v1614_v19 }
 0xf4a   :  { %v5371_v20 = vpop.eup %5370 }
 0xf4b   :  { %v5373_v49 = vpop.eup %5372  ;;  %v1596_v31 = vmul.f32 %v5371_v20, %v1390_v54 }
 0xf4c   :  { %v1616_v24 = vadd.f32 1.0, %v5373_v49 }
 0xf4e   :  { %5374 = vrcp.f32 %v1616_v24  ;;  %v1867_v24 = vld [vmem:[#allocation7 + $0x18] sm:$0xff] }
 0xf58   :  { %v5375_v25 = vpop.eup %5374 }
 0xf59   :  { %v1620_v36 = vmul.f32 %v5375_v25, %v1414_v59 }
 0xf93   :  { %v1599_v21 = vpop.permute.xlu1 %1598 }
 0xf94   :  { %v1601_v23 = vmul.f32 %v5371_v20, %v1599_v21  ;;  %v1865_v21 = vld [vmem:[#allocation7 + $0x8] sm:$0xff] }
 0xf96   :  { %1603 = vrot.lane.b32.xlu1 %v1601_v23, %s5759_s4  ;;  %v1866_v23 = vld [vmem:[#allocation7 + $0x10] sm:$0xff] }
 0xfaf   :  { %v1623_v26 = vpop.permute.xlu0 %1622 }
 0xfb0   :  { %v1625_v28 = vmul.f32 %v5375_v25, %v1623_v26 }
 0xfb2   :  { %1627 = vrot.lane.b32.xlu0 %v1625_v28, %s5759_s4  ;;  %v1942_v28 = vld [vmem:[#allocation9] sm:$0xff] }
0x1008   :  { %v1604_v33 = vpop.permute.xlu1 %1603 }
0x1009   :  { %v1606_v34 = vadd.f32 %v1604_v33, %v1596_v31  ;;  %v1943_v31 = vld [vmem:[#allocation9 + $0x8] sm:$0xff]  ;;  %v1944_v33 = vld [vmem:[#allocation9 + $0x10] sm:$0xff] }
0x100b   :  { %5376 = vtanh.f32 %v1606_v34 }
0x1015   :  { %v5377_v35 = vpop.eup %5376 }
0x1016   :  { %1609 = vrot.lane.b32.xlu1 %v5377_v35, %s5758_s0  ;;  %v1945_v35 = vld [vmem:[#allocation9 + $0x18] sm:$0xff] }
0x1024   :  { %v1628_v58 = vpop.permute.xlu0 %1627 }
0x1025   :  { %v1630_v37 = vadd.f32 %v1628_v58, %v1620_v36  ;;  %v5125_v36 = vpack.c.bf16 %v1945_v35, %v1944_v33  ;;  %v2096_v35 = vld [vmem:[#allocation10 + $0x48] sm:$0xff] }
0x1027   :  { %5378 = vtanh.f32 %v1630_v37 }
0x1031   :  { %v5379_v40 = vpop.eup %5378 }
0x1032   :  { %1633 = vrot.lane.b32.xlu0 %v5379_v40, %s5758_s0 }
0x1088   :  { %v1610_v41 = vpop.permute.xlu1 %1609 }
0x1089   :  { %v1612_v43 = vmul.f32 %v5371_v20, %v1610_v41  ;;  %v1864_v20 = vld [vmem:[#allocation7] sm:$0xff] }
0x108a   :  { %v5116_v49 = vpack.c.bf16 %v1865_v21, %v1864_v20  ;;  %v2090_v20 = vld [vmem:[#allocation10 + $0x18] sm:$0xff]  ;;  %v2087_v21 = vld [vmem:[#allocation10] sm:$0xff] }
0x108b   :  { %1638 = vrot.lane.b32.xlu1 %v1612_v43, %s5759_s4 }
0x10a4   :  { %v1634_v55 = vpop.permute.xlu0 %1633 }
0x10a5   :  { %v6239_v44 = vmul.f32 %v5375_v25, %v1634_v55  ;;  %v5119_v25 = vpack.c.bf16 %v1867_v24, %v1866_v23  ;;  %v2094_v24 = vld [vmem:[#allocation10 + $0x38] sm:$0xff] }
0x10a7   :  { %1730 = vrot.lane.b32.xlu0 %v6239_v44, %s5759_s4 }
0x10fd   :  { %v6243_v46 = vpop.permute.xlu1 %1638 }
0x10fe   :  { %4769 = vmatmul.mubr.msk.f32.vlgmr.msra.gmra.mrb[24].mxu0 %vm329_vm2, %v6243_v46 }
0x10ff   :  { %4790 = vmatprep.mubr.msk.f32.mxu0 %vm5757_vm0, %v5756_v1  ;;  %5117 = vmatpush3.bf16.msra.mxu0 %v5116_v49  ;;  %v2092_v49 = vld [vmem:[#allocation10 + $0x28] sm:$0xff] }
0x1100   :  { %5118 = vmatprep.subr.bf16.mxu0 %v5755_v0 }
0x1103   :  { %5120 = vmatpush3.bf16.msra.mxu0 %v5119_v25  ;;  %v5131_v25 = vpack.c.bf16 %v2094_v24, %v2092_v49 }
0x1119   :  { %v1731_v48 = vpop.permute.xlu0 %1730 }
0x111a   :  { %4780 = vmatmul.mubr.msk.f32.vlgmr.msra.gmra.mrb[16].mxu1 %vm329_vm2, %v1731_v48 }
0x111b   :  { %4801 = vmatprep.mubr.msk.f32.mxu1 %vm5757_vm0, %v5756_v1 }
0x11d1   :  { %v1720_v51 = vpop.f32.mrb[24].mxu0 }
0x11d2   :  { %v1724_v52 = vadd.f32 %v1720_v51, %v6053_v4  ;;  %v4770_v53 = vpop.f32.mrb[25].mxu0 }
0x11d4   :  { %5380 = vtanh.f32 %v1724_v52  ;;  %v1805_v61 = vsub.f32 0.0, %v1724_v52 }
0x11d6   :  { %v1806_v63 = vmul.f32 1.442695, %v1805_v61 }
0x11de   :  { %v5381_v54 = vpop.eup %5380 }
0x11df   :  { %1814 = vrot.lane.b32.xlu1 %v5381_v54, %s5758_s0 }
0x11ed   :  { %v1800_v56 = vpop.f32.mrb[16].mxu1 }
0x11ee   :  { %v1804_v57 = vadd.f32 %v1800_v56, %v6034_v45  ;;  %v4781_v60 = vpop.f32.mrb[17].mxu1 }
0x11f0   :  { %5382 = vtanh.f32 %v1804_v57  ;;  %v1829_v4 = vsub.f32 0.0, %v1804_v57 }
0x11f1   :  { %5384 = vpow2.f32 %v1806_v63 }
0x11f2   :  { %v1830_v10 = vmul.f32 1.442695, %v1829_v4 }
0x11fa   :  { %v5383_v59 = vpop.eup %5382 }
0x11fb   :  { %1838 = vrot.lane.b32.xlu0 %v5383_v59, %s5758_s0  ;;  %v5385_v47 = vpop.eup %5384 }
0x11fc   :  { %v1808_v3 = vadd.f32 1.0, %v5385_v47 }
0x11fe   :  { %5386 = vrcp.f32 %v1808_v3 }
0x11ff   :  { %5388 = vpow2.f32 %v1830_v10 }
0x1208   :  { %v5387_v9 = vpop.eup %5386 }
0x1209   :  { %v5389_v45 = vpop.eup %5388  ;;  %v1812_v13 = vmul.f32 %v5387_v9, %v1606_v34  ;;  %v5122_v34 = vpack.c.bf16 %v1943_v31, %v1942_v28 }
0x120a   :  { %v1832_v11 = vadd.f32 1.0, %v5389_v45 }
0x120b   :  { %5123 = vmatpush3.bf16.msra.mxu1 %v5122_v34 }
0x120c   :  { %5390 = vrcp.f32 %v1832_v11  ;;  %5124 = vmatprep.subr.bf16.mxu1 %v5755_v0 }
0x120f   :  { %5126 = vmatpush3.bf16.msra.mxu1 %v5125_v36  ;;  %v2098_v36 = vld [vmem:[#allocation10 + $0x58] sm:$0xff] }
0x1210   :  { %5143 = vmatprep.subr.bf16.mxu1 %v5755_v0 }
0x1216   :  { %v5391_v12 = vpop.eup %5390 }
0x1217   :  { %v1836_v6 = vmul.f32 %v5391_v12, %v1630_v37 }
0x1251   :  { %v1815_v2 = vpop.permute.xlu1 %1814 }
0x1252   :  { %v1817_v14 = vmul.f32 %v5387_v9, %v1815_v2 }
0x1254   :  { %1819 = vrot.lane.b32.xlu1 %v1817_v14, %s5759_s4 }
0x126d   :  { %v1839_v18 = vpop.permute.xlu0 %1838 }
0x126e   :  { %v1841_v42 = vmul.f32 %v5391_v12, %v1839_v18 }
0x1270   :  { %1843 = vrot.lane.b32.xlu0 %v1841_v42, %s5759_s4 }
0x12c6   :  { %v1820_v15 = vpop.permute.xlu1 %1819 }
0x12c7   :  { %v6258_v22 = vadd.f32 %v1820_v15, %v1812_v13 }
0x12c9   :  { %5392 = vtanh.f32 %v6258_v22 }
0x12d3   :  { %v5393_v16 = vpop.eup %5392 }
0x12d4   :  { %1825 = vrot.lane.b32.xlu1 %v5393_v16, %s5758_s0 }
0x12e2   :  { %v1844_v62 = vpop.permute.xlu0 %1843 }
0x12e3   :  { %v6262_v19 = vadd.f32 %v1844_v62, %v1836_v6  ;;  %v2088_v62 = vld [vmem:[#allocation10 + $0x8] sm:$0xff] }
0x12e4   :  { %v5127_v23 = vpack.c.bf16 %v2090_v20, %v2088_v62 }
0x12e5   :  { %5394 = vtanh.f32 %v6262_v19 }
0x12e6   :  { %5128 = vmatprep.subr.bf16.mxu0 %v5127_v23 }
0x12ef   :  { %v5395_v26 = vpop.eup %5394 }
0x12f0   :  { %1849 = vrot.lane.b32.xlu0 %v5395_v26, %s5758_s0  ;;  %v2091_v26 = vld [vmem:[#allocation10 + $0x20] sm:$0xff] }
0x1346   :  { %v1826_v58 = vpop.permute.xlu1 %1825 }
0x1347   :  { %v1828_v37 = vmul.f32 %v5387_v9, %v1826_v58 }
0x1349   :  { %1854 = vrot.lane.b32.xlu1 %v1828_v37, %s5759_s4  ;;  %v5135_v37 = vpack.c.bf16 %v2098_v36, %v2096_v35 }
0x1362   :  { %v1850_v40 = vpop.permute.xlu0 %1849 }
0x1363   :  { %v1852_v41 = vmul.f32 %v5391_v12, %v1850_v40  ;;  %v2095_v40 = vld [vmem:[#allocation10 + $0x40] sm:$0xff] }
0x1365   :  { %1946 = vrot.lane.b32.xlu0 %v1852_v41, %s5759_s4 }
0x13bb   :  { %v6271_v43 = vpop.permute.xlu1 %1854 }
0x13bc   :  { %4791 = vmatmul.mubr.msk.f32.vlgmr.msra.gmra.mrb[26].mxu0 %vm329_vm2, %v6271_v43 }
0x13bd   :  { %2204 = vmatprep.mubr.f32.mxu0 %v5756_v1 }
0x13d7   :  { %v1947_v55 = vpop.permute.xlu0 %1946 }
0x13d8   :  { %4802 = vmatmul.mubr.msk.f32.vlgmr.msra.gmra.mrb[18].mxu1 %vm329_vm2, %v1947_v55 }
0x13d9   :  { %4812 = vmatprep.mubr.msk.f32.mxu1 %vm5757_vm0, %v5756_v1 }
0x148f   :  { %v1936_v48 = vpop.f32.mrb[26].mxu0 }
0x1490   :  { %v1940_v51 = vadd.f32 %v1936_v48, %v6057_v8  ;;  %v4792_v52 = vpop.f32.mrb[27].mxu0  ;;  %v2270_v48 = vld [vmem:[#allocation12] sm:$0xff] }
0x1492   :  { %5396 = vtanh.f32 %v1940_v51  ;;  %v2021_v59 = vsub.f32 0.0, %v1940_v51  ;;  %v2271_v51 = vld [vmem:[#allocation12 + $0x8] sm:$0xff] }
0x1493   :  { %v6310_v52 = vpack.c.bf16 %v2271_v51, %v2270_v48 }
0x1494   :  { %v2022_v61 = vmul.f32 1.442695, %v2021_v59  ;;  %v2272_v59 = vld [vmem:[#allocation12 + $0x10] sm:$0xff] }
0x1495   :  { %5145 = vmatpush3.bf16.msra.mxu1 %v6310_v52 }
0x1496   :  { %5146 = vmatprep.subr.bf16.mxu1 %v5755_v0 }
0x149c   :  { %v5397_v53 = vpop.eup %5396 }
0x149d   :  { %2030 = vrot.lane.b32.xlu1 %v5397_v53, %s5758_s0  ;;  %v2100_v53 = vld [vmem:[#allocation10 + $0x68] sm:$0xff] }
0x14ab   :  { %v2016_v54 = vpop.f32.mrb[18].mxu1 }
0x14ac   :  { %v2020_v56 = vadd.f32 %v2016_v54, %v6030_v38  ;;  %v4803_v57 = vpop.f32.mrb[19].mxu1  ;;  %v2102_v54 = vld [vmem:[#allocation10 + $0x78] sm:$0xff] }
0x14ad   :  { %v2101_v57 = vld [vmem:[#allocation10 + $0x70] sm:$0xff] }
0x14ae   :  { %5398 = vtanh.f32 %v2020_v56  ;;  %v2045_v8 = vsub.f32 0.0, %v2020_v56  ;;  %v2099_v56 = vld [vmem:[#allocation10 + $0x60] sm:$0xff] }
0x14af   :  { %5400 = vpow2.f32 %v2022_v61  ;;  %v2273_v61 = vld [vmem:[#allocation12 + $0x18] sm:$0xff] }
0x14b0   :  { %v2046_v3 = vmul.f32 1.442695, %v2045_v8 }
0x14b8   :  { %v5399_v60 = vpop.eup %5398 }
0x14b9   :  { %2054 = vrot.lane.b32.xlu0 %v5399_v60, %s5758_s0  ;;  %v5401_v63 = vpop.eup %5400  ;;  %v5141_v60 = vpack.c.bf16 %v2101_v57, %v2099_v56 }
0x14ba   :  { %v2024_v47 = vadd.f32 1.0, %v5401_v63  ;;  %v6314_v63 = vpack.c.bf16 %v2273_v61, %v2272_v59 }
0x14bc   :  { %5402 = vrcp.f32 %v2024_v47  ;;  %5148 = vmatpush3.bf16.msra.mxu1 %v6314_v63 }
0x14bd   :  { %5404 = vpow2.f32 %v2046_v3  ;;  %5149 = vmatprep.subr.bf16.mxu1 %v5755_v0 }
0x14bf   :  { %4813 = vmatmul.mubr.f32.vlgmr.msra.gmra.mrb[20].mxu1 %v5756_v1 }
0x14c0   :  { %4823 = vmatprep.mubr.msk.f32.mxu1 %vm5757_vm0, %v5756_v1 }
0x14c6   :  { %v6283_v4 = vpop.eup %5402 }
0x14c7   :  { %v5405_v38 = vpop.eup %5404  ;;  %v2028_v12 = vmul.f32 %v6283_v4, %v6258_v22 }
0x14c8   :  { %v2048_v2 = vadd.f32 1.0, %v5405_v38 }
0x14ca   :  { %5406 = vrcp.f32 %v2048_v2  ;;  %v2348_v2 = vld [vmem:[#allocation13 + $0x10] sm:$0xff] }
0x14d4   :  { %v6287_v14 = vpop.eup %5406 }
0x14d5   :  { %v2052_v15 = vmul.f32 %v6287_v14, %v6262_v19  ;;  %v2093_v19 = vld [vmem:[#allocation10 + $0x30] sm:$0xff] }
0x14d6   :  { %v5133_v28 = vpack.c.bf16 %v2093_v19, %v2091_v26 }
0x150f   :  { %v2031_v10 = vpop.permute.xlu1 %2030 }
0x1510   :  { %v2033_v9 = vmul.f32 %v6283_v4, %v2031_v10  ;;  %v2346_v10 = vld [vmem:[#allocation13] sm:$0xff] }
0x1512   :  { %2035 = vrot.lane.b32.xlu1 %v2033_v9, %s5759_s4  ;;  %v2347_v9 = vld [vmem:[#allocation13 + $0x8] sm:$0xff] }
0x1513   :  { %v6332_v38 = vpack.c.bf16 %v2347_v9, %v2346_v10 }
0x1515   :  { %5151 = vmatpush3.bf16.msra.mxu1 %v6332_v38 }
0x1516   :  { %5152 = vmatprep.subr.bf16.mxu1 %v5755_v0 }
0x152b   :  { %v2055_v45 = vpop.permute.xlu0 %2054 }
0x152c   :  { %v2057_v11 = vmul.f32 %v6287_v14, %v2055_v45 }
0x152e   :  { %2059 = vrot.lane.b32.xlu0 %v2057_v11, %s5759_s4 }
0x1584   :  { %v2036_v18 = vpop.permute.xlu1 %2035 }
0x1585   :  { %v2038_v42 = vadd.f32 %v2036_v18, %v2028_v12 }
0x1587   :  { %5408 = vtanh.f32 %v2038_v42 }
0x1591   :  { %v5409_v13 = vpop.eup %5408 }
0x1592   :  { %2041 = vrot.lane.b32.xlu1 %v5409_v13, %s5758_s0 }
0x1596   :  { %1859 = vrot.lane.b32.xlu1 %v1852_v41, %s5758_s0  ;;  %v2097_v41 = vld [vmem:[#allocation10 + $0x50] sm:$0xff] }
0x1597   :  { %v5137_v55 = vpack.c.bf16 %v2097_v41, %v2095_v40 }
0x159a   :  { %1427 = vrot.lane.b32.xlu1 %v6209_v5, %s5758_s0  ;;  %v2089_v5 = vld [vmem:[#allocation10 + $0x10] sm:$0xff] }
0x159e   :  { %986 = vrot.lane.b32.xlu1 %v6143_v27, %s5758_s0  ;;  %v5129_v27 = vpack.c.bf16 %v2089_v5, %v2087_v21  ;;  %v2103_v21 = vld [vmem:[#allocation15] sm:$0x3] }
0x159f   :  { %v2108_v23 = vrot.slane %v2103_v21, %v159_v30  ;;  %v2112_v5 = vrot.slane %v2103_v21, %v163_v32 }
0x15a0   :  { %v2060_v16 = vpop.permute.xlu0 %2059  ;;  %5130 = vmatpush1.bf16.msra.mxu0 %v5129_v27 }
0x15a1   :  { %v2062_v6 = vadd.f32 %v2060_v16, %v2052_v15  ;;  %5132 = vmatprep.subr.bf16.mxu0 %v5131_v25 }
0x15a2   :  { %537 = vrot.lane.b32.xlu1 %v6071_v50, %s5758_s0 }
0x15a3   :  { %5410 = vtanh.f32 %v2062_v6  ;;  %v2340_v6 = vpop.f32.mrb[20].mxu1 }
0x15a4   :  { %5134 = vmatpush1.bf16.msra.mxu0 %v5133_v28 }
0x15a5   :  { %5136 = vmatprep.subr.bf16.mxu0 %v5135_v37 }
0x15a8   :  { %5138 = vmatpush1.bf16.msra.mxu0 %v5137_v55 }
0x15ad   :  { %v5411_v22 = vpop.eup %5410 }
0x15ae   :  { %2065 = vrot.lane.b32.xlu0 %v5411_v22, %s5758_s0  ;;  %v4814_v22 = vpop.f32.mrb[21].mxu1 }
0x1604   :  { %v2042_v50 = vpop.permute.xlu1 %2041 }
0x1605   :  { %v2044_v3 = vmul.f32 %v6283_v4, %v2042_v50 }
0x1608   :  { %v1860_v31 = vpop.permute.xlu1 %1859 }
0x1609   :  { %1862 = vst.msk [vmem:[#allocation2 + $0x8] sm:$0xff] %vm541_vm3, %v1860_v31 }
0x160c   :  { %v1428_v33 = vpop.permute.xlu1 %1427 }
0x160d   :  { %1430 = vst.msk [vmem:[#allocation2 + $0x18] sm:$0xff] %vm541_vm3, %v1428_v33 }
0x1610   :  { %v987_v34 = vpop.permute.xlu1 %986  ;;  %v2080_v12 = vld [vmem:[#allocation2 + $0x8] sm:$0xff] }
0x1611   :  { %990 = vst.msk [vmem:[#allocation2 + $0x28] sm:$0xff] %vm541_vm3, %v987_v34 }
0x1612   :  { %1641 = vst.msk [vmem:[#allocation2 + $0x28] sm:$0xff] %vm329_vm2, %v6243_v46  ;;  %v5139_v46 = vpack.c.bf16 %v2102_v54, %v2100_v53 }
0x1614   :  { %v538_v58 = vpop.permute.xlu1 %537  ;;  %5140 = vmatprep.subr.bf16.mxu0 %v5139_v46  ;;  %v2082_v42 = vld [vmem:[#allocation2 + $0x18] sm:$0xff] }
0x1615   :  { %542 = vst.msk [vmem:[#allocation2 + $0x38] sm:$0xff] %vm541_vm3, %v538_v58  ;;  %5142 = vmatpush1.bf16.msra.mxu0 %v5141_v60 }
0x1616   :  { %5173 = vmatprep.subr.bf16.mxu0 %v5755_v0 }
0x1619   :  { %v2084_v13 = vld [vmem:[#allocation2 + $0x28] sm:$0xff] }
0x1620   :  { %v2066_v47 = vpop.permute.xlu0 %2065 }
0x1621   :  { %v2068_v8 = vmul.f32 %v6287_v14, %v2066_v47 }
0x1623   :  { %2075 = vrot.lane.b32.xlu0 %v2068_v8, %s5758_s0 }
0x1627   :  { %1643 = vrot.lane.b32.xlu0 %v6239_v44, %s5758_s0  ;;  %v2349_v44 = vld [vmem:[#allocation13 + $0x18] sm:$0xff] }
0x1628   :  { %v6336_v14 = vpack.c.bf16 %v2349_v44, %v2348_v2 }
0x162a   :  { %5154 = vmatpush3.bf16.msra.mxu1 %v6336_v14 }
0x162b   :  { %1210 = vrot.lane.b32.xlu0 %v6179_v17, %s5758_s0  ;;  %5155 = vmatprep.subr.bf16.mxu1 %v5755_v0 }
0x162d   :  { %4824 = vmatmul.mubr.f32.vlgmr.msra.gmra.mrb[22].mxu1 %v5756_v1 }
0x162e   :  { %5157 = vmatpush3.bf16.msra.mxu1 %v6310_v52  ;;  %4834 = vmatprep.mubr.msk.f32.mxu1 %vm5757_vm0, %v5756_v1 }
0x162f   :  { %762 = vrot.lane.b32.xlu0 %v6107_v39, %s5758_s0  ;;  %5158 = vmatprep.subr.bf16.mxu1 %v5755_v0 }
0x1632   :  { %5160 = vmatpush3.bf16.msra.mxu1 %v6314_v63 }
0x1633   :  { %2070 = vrot.lane.b32.xlu0 %v2044_v3, %s5759_s4  ;;  %5161 = vmatprep.subr.bf16.mxu1 %v5755_v0 }
0x1695   :  { %v2076_v39 = vpop.permute.xlu0 %2075 }
0x1696   :  { %2078 = vst.msk [vmem:[#allocation2] sm:$0xff] %vm541_vm3, %v2076_v39 }
0x1699   :  { %v1644_v17 = vpop.permute.xlu0 %1643 }
0x169a   :  { %1646 = vst.msk [vmem:[#allocation2 + $0x10] sm:$0xff] %vm541_vm3, %v1644_v17 }
0x169d   :  { %v1211_v4 = vpop.permute.xlu0 %1210  ;;  %v2079_v45 = vld [vmem:[#allocation2] sm:$0xff] }
0x169e   :  { %1214 = vst.msk [vmem:[#allocation2 + $0x20] sm:$0xff] %vm541_vm3, %v1211_v4  ;;  %4409 = vmatmul.mubr.msk.f32.vlgmr.msra.gmra.mrb[28].mxu0 %vm2115_vm4, %v2079_v45 }
0x169f   :  { %1425 = vst.msk [vmem:[#allocation2 + $0x20] sm:$0xff] %vm329_vm2, %v6213_v7  ;;  %2210 = vmatprep.mubr.f32.mxu0 %v5756_v1  ;;  %5175 = vmatpush3.bf16.msra.mxu0 %v6332_v38 }
0x16a0   :  { %5176 = vmatprep.subr.bf16.mxu0 %v5755_v0 }
0x16a1   :  { %v763_v11 = vpop.permute.xlu0 %762  ;;  %v2081_v18 = vld [vmem:[#allocation2 + $0x10] sm:$0xff] }
0x16a2   :  { %766 = vst.msk [vmem:[#allocation2 + $0x30] sm:$0xff] %vm541_vm3, %v763_v11  ;;  %4410 = vmatmul.mubr.msk.f32.gmra.mrb[30].mxu0 %vm2115_vm4, %v2080_v12 }
0x16a3   :  { %1857 = vst.msk [vmem:[#allocation2 + $0x30] sm:$0xff] %vm329_vm2, %v6271_v43  ;;  %2216 = vmatprep.mubr.f32.mxu0 %v5756_v1  ;;  %5178 = vmatpush3.bf16.msra.mxu0 %v6336_v14 }
0x16a4   :  { %5185 = vmatprep.subr.bf16.mxu0 %v5755_v0 }
0x16a5   :  { %v2071_v7 = vpop.permute.xlu0 %2070 }
0x16a6   :  { %2073 = vst.msk [vmem:[#allocation2 + $0x38] sm:$0xff] %vm329_vm2, %v2071_v7  ;;  %4411 = vmatmul.mubr.msk.f32.gmra.mrb[32].mxu0 %vm2115_vm4, %v2081_v18  ;;  %v2083_v43 = vld [vmem:[#allocation2 + $0x20] sm:$0xff] }
0x16a7   :  { %2222 = vmatprep.mubr.f32.mxu0 %v5756_v1 }
0x16aa   :  { %4412 = vmatmul.mubr.msk.f32.gmra.mrb[34].mxu0 %vm2115_vm4, %v2082_v42  ;;  %v2085_v15 = vld [vmem:[#allocation2 + $0x30] sm:$0xff] }
0x16ab   :  { %2228 = vmatprep.mubr.f32.mxu0 %v5756_v1 }
0x16ad   :  { %v2086_v16 = vld [vmem:[#allocation2 + $0x38] sm:$0xff] }
0x16ae   :  { %4413 = vmatmul.mubr.msk.f32.gmra.mrb[36].mxu0 %vm2115_vm4, %v2083_v43 }
0x16af   :  { %2234 = vmatprep.mubr.f32.mxu0 %v5756_v1 }
0x16b2   :  { %4414 = vmatmul.mubr.msk.f32.gmra.mrb[38].mxu0 %vm2115_vm4, %v2084_v13 }
0x16b3   :  { %2240 = vmatprep.mubr.f32.mxu0 %v5756_v1 }
0x16b6   :  { %4415 = vmatmul.mubr.msk.f32.gmra.mrb[40].mxu0 %vm2115_vm4, %v2085_v15 }
0x16b7   :  { %2246 = vmatprep.mubr.f32.mxu0 %v5756_v1 }
0x16ba   :  { %4416 = vmatmul.mubr.msk.f32.gmra.mrb[42].mxu0 %vm2115_vm4, %v2086_v16 }
0x16bb   :  { %4867 = vmatprep.mubr.msk.f32.mxu0 %vm5757_vm0, %v5756_v1 }
0x1700   :  { %v2416_v62 = vpop.f32.mrb[22].mxu1 }
0x1701   :  { %v4825_v20 = vpop.f32.mrb[23].mxu1 }
0x1771   :  { %v2206_v49 = vpop.f32.mrb[28].mxu0 }
0x1772   :  { %v2207_v24 = vadd.f32 %v2206_v49, %v2108_v23  ;;  %v2208_v27 = vpop.f32.mrb[29].mxu0 }
0x1773   :  { %v6381_v25 = vadd.f32 %v2208_v27, %v2112_v5 }
0x1774   :  { %v2344_v26 = vadd.f32 %v2340_v6, %v2207_v24 }
0x1775   :  { %v2212_v19 = vpop.f32.mrb[30].mxu0 }
0x1776   :  { %5412 = vtanh.f32 %v2344_v26  ;;  %v6383_v28 = vadd.f32 %v2212_v19, %v2108_v23  ;;  %v2214_v50 = vpop.f32.mrb[31].mxu0  ;;  %v2421_v2 = vsub.f32 0.0, %v2344_v26 }
0x1777   :  { %v6385_v31 = vadd.f32 %v2214_v50, %v2112_v5 }
0x1778   :  { %v2422_v44 = vmul.f32 1.442695, %v2421_v2 }
0x1779   :  { %v2218_v33 = vpop.f32.mrb[32].mxu0 }
0x177a   :  { %v6387_v34 = vadd.f32 %v2218_v33, %v2108_v23  ;;  %v2220_v30 = vpop.f32.mrb[33].mxu0 }
0x177b   :  { %v6389_v35 = vadd.f32 %v2220_v30, %v2112_v5 }
0x177d   :  { %v2224_v29 = vpop.f32.mrb[34].mxu0 }
0x177e   :  { %v6391_v32 = vadd.f32 %v2224_v29, %v2108_v23  ;;  %v2226_v36 = vpop.f32.mrb[35].mxu0 }
0x177f   :  { %v6393_v58 = vadd.f32 %v2226_v36, %v2112_v5 }
0x1780   :  { %v5413_v37 = vpop.eup %5412 }
0x1781   :  { %v2230_v40 = vpop.f32.mrb[36].mxu0  ;;  %2430 = vrot.lane.b32.xlu1 %v5413_v37, %s5758_s0 }
0x1782   :  { %v6396_v41 = vadd.f32 %v2230_v40, %v2108_v23  ;;  %v2232_v55 = vpop.f32.mrb[37].mxu0 }
0x1783   :  { %v6398_v48 = vadd.f32 %v2232_v55, %v2112_v5 }
0x1785   :  { %v2236_v51 = vpop.f32.mrb[38].mxu0 }
0x1786   :  { %v6400_v53 = vadd.f32 %v2236_v51, %v2108_v23  ;;  %v2238_v54 = vpop.f32.mrb[39].mxu0 }
0x1787   :  { %v6402_v46 = vadd.f32 %v2238_v54, %v2112_v5 }
0x1789   :  { %v2242_v56 = vpop.f32.mrb[40].mxu0 }
0x178a   :  { %v6404_v57 = vadd.f32 %v2242_v56, %v2108_v23  ;;  %v2244_v60 = vpop.f32.mrb[41].mxu0 }
0x178b   :  { %v6406_v59 = vadd.f32 %v2244_v60, %v2112_v5 }
0x178d   :  { %v2248_v61 = vpop.f32.mrb[42].mxu0 }
0x178e   :  { %v6408_v47 = vadd.f32 %v2248_v61, %v2108_v23  ;;  %v2250_v8 = vpop.f32.mrb[43].mxu0 }
0x178f   :  { %v2251_v3 = vadd.f32 %v2250_v8, %v2112_v5 }
0x1791   :  { %v2420_v10 = vadd.f32 %v2416_v62, %v2251_v3 }
0x1793   :  { %5414 = vtanh.f32 %v2420_v10  ;;  %v2445_v4 = vsub.f32 0.0, %v2420_v10 }
0x1794   :  { %5416 = vpow2.f32 %v2422_v44 }
0x1795   :  { %v2446_v45 = vmul.f32 1.442695, %v2445_v4 }
0x179d   :  { %v5415_v9 = vpop.eup %5414 }
0x179e   :  { %2454 = vrot.lane.b32.xlu0 %v5415_v9, %s5758_s0  ;;  %v5417_v39 = vpop.eup %5416 }
0x179f   :  { %v2424_v17 = vadd.f32 1.0, %v5417_v39 }
0x17a1   :  { %5418 = vrcp.f32 %v2424_v17 }
0x17a2   :  { %5420 = vpow2.f32 %v2446_v45 }
0x17ab   :  { %v5419_v11 = vpop.eup %5418 }
0x17ac   :  { %v5421_v18 = vpop.eup %5420  ;;  %v2428_v16 = vmul.f32 0.0, %v5419_v11 }
0x17ad   :  { %v2448_v42 = vadd.f32 1.0, %v5421_v18 }
0x17af   :  { %5422 = vrcp.f32 %v2448_v42 }
0x17b9   :  { %v5423_v43 = vpop.eup %5422 }
0x17ba   :  { %v2452_v20 = vmul.f32 0.0, %v5423_v43 }
0x17f3   :  { %v2431_v12 = vpop.permute.xlu1 %2430 }
0x17f4   :  { %v2433_v7 = vmul.f32 %v5419_v11, %v2431_v12 }
0x17f6   :  { %2435 = vrot.lane.b32.xlu1 %v2433_v7, %s5759_s4 }
0x1810   :  { %v2455_v13 = vpop.permute.xlu0 %2454 }
0x1811   :  { %v2457_v15 = vmul.f32 %v5423_v43, %v2455_v13 }
0x1813   :  { %2459 = vrot.lane.b32.xlu0 %v2457_v15, %s5759_s4 }
0x1868   :  { %v2436_v6 = vpop.permute.xlu1 %2435 }
0x1869   :  { %v6413_v22 = vadd.f32 %v2436_v6, %v2428_v16 }
0x186b   :  { %5424 = vtanh.f32 %v6413_v22 }
0x1875   :  { %v5425_v62 = vpop.eup %5424 }
0x1876   :  { %2441 = vrot.lane.b32.xlu1 %v5425_v62, %s5758_s0 }
0x1885   :  { %v2460_v21 = vpop.permute.xlu0 %2459 }
0x1886   :  { %v6417_v23 = vadd.f32 %v2460_v21, %v2452_v20 }
0x1888   :  { %5426 = vtanh.f32 %v6417_v23 }
0x1892   :  { %v5427_v5 = vpop.eup %5426 }
0x1893   :  { %2465 = vrot.lane.b32.xlu0 %v5427_v5, %s5758_s0 }
0x18e8   :  { %v2442_v49 = vpop.permute.xlu1 %2441 }
0x18e9   :  { %v2444_v24 = vmul.f32 %v5419_v11, %v2442_v49 }
0x18eb   :  { %2470 = vrot.lane.b32.xlu1 %v2444_v24, %s5759_s4 }
0x1905   :  { %v2466_v27 = vpop.permute.xlu0 %2465 }
0x1906   :  { %v6422_v26 = vmul.f32 %v5423_v43, %v2466_v27 }
0x1908   :  { %2562 = vrot.lane.b32.xlu0 %v6422_v26, %s5759_s4 }
0x195d   :  { %v2471_v19 = vpop.permute.xlu1 %2470 }
0x195e   :  { %2473 = vst.msk [vmem:[#allocation2] sm:$0xff] %vm329_vm2, %v2471_v19  ;;  %4835 = vmatmul.mubr.msk.f32.vlgmr.msra.gmra.mrb[24].mxu1 %vm329_vm2, %v2471_v19 }
0x195f   :  { %5163 = vmatpush3.bf16.msra.mxu1 %v6332_v38  ;;  %4845 = vmatprep.mubr.msk.f32.mxu1 %vm5757_vm0, %v5756_v1 }
0x1960   :  { %5164 = vmatprep.subr.bf16.mxu1 %v5755_v0 }
0x1963   :  { %5166 = vmatpush3.bf16.msra.mxu1 %v6336_v14 }
0x1964   :  { %5167 = vmatprep.subr.bf16.mxu1 %v5755_v0 }
0x197a   :  { %v2563_v50 = vpop.permute.xlu0 %2562 }
0x197b   :  { %4846 = vmatmul.mubr.msk.f32.vlgmr.msra.gmra.mrb[26].mxu1 %vm329_vm2, %v2563_v50 }
0x197c   :  { %5169 = vmatpush3.bf16.msra.mxu1 %v6310_v52  ;;  %4856 = vmatprep.mubr.msk.f32.mxu1 %vm5757_vm0, %v5756_v1 }
0x197d   :  { %5170 = vmatprep.subr.bf16.mxu1 %v5755_v0 }
0x1980   :  { %5172 = vmatpush3.bf16.msra.mxu1 %v6314_v63 }
0x1981   :  { %5179 = vmatprep.subr.bf16.mxu1 %v5755_v0 }
0x1a31   :  { %v2552_v33 = vpop.f32.mrb[24].mxu1 }
0x1a32   :  { %v2556_v30 = vadd.f32 %v2552_v33, %v6383_v28  ;;  %v4836_v29 = vpop.f32.mrb[25].mxu1 }
0x1a34   :  { %5428 = vtanh.f32 %v2556_v30  ;;  %v2637_v54 = vsub.f32 0.0, %v2556_v30 }
0x1a36   :  { %v2638_v56 = vmul.f32 1.442695, %v2637_v54 }
0x1a3e   :  { %v5429_v36 = vpop.eup %5428 }
0x1a3f   :  { %2646 = vrot.lane.b32.xlu0 %v5429_v36, %s5758_s0 }
0x1a4e   :  { %v2632_v37 = vpop.f32.mrb[26].mxu1 }
0x1a4f   :  { %v2636_v40 = vadd.f32 %v2632_v37, %v6406_v59  ;;  %v4847_v55 = vpop.f32.mrb[27].mxu1 }
0x1a51   :  { %5430 = vtanh.f32 %v2636_v40  ;;  %v2661_v28 = vsub.f32 0.0, %v2636_v40 }
0x1a52   :  { %5432 = vpow2.f32 %v2638_v56 }
0x1a53   :  { %v2662_v8 = vmul.f32 1.442695, %v2661_v28 }
0x1a5b   :  { %v5431_v51 = vpop.eup %5430 }
0x1a5c   :  { %2670 = vrot.lane.b32.xlu1 %v5431_v51, %s5758_s0  ;;  %v5433_v60 = vpop.eup %5432 }
0x1a5d   :  { %v2640_v61 = vadd.f32 1.0, %v5433_v60 }
0x1a5f   :  { %5434 = vrcp.f32 %v2640_v61 }
0x1a60   :  { %5436 = vpow2.f32 %v2662_v8 }
0x1a69   :  { %v5435_v3 = vpop.eup %5434 }
0x1a6a   :  { %v5437_v59 = vpop.eup %5436  ;;  %v2644_v4 = vmul.f32 %v5435_v3, %v6413_v22 }
0x1a6b   :  { %v2664_v2 = vadd.f32 1.0, %v5437_v59 }
0x1a6d   :  { %5438 = vrcp.f32 %v2664_v2 }
0x1a77   :  { %v5439_v44 = vpop.eup %5438 }
0x1a78   :  { %v2668_v7 = vmul.f32 %v5439_v44, %v6417_v23 }
0x1ab1   :  { %v2647_v10 = vpop.permute.xlu0 %2646 }
0x1ab2   :  { %v2649_v9 = vmul.f32 %v5435_v3, %v2647_v10 }
0x1ab4   :  { %2651 = vrot.lane.b32.xlu0 %v2649_v9, %s5759_s4 }
0x1ace   :  { %v2671_v39 = vpop.permute.xlu1 %2670 }
0x1acf   :  { %v2673_v17 = vmul.f32 %v5439_v44, %v2671_v39 }
0x1ad1   :  { %2675 = vrot.lane.b32.xlu1 %v2673_v17, %s5759_s4 }
0x1b26   :  { %v2652_v45 = vpop.permute.xlu0 %2651 }
0x1b27   :  { %v6448_v11 = vadd.f32 %v2652_v45, %v2644_v4 }
0x1b29   :  { %5440 = vtanh.f32 %v6448_v11 }
0x1b33   :  { %v5441_v12 = vpop.eup %5440 }
0x1b34   :  { %2657 = vrot.lane.b32.xlu0 %v5441_v12, %s5758_s0 }
0x1b43   :  { %v2676_v18 = vpop.permute.xlu1 %2675 }
0x1b44   :  { %v6453_v42 = vadd.f32 %v2676_v18, %v2668_v7 }
0x1b46   :  { %5442 = vtanh.f32 %v6453_v42 }
0x1b50   :  { %v5443_v43 = vpop.eup %5442 }
0x1b51   :  { %2681 = vrot.lane.b32.xlu1 %v5443_v43, %s5758_s0 }
0x1ba6   :  { %v2658_v13 = vpop.permute.xlu0 %2657 }
0x1ba7   :  { %v2660_v15 = vmul.f32 %v5435_v3, %v2658_v13 }
0x1ba9   :  { %2686 = vrot.lane.b32.xlu0 %v2660_v15, %s5759_s4 }
0x1bc3   :  { %v2682_v16 = vpop.permute.xlu1 %2681 }
0x1bc4   :  { %v6458_v6 = vmul.f32 %v5439_v44, %v2682_v16 }
0x1bc6   :  { %2778 = vrot.lane.b32.xlu1 %v6458_v6, %s5759_s4 }
0x1c1b   :  { %v2687_v22 = vpop.permute.xlu0 %2686 }
0x1c1c   :  { %2689 = vst.msk [vmem:[#allocation2 + $0x8] sm:$0xff] %vm329_vm2, %v2687_v22  ;;  %4857 = vmatmul.mubr.msk.f32.vlgmr.msra.gmra.mrb[28].mxu1 %vm329_vm2, %v2687_v22 }
0x1c1d   :  { %5181 = vmatpush3.bf16.msra.mxu1 %v6310_v52  ;;  %4878 = vmatprep.mubr.msk.f32.mxu1 %vm5757_vm0, %v5756_v1 }
0x1c1e   :  { %5182 = vmatprep.subr.bf16.mxu1 %v5755_v0 }
0x1c21   :  { %5184 = vmatpush3.bf16.msra.mxu1 %v6314_v63 }
0x1c22   :  { %5191 = vmatprep.subr.bf16.mxu1 %v5755_v0 }
0x1c38   :  { %v2779_v62 = vpop.permute.xlu1 %2778 }
0x1c39   :  { %4868 = vmatmul.mubr.msk.f32.vlgmr.msra.gmra.mrb[44].mxu0 %vm329_vm2, %v2779_v62 }
0x1c3a   :  { %5187 = vmatpush3.bf16.msra.mxu0 %v6332_v38  ;;  %4889 = vmatprep.mubr.msk.f32.mxu0 %vm5757_vm0, %v5756_v1 }
0x1c3b   :  { %5188 = vmatprep.subr.bf16.mxu0 %v5755_v0 }
0x1c3e   :  { %5190 = vmatpush3.bf16.msra.mxu0 %v6336_v14 }
0x1c3f   :  { %5197 = vmatprep.subr.bf16.mxu0 %v5755_v0 }
0x1cef   :  { %v2768_v20 = vpop.f32.mrb[28].mxu1 }
0x1cf0   :  { %v2772_v21 = vadd.f32 %v2768_v20, %v6387_v34  ;;  %v4858_v23 = vpop.f32.mrb[29].mxu1 }
0x1cf2   :  { %5444 = vtanh.f32 %v2772_v21  ;;  %v2853_v50 = vsub.f32 0.0, %v2772_v21 }
0x1cf4   :  { %v2854_v33 = vmul.f32 1.442695, %v2853_v50 }
0x1cfc   :  { %v5445_v5 = vpop.eup %5444 }
0x1cfd   :  { %2862 = vrot.lane.b32.xlu0 %v5445_v5, %s5758_s0 }
0x1d0c   :  { %v2848_v49 = vpop.f32.mrb[44].mxu0 }
0x1d0d   :  { %v2852_v24 = vadd.f32 %v2848_v49, %v6402_v46  ;;  %v4869_v27 = vpop.f32.mrb[45].mxu0 }
0x1d0f   :  { %5446 = vtanh.f32 %v2852_v24  ;;  %v2877_v34 = vsub.f32 0.0, %v2852_v24 }
0x1d10   :  { %5448 = vpow2.f32 %v2854_v33 }
0x1d11   :  { %v2878_v36 = vmul.f32 1.442695, %v2877_v34 }
0x1d19   :  { %v5447_v19 = vpop.eup %5446 }
0x1d1a   :  { %2886 = vrot.lane.b32.xlu1 %v5447_v19, %s5758_s0  ;;  %v5449_v30 = vpop.eup %5448 }
0x1d1b   :  { %v2856_v29 = vadd.f32 1.0, %v5449_v30 }
0x1d1d   :  { %5450 = vrcp.f32 %v2856_v29 }
0x1d1e   :  { %5452 = vpow2.f32 %v2878_v36 }
0x1d27   :  { %v5451_v37 = vpop.eup %5450 }
0x1d28   :  { %v5453_v46 = vpop.eup %5452  ;;  %v2860_v61 = vmul.f32 %v5451_v37, %v6448_v11 }
0x1d29   :  { %v2880_v51 = vadd.f32 1.0, %v5453_v46 }
0x1d2b   :  { %5454 = vrcp.f32 %v2880_v51 }
0x1d35   :  { %v5455_v54 = vpop.eup %5454 }
0x1d36   :  { %v2884_v10 = vmul.f32 %v5455_v54, %v6453_v42 }
0x1d6f   :  { %v2863_v40 = vpop.permute.xlu0 %2862 }
0x1d70   :  { %v2865_v55 = vmul.f32 %v5451_v37, %v2863_v40 }
0x1d72   :  { %2867 = vrot.lane.b32.xlu0 %v2865_v55, %s5759_s4 }
0x1d8c   :  { %v2887_v56 = vpop.permute.xlu1 %2886 }
0x1d8d   :  { %v2889_v60 = vmul.f32 %v5455_v54, %v2887_v56 }
0x1d8f   :  { %2891 = vrot.lane.b32.xlu1 %v2889_v60, %s5759_s4 }
0x1de4   :  { %v2868_v28 = vpop.permute.xlu0 %2867 }
0x1de5   :  { %v6484_v8 = vadd.f32 %v2868_v28, %v2860_v61 }
0x1de7   :  { %5456 = vtanh.f32 %v6484_v8 }
0x1df1   :  { %v5457_v3 = vpop.eup %5456 }
0x1df2   :  { %2873 = vrot.lane.b32.xlu0 %v5457_v3, %s5758_s0 }
0x1e01   :  { %v2892_v9 = vpop.permute.xlu1 %2891 }
0x1e02   :  { %v6489_v59 = vadd.f32 %v2892_v9, %v2884_v10 }
0x1e04   :  { %5458 = vtanh.f32 %v6489_v59 }
0x1e0e   :  { %v5459_v2 = vpop.eup %5458 }
0x1e0f   :  { %2897 = vrot.lane.b32.xlu1 %v5459_v2, %s5758_s0 }
0x1e64   :  { %v2874_v44 = vpop.permute.xlu0 %2873 }
0x1e65   :  { %v2876_v39 = vmul.f32 %v5451_v37, %v2874_v44 }
0x1e67   :  { %2902 = vrot.lane.b32.xlu0 %v2876_v39, %s5759_s4 }
0x1e81   :  { %v2898_v17 = vpop.permute.xlu1 %2897 }
0x1e82   :  { %v6494_v4 = vmul.f32 %v5455_v54, %v2898_v17 }
0x1e84   :  { %2994 = vrot.lane.b32.xlu1 %v6494_v4, %s5759_s4 }
0x1ed9   :  { %v2903_v45 = vpop.permute.xlu0 %2902 }
0x1eda   :  { %2905 = vst.msk [vmem:[#allocation2 + $0x10] sm:$0xff] %vm329_vm2, %v2903_v45  ;;  %4879 = vmatmul.mubr.msk.f32.vlgmr.msra.gmra.mrb[30].mxu1 %vm329_vm2, %v2903_v45 }
0x1edb   :  { %5193 = vmatpush3.bf16.msra.mxu1 %v6310_v52  ;;  %4900 = vmatprep.mubr.msk.f32.mxu1 %vm5757_vm0, %v5756_v1 }
0x1edc   :  { %5194 = vmatprep.subr.bf16.mxu1 %v5755_v0 }
0x1edf   :  { %5196 = vmatpush3.bf16.msra.mxu1 %v6314_v63 }
0x1ee0   :  { %5203 = vmatprep.subr.bf16.mxu1 %v5755_v0 }
0x1ef6   :  { %v2995_v11 = vpop.permute.xlu1 %2994 }
0x1ef7   :  { %4890 = vmatmul.mubr.msk.f32.vlgmr.msra.gmra.mrb[46].mxu0 %vm329_vm2, %v2995_v11 }
0x1ef8   :  { %5199 = vmatpush3.bf16.msra.mxu0 %v6332_v38  ;;  %4911 = vmatprep.mubr.msk.f32.mxu0 %vm5757_vm0, %v5756_v1 }
0x1ef9   :  { %5200 = vmatprep.subr.bf16.mxu0 %v5755_v0 }
0x1efc   :  { %5202 = vmatpush3.bf16.msra.mxu0 %v6336_v14 }
0x1efd   :  { %5209 = vmatprep.subr.bf16.mxu0 %v5755_v0 }
0x1fad   :  { %v2984_v12 = vpop.f32.mrb[30].mxu1 }
0x1fae   :  { %v2988_v7 = vadd.f32 %v2984_v12, %v6391_v32  ;;  %v4880_v18 = vpop.f32.mrb[31].mxu1 }
0x1fb0   :  { %5460 = vtanh.f32 %v2988_v7  ;;  %v3069_v22 = vsub.f32 0.0, %v2988_v7 }
0x1fb2   :  { %v3070_v62 = vmul.f32 1.442695, %v3069_v22 }
0x1fba   :  { %v5461_v42 = vpop.eup %5460 }
0x1fbb   :  { %3078 = vrot.lane.b32.xlu0 %v5461_v42, %s5758_s0 }
0x1fca   :  { %v3064_v43 = vpop.f32.mrb[46].mxu0 }
0x1fcb   :  { %v3068_v13 = vadd.f32 %v3064_v43, %v6398_v48  ;;  %v4891_v15 = vpop.f32.mrb[47].mxu0 }
0x1fcd   :  { %5462 = vtanh.f32 %v3068_v13  ;;  %v3093_v32 = vsub.f32 0.0, %v3068_v13 }
0x1fce   :  { %5464 = vpow2.f32 %v3070_v62 }
0x1fcf   :  { %v3094_v23 = vmul.f32 1.442695, %v3093_v32 }
0x1fd7   :  { %v5463_v16 = vpop.eup %5462 }
0x1fd8   :  { %3102 = vrot.lane.b32.xlu1 %v5463_v16, %s5758_s0  ;;  %v5465_v20 = vpop.eup %5464 }
0x1fd9   :  { %v3072_v21 = vadd.f32 1.0, %v5465_v20 }
0x1fdb   :  { %5466 = vrcp.f32 %v3072_v21 }
0x1fdc   :  { %5468 = vpow2.f32 %v3094_v23 }
0x1fe5   :  { %v5467_v5 = vpop.eup %5466 }
0x1fe6   :  { %v5469_v48 = vpop.eup %5468  ;;  %v3076_v30 = vmul.f32 %v5467_v5, %v6484_v8 }
0x1fe7   :  { %v3096_v27 = vadd.f32 1.0, %v5469_v48 }
0x1fe9   :  { %5470 = vrcp.f32 %v3096_v27 }
0x1ff3   :  { %v5471_v19 = vpop.eup %5470 }
0x1ff4   :  { %v3100_v37 = vmul.f32 %v5471_v19, %v6489_v59 }
0x202d   :  { %v3079_v49 = vpop.permute.xlu0 %3078 }
0x202e   :  { %v3081_v24 = vmul.f32 %v5467_v5, %v3079_v49 }
0x2030   :  { %3083 = vrot.lane.b32.xlu0 %v3081_v24, %s5759_s4 }
0x204a   :  { %v3103_v50 = vpop.permute.xlu1 %3102 }
0x204b   :  { %v3105_v33 = vmul.f32 %v5471_v19, %v3103_v50 }
0x204d   :  { %3107 = vrot.lane.b32.xlu1 %v3105_v33, %s5759_s4 }
0x20a2   :  { %v3084_v29 = vpop.permute.xlu0 %3083 }
0x20a3   :  { %v6520_v34 = vadd.f32 %v3084_v29, %v3076_v30 }
0x20a5   :  { %5472 = vtanh.f32 %v6520_v34 }
0x20af   :  { %v5473_v36 = vpop.eup %5472 }
0x20b0   :  { %3089 = vrot.lane.b32.xlu0 %v5473_v36, %s5758_s0 }
0x20bf   :  { %v3108_v40 = vpop.permute.xlu1 %3107 }
0x20c0   :  { %v6525_v55 = vadd.f32 %v3108_v40, %v3100_v37 }
0x20c2   :  { %5474 = vtanh.f32 %v6525_v55 }
0x20cc   :  { %v5475_v46 = vpop.eup %5474 }
0x20cd   :  { %3113 = vrot.lane.b32.xlu1 %v5475_v46, %s5758_s0 }
0x2122   :  { %v3090_v51 = vpop.permute.xlu0 %3089 }
0x2123   :  { %v3092_v54 = vmul.f32 %v5467_v5, %v3090_v51 }
0x2125   :  { %3118 = vrot.lane.b32.xlu0 %v3092_v54, %s5759_s4 }
0x213f   :  { %v3114_v56 = vpop.permute.xlu1 %3113 }
0x2140   :  { %v6530_v60 = vmul.f32 %v5471_v19, %v3114_v56 }
0x2142   :  { %3210 = vrot.lane.b32.xlu1 %v6530_v60, %s5759_s4 }
0x2197   :  { %v3119_v61 = vpop.permute.xlu0 %3118 }
0x2198   :  { %3121 = vst.msk [vmem:[#allocation2 + $0x18] sm:$0xff] %vm329_vm2, %v3119_v61  ;;  %4901 = vmatmul.mubr.msk.f32.vlgmr.msra.gmra.mrb[32].mxu1 %vm329_vm2, %v3119_v61 }
0x2199   :  { %5205 = vmatpush3.bf16.msra.mxu1 %v6310_v52  ;;  %4922 = vmatprep.mubr.msk.f32.mxu1 %vm5757_vm0, %v5756_v1 }
0x219a   :  { %5206 = vmatprep.subr.bf16.mxu1 %v5755_v0 }
0x219d   :  { %5208 = vmatpush3.bf16.msra.mxu1 %v6314_v63 }
0x219e   :  { %5215 = vmatprep.subr.bf16.mxu1 %v5755_v0 }
0x21b4   :  { %v3211_v28 = vpop.permute.xlu1 %3210 }
0x21b5   :  { %4912 = vmatmul.mubr.msk.f32.vlgmr.msra.gmra.mrb[48].mxu0 %vm329_vm2, %v3211_v28 }
0x21b6   :  { %5211 = vmatpush3.bf16.msra.mxu0 %v6332_v38  ;;  %4933 = vmatprep.mubr.msk.f32.mxu0 %vm5757_vm0, %v5756_v1 }
0x21b7   :  { %5212 = vmatprep.subr.bf16.mxu0 %v5755_v0 }
0x21ba   :  { %5214 = vmatpush3.bf16.msra.mxu0 %v6336_v14 }
0x21bb   :  { %5221 = vmatprep.subr.bf16.mxu0 %v5755_v0 }
0x226b   :  { %v3200_v8 = vpop.f32.mrb[32].mxu1 }
0x226c   :  { %v3204_v3 = vadd.f32 %v3200_v8, %v6396_v41  ;;  %v4902_v10 = vpop.f32.mrb[33].mxu1 }
0x226e   :  { %5476 = vtanh.f32 %v3204_v3  ;;  %v3285_v17 = vsub.f32 0.0, %v3204_v3 }
0x2270   :  { %v3286_v45 = vmul.f32 1.442695, %v3285_v17 }
0x2278   :  { %v5477_v9 = vpop.eup %5476 }
0x2279   :  { %3294 = vrot.lane.b32.xlu0 %v5477_v9, %s5758_s0 }
0x2288   :  { %v3280_v59 = vpop.f32.mrb[48].mxu0 }
0x2289   :  { %v3284_v2 = vadd.f32 %v3280_v59, %v6393_v58  ;;  %v4913_v44 = vpop.f32.mrb[49].mxu0 }
0x228b   :  { %5478 = vtanh.f32 %v3284_v2  ;;  %v3309_v41 = vsub.f32 0.0, %v3284_v2 }
0x228c   :  { %5480 = vpow2.f32 %v3286_v45 }
0x228d   :  { %v3310_v7 = vmul.f32 1.442695, %v3309_v41 }
0x2295   :  { %v5479_v39 = vpop.eup %5478 }
0x2296   :  { %3318 = vrot.lane.b32.xlu1 %v5479_v39, %s5758_s0  ;;  %v5481_v11 = vpop.eup %5480 }
0x2297   :  { %v3288_v12 = vadd.f32 1.0, %v5481_v11 }
0x2299   :  { %5482 = vrcp.f32 %v3288_v12 }
0x229a   :  { %5484 = vpow2.f32 %v3310_v7 }
0x22a3   :  { %v5483_v18 = vpop.eup %5482 }
0x22a4   :  { %v5485_v58 = vpop.eup %5484  ;;  %v3292_v62 = vmul.f32 %v5483_v18, %v6520_v34 }
0x22a5   :  { %v3312_v13 = vadd.f32 1.0, %v5485_v58 }
0x22a7   :  { %5486 = vrcp.f32 %v3312_v13 }
0x22b1   :  { %v5487_v15 = vpop.eup %5486 }
0x22b2   :  { %v3316_v23 = vmul.f32 %v5487_v15, %v6525_v55 }
0x22eb   :  { %v3295_v42 = vpop.permute.xlu0 %3294 }
0x22ec   :  { %v3297_v43 = vmul.f32 %v5483_v18, %v3295_v42 }
0x22ee   :  { %3299 = vrot.lane.b32.xlu0 %v3297_v43, %s5759_s4 }
0x2308   :  { %v3319_v16 = vpop.permute.xlu1 %3318 }
0x2309   :  { %v3321_v22 = vmul.f32 %v5487_v15, %v3319_v16 }
0x230b   :  { %3323 = vrot.lane.b32.xlu1 %v3321_v22, %s5759_s4 }
0x2360   :  { %v3300_v20 = vpop.permute.xlu0 %3299 }
0x2361   :  { %v3302_v21 = vadd.f32 %v3300_v20, %v3292_v62 }
0x2363   :  { %5488 = vtanh.f32 %v3302_v21 }
0x236d   :  { %v5489_v32 = vpop.eup %5488 }
0x236e   :  { %3305 = vrot.lane.b32.xlu0 %v5489_v32, %s5758_s0 }
0x237d   :  { %v3324_v5 = vpop.permute.xlu1 %3323 }
0x237e   :  { %v3326_v49 = vadd.f32 %v3324_v5, %v3316_v23 }
0x2380   :  { %5490 = vtanh.f32 %v3326_v49 }
0x238a   :  { %v5491_v24 = vpop.eup %5490 }
0x238b   :  { %3329 = vrot.lane.b32.xlu1 %v5491_v24, %s5758_s0 }
0x23e0   :  { %v3306_v48 = vpop.permute.xlu0 %3305 }
0x23e1   :  { %v3308_v27 = vmul.f32 %v5483_v18, %v3306_v48 }
0x23e3   :  { %3334 = vrot.lane.b32.xlu0 %v3308_v27, %s5759_s4 }
0x23fd   :  { %v3330_v19 = vpop.permute.xlu1 %3329 }
0x23fe   :  { %v6560_v50 = vmul.f32 %v5487_v15, %v3330_v19 }
0x2400   :  { %3426 = vrot.lane.b32.xlu1 %v6560_v50, %s5759_s4 }
0x2455   :  { %v6564_v33 = vpop.permute.xlu0 %3334 }
0x2456   :  { %4923 = vmatmul.mubr.msk.f32.vlgmr.msra.gmra.mrb[34].mxu1 %vm329_vm2, %v6564_v33 }
0x2457   :  { %5217 = vmatpush3.bf16.msra.mxu1 %v6310_v52  ;;  %4944 = vmatprep.mubr.msk.f32.mxu1 %vm5757_vm0, %v5756_v1 }
0x2458   :  { %5218 = vmatprep.subr.bf16.mxu1 %v5755_v0 }
0x245b   :  { %5220 = vmatpush3.bf16.msra.mxu1 %v6314_v63 }
0x245c   :  { %5227 = vmatprep.subr.bf16.mxu1 %v5755_v0 }
0x2472   :  { %v3427_v30 = vpop.permute.xlu1 %3426 }
0x2473   :  { %4934 = vmatmul.mubr.msk.f32.vlgmr.msra.gmra.mrb[50].mxu0 %vm329_vm2, %v3427_v30 }
0x2474   :  { %5223 = vmatpush3.bf16.msra.mxu0 %v6332_v38  ;;  %4955 = vmatprep.mubr.msk.f32.mxu0 %vm5757_vm0, %v5756_v1 }
0x2475   :  { %5224 = vmatprep.subr.bf16.mxu0 %v5755_v0 }
0x2478   :  { %5226 = vmatpush3.bf16.msra.mxu0 %v6336_v14 }
0x2479   :  { %5233 = vmatprep.subr.bf16.mxu0 %v5755_v0 }
0x2529   :  { %v3416_v52 = vpop.f32.mrb[34].mxu1 }
0x252a   :  { %v3420_v29 = vadd.f32 %v3416_v52, %v6400_v53  ;;  %v4924_v63 = vpop.f32.mrb[35].mxu1 }
0x252c   :  { %5492 = vtanh.f32 %v3420_v29  ;;  %v3501_v55 = vsub.f32 0.0, %v3420_v29 }
0x252e   :  { %v3502_v14 = vmul.f32 1.442695, %v3501_v55 }
0x2536   :  { %v5493_v34 = vpop.eup %5492 }
0x2537   :  { %3510 = vrot.lane.b32.xlu0 %v5493_v34, %s5758_s0 }
0x2546   :  { %v3496_v36 = vpop.f32.mrb[50].mxu0 }
0x2547   :  { %v3500_v38 = vadd.f32 %v3496_v36, %v6389_v35  ;;  %v4935_v37 = vpop.f32.mrb[51].mxu0 }
0x2549   :  { %5494 = vtanh.f32 %v3500_v38  ;;  %v3525_v53 = vsub.f32 0.0, %v3500_v38 }
0x254a   :  { %5496 = vpow2.f32 %v3502_v14 }
0x254b   :  { %v3526_v54 = vmul.f32 1.442695, %v3525_v53  ;;  %v3777_v53 = vld [vmem:[#allocation12 + $0x8] sm:$0xff] }
0x2553   :  { %v5495_v40 = vpop.eup %5494 }
0x2554   :  { %3534 = vrot.lane.b32.xlu1 %v5495_v40, %s5758_s0  ;;  %v5497_v46 = vpop.eup %5496 }
0x2555   :  { %v3504_v51 = vadd.f32 1.0, %v5497_v46 }
0x2557   :  { %5498 = vrcp.f32 %v3504_v51  ;;  %v3776_v51 = vld [vmem:[#allocation12] sm:$0xff] }
0x2558   :  { %5500 = vpow2.f32 %v3526_v54  ;;  %v3778_v54 = vld [vmem:[#allocation12 + $0x10] sm:$0xff] }
0x2561   :  { %v5499_v56 = vpop.eup %5498 }
0x2562   :  { %v5501_v35 = vpop.eup %5500  ;;  %v3508_v59 = vmul.f32 %v5499_v56, %v3302_v21 }
0x2563   :  { %v3528_v8 = vadd.f32 1.0, %v5501_v35 }
0x2565   :  { %5502 = vrcp.f32 %v3528_v8  ;;  %v3854_v8 = vld [vmem:[#allocation13] sm:$0xff] }
0x256f   :  { %v5503_v3 = vpop.eup %5502 }
0x2570   :  { %v3532_v17 = vmul.f32 %v5503_v3, %v3326_v49 }
0x25a9   :  { %v3511_v61 = vpop.permute.xlu0 %3510 }
0x25aa   :  { %v3513_v28 = vmul.f32 %v5499_v56, %v3511_v61  ;;  %v3779_v61 = vld [vmem:[#allocation12 + $0x18] sm:$0xff] }
0x25ac   :  { %3515 = vrot.lane.b32.xlu0 %v3513_v28, %s5759_s4  ;;  %v5231_v28 = vpack.c.bf16 %v3779_v61, %v3778_v54  ;;  %v4003_v54 = vld [vmem:[%s6844_s9 + $0x20] sm:$0xff] }
0x25c6   :  { %v3535_v10 = vpop.permute.xlu1 %3534 }
0x25c7   :  { %v3537_v9 = vmul.f32 %v5503_v3, %v3535_v10  ;;  %v3856_v10 = vld [vmem:[#allocation13 + $0x10] sm:$0xff] }
0x25c9   :  { %3539 = vrot.lane.b32.xlu1 %v3537_v9, %s5759_s4 }
0x261e   :  { %v3516_v2 = vpop.permute.xlu0 %3515 }
0x261f   :  { %v3518_v44 = vadd.f32 %v3516_v2, %v3508_v59  ;;  %v3857_v59 = vld [vmem:[#allocation13 + $0x18] sm:$0xff] }
0x2620   :  { %v5237_v2 = vpack.c.bf16 %v3857_v59, %v3856_v10 }
0x2621   :  { %5504 = vtanh.f32 %v3518_v44 }
0x262b   :  { %v5505_v39 = vpop.eup %5504 }
0x262c   :  { %3521 = vrot.lane.b32.xlu0 %v5505_v39, %s5758_s0 }
0x263b   :  { %v3540_v45 = vpop.permute.xlu1 %3539 }
0x263c   :  { %v3542_v11 = vadd.f32 %v3540_v45, %v3532_v17 }
0x263e   :  { %5506 = vtanh.f32 %v3542_v11 }
0x2648   :  { %v5507_v12 = vpop.eup %5506 }
0x2649   :  { %3545 = vrot.lane.b32.xlu1 %v5507_v12, %s5758_s0 }
0x269e   :  { %v3522_v41 = vpop.permute.xlu0 %3521 }
0x269f   :  { %v3524_v7 = vmul.f32 %v5499_v56, %v3522_v41  ;;  %v5228_v56 = vpack.c.bf16 %v3777_v53, %v3776_v51 }
0x26a1   :  { %3550 = vrot.lane.b32.xlu0 %v3524_v7, %s5759_s4 }
0x26bb   :  { %v3546_v18 = vpop.permute.xlu1 %3545 }
0x26bc   :  { %v6590_v42 = vmul.f32 %v5503_v3, %v3546_v18  ;;  %v3855_v3 = vld [vmem:[#allocation13 + $0x8] sm:$0xff] }
0x26bd   :  { %v5234_v9 = vpack.c.bf16 %v3855_v3, %v3854_v8 }
0x26be   :  { %3642 = vrot.lane.b32.xlu1 %v6590_v42, %s5759_s4 }
0x2713   :  { %v6594_v43 = vpop.permute.xlu0 %3550 }
0x2714   :  { %4945 = vmatmul.mubr.msk.f32.vlgmr.msra.gmra.mrb[36].mxu1 %vm329_vm2, %v6594_v43 }
0x2715   :  { %4966 = vmatprep.mubr.msk.f32.mxu1 %vm5757_vm0, %v5756_v1  ;;  %5229 = vmatpush3.bf16.msra.mxu1 %v5228_v56  ;;  %v4004_v56 = vld [vmem:[%s6844_s9 + $0x28] sm:$0xff] }
0x2716   :  { %5230 = vmatprep.subr.bf16.mxu1 %v5755_v0  ;;  %v5247_v61 = vpack.c.bf16 %v4004_v56, %v4003_v54  ;;  %v4269_v56 = vld [vmem:[%s6847_s12] sm:$0xff] }
0x2719   :  { %5232 = vmatpush3.bf16.msra.mxu1 %v5231_v28  ;;  %v4005_v28 = vld [vmem:[%s6844_s9 + $0x30] sm:$0xff] }
0x2730   :  { %v3643_v58 = vpop.permute.xlu1 %3642 }
0x2731   :  { %4956 = vmatmul.mubr.msk.f32.vlgmr.msra.gmra.mrb[52].mxu0 %vm329_vm2, %v3643_v58 }
0x2732   :  { %4977 = vmatprep.mubr.msk.f32.mxu0 %vm5757_vm0, %v5756_v1  ;;  %5235 = vmatpush3.bf16.msra.mxu0 %v5234_v9 }
0x2733   :  { %5236 = vmatprep.subr.bf16.mxu0 %v5755_v0 }
0x2736   :  { %5238 = vmatpush3.bf16.msra.mxu0 %v5237_v2 }
0x2737   :  { %5255 = vmatprep.subr.bf16.mxu0 %v5755_v0 }
0x27e7   :  { %v3632_v13 = vpop.f32.mrb[36].mxu1 }
0x27e8   :  { %v3636_v15 = vadd.f32 %v3632_v13, %v6404_v57  ;;  %v4946_v16 = vpop.f32.mrb[37].mxu1 }
0x27ea   :  { %5508 = vtanh.f32 %v3636_v15  ;;  %v3717_v23 = vsub.f32 0.0, %v3636_v15 }
0x27ec   :  { %v3718_v5 = vmul.f32 1.442695, %v3717_v23 }
0x27f4   :  { %v5509_v22 = vpop.eup %5508 }
0x27f5   :  { %3726 = vrot.lane.b32.xlu0 %v5509_v22, %s5758_s0 }
0x2804   :  { %v3712_v62 = vpop.f32.mrb[52].mxu0 }
0x2805   :  { %v3716_v20 = vadd.f32 %v3712_v62, %v6385_v31  ;;  %v4957_v21 = vpop.f32.mrb[53].mxu0 }
0x2807   :  { %5510 = vtanh.f32 %v3716_v20  ;;  %v3741_v57 = vsub.f32 0.0, %v3716_v20 }
0x2808   :  { %5512 = vpow2.f32 %v3718_v5 }
0x2809   :  { %v3742_v48 = vmul.f32 1.442695, %v3741_v57 }
0x2811   :  { %v5511_v32 = vpop.eup %5510 }
0x2812   :  { %3750 = vrot.lane.b32.xlu1 %v5511_v32, %s5758_s0  ;;  %v5513_v49 = vpop.eup %5512 }
0x2813   :  { %v3720_v24 = vadd.f32 1.0, %v5513_v49 }
0x2815   :  { %5514 = vrcp.f32 %v3720_v24 }
0x2816   :  { %5516 = vpow2.f32 %v3742_v48 }
0x281f   :  { %v5515_v27 = vpop.eup %5514 }
0x2820   :  { %v5517_v31 = vpop.eup %5516  ;;  %v3724_v36 = vmul.f32 %v5515_v27, %v3518_v44 }
0x2821   :  { %v3744_v52 = vadd.f32 1.0, %v5517_v31 }
0x2823   :  { %5518 = vrcp.f32 %v3744_v52 }
0x282d   :  { %v5519_v29 = vpop.eup %5518 }
0x282e   :  { %v3748_v55 = vmul.f32 %v5519_v29, %v3542_v11 }
0x2867   :  { %v3727_v19 = vpop.permute.xlu0 %3726 }
0x2868   :  { %v3729_v30 = vmul.f32 %v5515_v27, %v3727_v19 }
0x286a   :  { %3731 = vrot.lane.b32.xlu0 %v3729_v30, %s5759_s4 }
0x2884   :  { %v3751_v63 = vpop.permute.xlu1 %3750 }
0x2885   :  { %v3753_v34 = vmul.f32 %v5519_v29, %v3751_v63 }
0x2887   :  { %3755 = vrot.lane.b32.xlu1 %v3753_v34, %s5759_s4 }
0x28dc   :  { %v3732_v38 = vpop.permute.xlu0 %3731 }
0x28dd   :  { %v6609_v37 = vadd.f32 %v3732_v38, %v3724_v36  ;;  %v3999_v38 = vld [vmem:[%s6844_s9] sm:$0xff] }
0x28df   :  { %5520 = vtanh.f32 %v6609_v37 }
0x28e9   :  { %v5521_v40 = vpop.eup %5520 }
0x28ea   :  { %3737 = vrot.lane.b32.xlu0 %v5521_v40, %s5758_s0 }
0x28f9   :  { %v3756_v14 = vpop.permute.xlu1 %3755 }
0x28fa   :  { %v6613_v46 = vadd.f32 %v3756_v14, %v3748_v55 }
0x28fc   :  { %5522 = vtanh.f32 %v6613_v46 }
0x2906   :  { %v5523_v35 = vpop.eup %5522 }
0x2907   :  { %3761 = vrot.lane.b32.xlu1 %v5523_v35, %s5758_s0 }
0x295c   :  { %v3738_v44 = vpop.permute.xlu0 %3737 }
0x295d   :  { %v3740_v39 = vmul.f32 %v5515_v27, %v3738_v44 }
0x295f   :  { %3766 = vrot.lane.b32.xlu0 %v3740_v39, %s5759_s4 }
0x2979   :  { %v3762_v17 = vpop.permute.xlu1 %3761 }
0x297a   :  { %v3764_v45 = vmul.f32 %v5519_v29, %v3762_v17 }
0x297c   :  { %3858 = vrot.lane.b32.xlu1 %v3764_v45, %s5759_s4 }
0x29d1   :  { %v6622_v11 = vpop.permute.xlu0 %3766 }
0x29d2   :  { %4967 = vmatmul.mubr.msk.f32.vlgmr.msra.gmra.mrb[38].mxu1 %vm329_vm2, %v6622_v11 }
0x29ee   :  { %v3859_v12 = vpop.permute.xlu1 %3858 }
0x29ef   :  { %4978 = vmatmul.mubr.msk.f32.vlgmr.msra.gmra.mrb[54].mxu0 %vm329_vm2, %v3859_v12 }
0x29f0   :  { %5024 = vmatprep.mubr.msk.f32.mxu0 %vm5757_vm0, %v5756_v1 }
0x2aa5   :  { %v3848_v41 = vpop.f32.mrb[38].mxu1 }
0x2aa6   :  { %v3852_v7 = vadd.f32 %v3848_v41, %v6408_v47  ;;  %v4968_v18 = vpop.f32.mrb[39].mxu1  ;;  %v4431_v41 = vld [vmem:[%s6845_s10] ss:$0 sm:$0xff] }
0x2aa8   :  { %5524 = vtanh.f32 %v3852_v7  ;;  %v3933_v62 = vsub.f32 0.0, %v3852_v7 }
0x2aaa   :  { %v3934_v20 = vmul.f32 1.442695, %v3933_v62 }
0x2ab2   :  { %v5525_v58 = vpop.eup %5524 }
0x2ab3   :  { %3942 = vrot.lane.b32.xlu0 %v5525_v58, %s5758_s0 }
0x2ac2   :  { %v3928_v13 = vpop.f32.mrb[54].mxu0 }
0x2ac3   :  { %v3932_v15 = vadd.f32 %v3928_v13, %v6381_v25  ;;  %v4979_v16 = vpop.f32.mrb[55].mxu0  ;;  %v4440_v13 = vld [vmem:[%s6846_s11] ss:$0 sm:$0xff] }
0x2ac5   :  { %5526 = vtanh.f32 %v3932_v15  ;;  %v3957_v47 = vsub.f32 0.0, %v3932_v15 }
0x2ac6   :  { %5528 = vpow2.f32 %v3934_v20 }
0x2ac7   :  { %v3958_v32 = vmul.f32 1.442695, %v3957_v47 }
0x2acf   :  { %v5527_v22 = vpop.eup %5526 }
0x2ad0   :  { %3966 = vrot.lane.b32.xlu1 %v5527_v22, %s5758_s0  ;;  %v5529_v1 = vpop.eup %5528 }
0x2ad1   :  { %v3936_v21 = vadd.f32 1.0, %v5529_v1 }
0x2ad3   :  { %5530 = vrcp.f32 %v3936_v21 }
0x2ad4   :  { %5532 = vpow2.f32 %v3958_v32 }
0x2add   :  { %v6633_v23 = vpop.eup %5530 }
0x2ade   :  { %v5533_v25 = vpop.eup %5532  ;;  %v3940_v19 = vmul.f32 %v6633_v23, %v6609_v37 }
0x2adf   :  { %v3960_v24 = vadd.f32 1.0, %v5533_v25 }
0x2ae1   :  { %5534 = vrcp.f32 %v3960_v24 }
0x2aeb   :  { %v5535_v57 = vpop.eup %5534 }
0x2aec   :  { %v3964_v29 = vmul.f32 %v5535_v57, %v6613_v46 }
0x2b25   :  { %v3943_v5 = vpop.permute.xlu0 %3942 }
0x2b26   :  { %v3945_v49 = vmul.f32 %v6633_v23, %v3943_v5 }
0x2b28   :  { %3947 = vrot.lane.b32.xlu0 %v3945_v49, %s5759_s4 }
0x2b42   :  { %v3967_v48 = vpop.permute.xlu1 %3966 }
0x2b43   :  { %v3969_v27 = vmul.f32 %v5535_v57, %v3967_v48 }
0x2b45   :  { %3971 = vrot.lane.b32.xlu1 %v3969_v27, %s5759_s4 }
0x2b9a   :  { %v3948_v30 = vpop.permute.xlu0 %3947 }
0x2b9b   :  { %v3950_v31 = vadd.f32 %v3948_v30, %v3940_v19 }
0x2b9d   :  { %5536 = vtanh.f32 %v3950_v31 }
0x2ba7   :  { %v5537_v52 = vpop.eup %5536 }
0x2ba8   :  { %3953 = vrot.lane.b32.xlu0 %v5537_v52, %s5758_s0 }
0x2bac   :  { %3771 = vrot.lane.b32.xlu0 %v3764_v45, %s5758_s0 }
0x2bb0   :  { %3339 = vrot.lane.b32.xlu0 %v6560_v50, %s5758_s0  ;;  %v4000_v50 = vld [vmem:[%s6844_s9 + $0x8] sm:$0xff] }
0x2bb1   :  { %v5239_v37 = vpack.c.bf16 %v4000_v50, %v3999_v38 }
0x2bb3   :  { %5240 = vmatprep.subr.bf16.mxu1 %v5239_v37 }
0x2bb4   :  { %2907 = vrot.lane.b32.xlu0 %v6494_v4, %s5758_s0  ;;  %v4001_v4 = vld [vmem:[%s6844_s9 + $0x10] sm:$0xff]  ;;  %5242 = vmatpush3.bf16.msra.mxu1 %v5239_v37 }
0x2bb7   :  { %v3972_v63 = vpop.permute.xlu1 %3971 }
0x2bb8   :  { %v3974_v34 = vadd.f32 %v3972_v63, %v3964_v29  ;;  %2475 = vrot.lane.b32.xlu0 %v6422_v26, %s5758_s0  ;;  %v4002_v26 = vld [vmem:[%s6844_s9 + $0x18] sm:$0xff] }
0x2bb9   :  { %v5243_v40 = vpack.c.bf16 %v4002_v26, %v4001_v4 }
0x2bba   :  { %5538 = vtanh.f32 %v3974_v34 }
0x2bbb   :  { %5244 = vmatprep.subr.bf16.mxu1 %v5243_v40 }
0x2bbc   :  { %5246 = vmatpush3.bf16.msra.mxu1 %v5243_v40 }
0x2bbd   :  { %5248 = vmatprep.subr.bf16.mxu1 %v5247_v61 }
0x2bc0   :  { %5250 = vmatpush3.bf16.msra.mxu1 %v5247_v61  ;;  %v4270_v61 = vld [vmem:[%s6847_s12 + $0x8] sm:$0xff] }
0x2bc4   :  { %v5539_v36 = vpop.eup %5538 }
0x2bc5   :  { %3977 = vrot.lane.b32.xlu1 %v5539_v36, %s5758_s0 }
0x2c1a   :  { %v3954_v55 = vpop.permute.xlu0 %3953 }
0x2c1b   :  { %v3956_v10 = vmul.f32 %v6633_v23, %v3954_v55 }
0x2c1e   :  { %v3772_v14 = vpop.permute.xlu0 %3771 }
0x2c1f   :  { %3774 = vst.msk [vmem:[#allocation2 + $0x8] sm:$0xff] %vm541_vm3, %v3772_v14 }
0x2c22   :  { %v3340_v46 = vpop.permute.xlu0 %3339 }
0x2c23   :  { %3342 = vst.msk [vmem:[#allocation2 + $0x18] sm:$0xff] %vm541_vm3, %v3340_v46 }
0x2c26   :  { %v2908_v51 = vpop.permute.xlu0 %2907 }
0x2c27   :  { %2910 = vst.msk [vmem:[#allocation2 + $0x28] sm:$0xff] %vm541_vm3, %v2908_v51 }
0x2c28   :  { %3553 = vst.msk [vmem:[#allocation2 + $0x28] sm:$0xff] %vm329_vm2, %v6594_v43  ;;  %v4006_v43 = vld [vmem:[%s6844_s9 + $0x38] sm:$0xff] }
0x2c29   :  { %v5251_v35 = vpack.c.bf16 %v4006_v43, %v4005_v28  ;;  %v4271_v28 = vld [vmem:[%s6847_s12 + $0x10] sm:$0xff]  ;;  %v5256_v43 = vpack.c.bf16 %v4270_v61, %v4269_v56 }
0x2c2a   :  { %v2476_v53 = vpop.permute.xlu0 %2475  ;;  %v6707_v39 = vld [vmem:[#allocation2 + $0x18] sm:$0xff] }
0x2c2b   :  { %2478 = vst.msk [vmem:[#allocation2 + $0x38] sm:$0xff] %vm541_vm3, %v2476_v53  ;;  %5252 = vmatprep.subr.bf16.mxu1 %v5251_v35  ;;  %5257 = vmatpush3.bf16.msra.mxu0 %v5256_v43 }
0x2c2c   :  { %5254 = vmatpush3.bf16.msra.mxu1 %v5251_v35  ;;  %v4272_v35 = vld [vmem:[%s6847_s12 + $0x18] sm:$0xff]  ;;  %5258 = vmatprep.subr.bf16.mxu0 %v5755_v0 }
0x2c2f   :  { %v6718_v45 = vld [vmem:[#allocation2 + $0x28] sm:$0xff] }
0x2c37   :  { %v3978_v8 = vpop.permute.xlu1 %3977 }
0x2c38   :  { %v3980_v3 = vmul.f32 %v5535_v57, %v3978_v8  ;;  %v5259_v8 = vpack.c.bf16 %v4272_v35, %v4271_v28 }
0x2c3a   :  { %3987 = vrot.lane.b32.xlu1 %v3980_v3, %s5758_s0  ;;  %v4273_v3 = vld [vmem:[%s6847_s12 + $0x20] sm:$0xff]  ;;  %5260 = vmatpush3.bf16.msra.mxu0 %v5259_v8 }
0x2c3b   :  { %5261 = vmatprep.subr.bf16.mxu0 %v5755_v0 }
0x2c3e   :  { %3555 = vrot.lane.b32.xlu1 %v6590_v42, %s5758_s0 }
0x2c42   :  { %3123 = vrot.lane.b32.xlu1 %v6530_v60, %s5758_s0  ;;  %v6696_v60 = vld [vmem:[#allocation2 + $0x8] sm:$0xff] }
0x2c46   :  { %2691 = vrot.lane.b32.xlu1 %v6458_v6, %s5758_s0  ;;  %s5712_s0 = scalar_lea.vmem %s4365_s19, 128 }
0x2c47   :  { %p5713_p0 = scmp.ne.s32.totalorder %s4365_s19, %s5712_s0  ;;  %p5718_p2 = scmp.lt.s32.totalorder %s5712_s0, %s5712_s0 }
0x2c49   :  { %p5719_p3 = por %p5718_p2, %p5717_p1 }
0x2c4a   :  { %3982 = vrot.lane.b32.xlu1 %v3956_v10, %s5759_s4  ;;  %v4274_v10 = vld [vmem:[%s6847_s12 + $0x28] sm:$0xff] }
0x2c4b   :  { %p5720_p4 = pnand %p5719_p3, %p5713_p0 }
0x2cac   :  { %v3988_v9 = vpop.permute.xlu1 %3987 }
0x2cad   :  { %3990 = vst.msk [vmem:[#allocation2] sm:$0xff] %vm541_vm3, %v3988_v9  ;;  %v5262_v9 = vpack.c.bf16 %v4274_v10, %v4273_v3 }
0x2caf   :  { %5263 = vmatpush3.bf16.msra.mxu0 %v5262_v9 }
0x2cb0   :  { %v3556_v59 = vpop.permute.xlu1 %3555  ;;  %5264 = vmatprep.subr.bf16.mxu0 %v5755_v0 }
0x2cb1   :  { %3558 = vst.msk [vmem:[#allocation2 + $0x10] sm:$0xff] %vm541_vm3, %v3556_v59  ;;  %v4275_v59 = vld [vmem:[%s6847_s12 + $0x30] sm:$0xff] }
0x2cb4   :  { %v3124_v2 = vpop.permute.xlu1 %3123  ;;  %v6691_v44 = vld [vmem:[#allocation2] sm:$0xff] }
0x2cb5   :  { %3126 = vst.msk [vmem:[#allocation2 + $0x20] sm:$0xff] %vm541_vm3, %v3124_v2  ;;  %4996 = vmatprep.mubr.msk.f32.mxu1 %vm2115_vm4, %v6691_v44  ;;  %v4276_v2 = vld [vmem:[%s6847_s12 + $0x38] sm:$0xff] }
0x2cb6   :  { %3337 = vst.msk [vmem:[#allocation2 + $0x20] sm:$0xff] %vm329_vm2, %v6564_v33  ;;  %4997 = vmatmul.mubr.msk.f32.vlgmr.msra.gmra.mrb[40].mxu1 %vm2115_vm4, %v6696_v60 }
0x2cb8   :  { %v2692_v6 = vpop.permute.xlu1 %2691  ;;  %v6702_v42 = vld [vmem:[#allocation2 + $0x10] sm:$0xff] }
0x2cb9   :  { %2694 = vst.msk [vmem:[#allocation2 + $0x30] sm:$0xff] %vm541_vm3, %v2692_v6  ;;  %4999 = vmatprep.mubr.msk.f32.mxu1 %vm2115_vm4, %v6702_v42  ;;  %v5265_v6 = vpack.c.bf16 %v4276_v2, %v4275_v59 }
0x2cba   :  { %3769 = vst.msk [vmem:[#allocation2 + $0x30] sm:$0xff] %vm329_vm2, %v6622_v11  ;;  %5000 = vmatmul.mubr.msk.f32.gmra.mrb[42].mxu1 %vm2115_vm4, %v6707_v39 }
0x2cbb   :  { %5266 = vmatpush3.bf16.msra.mxu0 %v5265_v6 }
0x2cbc   :  { %v3983_v33 = vpop.permute.xlu1 %3982 }
0x2cbd   :  { %3985 = vst.msk [vmem:[#allocation2 + $0x38] sm:$0xff] %vm329_vm2, %v3983_v33  ;;  %v6714_v17 = vld [vmem:[#allocation2 + $0x20] sm:$0xff] }
0x2cbe   :  { %5002 = vmatprep.mubr.msk.f32.mxu1 %vm2115_vm4, %v6714_v17 }
0x2cbf   :  { %5003 = vmatmul.mubr.msk.f32.gmra.mrb[44].mxu1 %vm2115_vm4, %v6718_v45 }
0x2cc1   :  { %v6722_v12 = vld [vmem:[#allocation2 + $0x30] sm:$0xff] }
0x2cc2   :  { %5005 = vmatprep.mubr.msk.f32.mxu1 %vm2115_vm4, %v6722_v12 }
0x2cc4   :  { %v6726_v11 = vld [vmem:[#allocation2 + $0x38] sm:$0xff] }
0x2cc5   :  { %5006 = vmatmul.mubr.msk.f32.gmra.mrb[46].mxu1 %vm2115_vm4, %v6726_v11 }
0x2d89   :  { %v4998_v7 = vpop.f32.mrb[40].mxu1 }
0x2d8a   :  { %v4110_v18 = vadd.f32 %v4998_v7, %v4431_v41  ;;  %v4104_v58 = vpop.f32.mrb[41].mxu1 }
0x2d8b   :  { %v4105_v15 = vadd.f32 %v4431_v41, %v4104_v58 }
0x2d8c   :  { %v4144_v16 = vmax.f32 %v4110_v18, 0.0 }
0x2d8d   :  { %v4143_v22 = vmax.f32 %v4105_v15, 0.0  ;;  %v5001_v62 = vpop.f32.mrb[42].mxu1 }
0x2d8e   :  { %v4159_v20 = vmul.f32 %v4440_v13, %v4144_v16  ;;  %v4120_v1 = vadd.f32 %v5001_v62, %v4431_v41  ;;  %v4114_v21 = vpop.f32.mrb[43].mxu1 }
0x2d8f   :  { %v4158_v47 = vmul.f32 %v4440_v13, %v4143_v22  ;;  %v4115_v32 = vadd.f32 %v4431_v41, %v4114_v21 }
0x2d90   :  { %v4146_v23 = vmax.f32 %v4120_v1, 0.0  ;;  %v4169_v5 = vsel %vm329_vm2, %v4159_v20, 0.0 }
0x2d91   :  { %v4145_v49 = vmax.f32 %v4115_v32, 0.0  ;;  %4170 = vadd.xlane.f32.xlu1 %v4169_v5  ;;  %v4166_v25 = vsel %vm329_vm2, %v4158_v47, 0.0 }
0x2d92   :  { %v4161_v24 = vmul.f32 %v4440_v13, %v4146_v23  ;;  %v5004_v57 = vpop.f32.mrb[44].mxu1  ;;  %4167 = vadd.xlane.f32.xlu0 %v4166_v25 }
0x2d93   :  { %v4130_v48 = vadd.f32 %v5004_v57, %v4431_v41  ;;  %v4124_v27 = vpop.f32.mrb[45].mxu1  ;;  %v4160_v31 = vmul.f32 %v4440_v13, %v4145_v49 }
0x2d94   :  { %v4125_v19 = vadd.f32 %v4431_v41, %v4124_v27  ;;  %v4175_v30 = vsel %vm329_vm2, %v4161_v24, 0.0 }
0x2d95   :  { %v4148_v52 = vmax.f32 %v4130_v48, 0.0  ;;  %v4172_v4 = vsel %vm329_vm2, %v4160_v31, 0.0 }
0x2d96   :  { %v4147_v29 = vmax.f32 %v4125_v19, 0.0  ;;  %4176 = vadd.xlane.f32.xlu0 %v4175_v30 }
0x2d97   :  { %v4163_v36 = vmul.f32 %v4440_v13, %v4148_v52 }
0x2d98   :  { %v4162_v63 = vmul.f32 %v4440_v13, %v4147_v29  ;;  %v5007_v34 = vpop.f32.mrb[46].mxu1 }
0x2d99   :  { %v4140_v38 = vadd.f32 %v5007_v34, %v4431_v41  ;;  %v4134_v50 = vpop.f32.mrb[47].mxu1  ;;  %v4181_v46 = vsel %vm329_vm2, %v4163_v36, 0.0 }
0x2d9a   :  { %v4135_v37 = vadd.f32 %v4431_v41, %v4134_v50  ;;  %4173 = vadd.xlane.f32.xlu0 %v4172_v4  ;;  %v4178_v26 = vsel %vm329_vm2, %v4162_v63, 0.0 }
0x2d9b   :  { %v4150_v40 = vmax.f32 %v4140_v38, 0.0  ;;  %4179 = vadd.xlane.f32.xlu1 %v4178_v26 }
0x2d9c   :  { %v4149_v55 = vmax.f32 %v4135_v37, 0.0 }
0x2d9d   :  { %v4165_v14 = vmul.f32 %v4440_v13, %v4150_v40 }
0x2d9e   :  { %v4164_v51 = vmul.f32 %v4440_v13, %v4149_v55  ;;  %4182 = vadd.xlane.f32.xlu0 %v4181_v46 }
0x2d9f   :  { %v4187_v54 = vsel %vm329_vm2, %v4165_v14, 0.0 }
0x2da0   :  { %v4184_v53 = vsel %vm329_vm2, %v4164_v51, 0.0 }
0x2da1   :  { %4185 = vadd.xlane.f32.xlu1 %v4184_v53 }
0x2da2   :  { %4188 = vadd.xlane.f32.xlu0 %v4187_v54 }
0x2e1e   :  { %v4171_v7 = vpop.xlane.xlu1 %4170 }
0x2e1f   :  { %v4168_v33 = vpop.xlane.xlu0 %4167 }
0x2e23   :  { %v4177_v41 = vpop.xlane.xlu0 %4176 }
0x2e27   :  { %v4174_v18 = vpop.xlane.xlu0 %4173 }
0x2e28   :  { %v4180_v58 = vpop.xlane.xlu1 %4179 }
0x2e29   :  { %v4190_v20 = vmax.f32 %v4168_v33, %v4180_v58 }
0x2e2b   :  { %v4183_v13 = vpop.xlane.xlu0 %4182 }
0x2e2c   :  { %v4191_v15 = vmax.f32 %v4171_v7, %v4183_v13 }
0x2e2e   :  { %v4186_v16 = vpop.xlane.xlu1 %4185  ;;  %v4194_v21 = vmax.f32 %v4190_v20, %v4191_v15 }
0x2e2f   :  { %v4192_v22 = vmax.f32 %v4174_v18, %v4186_v16  ;;  %v4189_v62 = vpop.xlane.xlu0 %4188 }
0x2e30   :  { %v4193_v1 = vmax.f32 %v4177_v41, %v4189_v62 }
0x2e32   :  { %v4195_v47 = vmax.f32 %v4192_v22, %v4193_v1 }
0x2e34   :  { %v4196_v32 = vmax.f32 %v4194_v21, %v4195_v47 }
0x2e36   :  { %v4197_v23 = vsub.f32 %v4168_v33, %v4196_v32  ;;  %v4198_v5 = vsub.f32 %v4171_v7, %v4196_v32  ;;  %v4199_v49 = vsub.f32 %v4174_v18, %v4196_v32  ;;  %v4200_v0 = vsub.f32 %v4177_v41, %v4196_v32 }
0x2e37   :  { %v4201_v57 = vsub.f32 %v4180_v58, %v4196_v32  ;;  %v4202_v27 = vsub.f32 %v4183_v13, %v4196_v32  ;;  %v4203_v30 = vsub.f32 %v4186_v16, %v4196_v32  ;;  %v4204_v52 = vsub.f32 %v4189_v62, %v4196_v32 }
0x2e38   :  { %v4205_v25 = vmul.f32 1.442695, %v4197_v23  ;;  %v4207_v24 = vmul.f32 1.442695, %v4198_v5  ;;  %v4209_v48 = vmul.f32 1.442695, %v4199_v49 }
0x2e39   :  { %v4211_v19 = vmul.f32 1.442695, %v4200_v0  ;;  %v4213_v31 = vmul.f32 1.442695, %v4201_v57  ;;  %v4215_v29 = vmul.f32 1.442695, %v4202_v27 }
0x2e3a   :  { %5540 = vpow2.f32 %v4205_v25  ;;  %v4217_v63 = vmul.f32 1.442695, %v4203_v30  ;;  %v4219_v34 = vmul.f32 1.442695, %v4204_v52 }
0x2e3b   :  { %5542 = vpow2.f32 %v4207_v24 }
0x2e3c   :  { %5544 = vpow2.f32 %v4209_v48 }
0x2e3d   :  { %5546 = vpow2.f32 %v4211_v19 }
0x2e3e   :  { %5548 = vpow2.f32 %v4213_v31 }
0x2e3f   :  { %5550 = vpow2.f32 %v4215_v29 }
0x2e40   :  { %5552 = vpow2.f32 %v4217_v63 }
0x2e41   :  { %5554 = vpow2.f32 %v4219_v34 }
0x2e44   :  { %v5541_v36 = vpop.eup %5540 }
0x2e45   :  { %v5543_v38 = vpop.eup %5542 }
0x2e46   :  { %v4221_v50 = vadd.f32 %v5543_v38, %v5541_v36  ;;  %v5545_v4 = vpop.eup %5544 }
0x2e47   :  { %v5547_v26 = vpop.eup %5546 }
0x2e48   :  { %v4222_v37 = vadd.f32 %v5545_v4, %v4221_v50  ;;  %v5549_v55 = vpop.eup %5548 }
0x2e49   :  { %v5551_v46 = vpop.eup %5550 }
0x2e4a   :  { %v4223_v40 = vadd.f32 %v5547_v26, %v4222_v37  ;;  %v5553_v53 = vpop.eup %5552 }
0x2e4b   :  { %v5555_v56 = vpop.eup %5554 }
0x2e4c   :  { %v4224_v14 = vadd.f32 %v5549_v55, %v4223_v40 }
0x2e4e   :  { %v4225_v51 = vadd.f32 %v5551_v46, %v4224_v14 }
0x2e50   :  { %v4226_v54 = vadd.f32 %v5553_v53, %v4225_v51 }
0x2e52   :  { %v4227_v61 = vadd.f32 %v5555_v56, %v4226_v54 }
0x2e54   :  { %5556 = vrcp.f32 %v4227_v61 }
0x2e5e   :  { %v5557_v28 = vpop.eup %5556 }
0x2e5f   :  { %v4236_v43 = vmul.f32 %v5557_v28, %v5555_v56  ;;  %v4229_v35 = vmul.f32 %v5557_v28, %v5541_v36  ;;  %v4230_v8 = vmul.f32 %v5557_v28, %v5543_v38  ;;  %v4231_v3 = vmul.f32 %v5557_v28, %v5545_v4 }
0x2e60   :  { %v4232_v10 = vmul.f32 %v5557_v28, %v5547_v26  ;;  %v4233_v9 = vmul.f32 %v5557_v28, %v5549_v55  ;;  %v4234_v59 = vmul.f32 %v5557_v28, %v5551_v46  ;;  %v4235_v2 = vmul.f32 %v5557_v28, %v5553_v53 }
0x2e61   :  { %4245 = vst.msk [vmem:[%s6850_s15 + $0x38] sm:$0xff] %vm4237_vm5, %v4236_v43  ;;  %4238 = vst.msk [vmem:[%s6850_s15] sm:$0xff] %vm4237_vm5, %v4229_v35  ;;  %v4246_v6 = vmul.f32 %v4229_v35, %v6691_v44  ;;  %v4247_v33 = vmul.f32 %v4230_v8, %v6696_v60  ;;  %v4248_v41 = vmul.f32 %v4231_v3, %v6702_v42 }
0x2e62   :  { %4239 = vst.msk [vmem:[%s6850_s15 + $0x8] sm:$0xff] %vm4237_vm5, %v4230_v8  ;;  %4240 = vst.msk [vmem:[%s6850_s15 + $0x10] sm:$0xff] %vm4237_vm5, %v4231_v3  ;;  %v4249_v44 = vmul.f32 %v4232_v10, %v6707_v39  ;;  %v4250_v18 = vmul.f32 %v4233_v9, %v6714_v17  ;;  %v4251_v15 = vmul.f32 %v4234_v59, %v6718_v45  ;;  %v4441_v45 = vld [vmem:[%s6848_s13] ss:$0 sm:$0xff] }
0x2e63   :  { %4241 = vst.msk [vmem:[%s6850_s15 + $0x18] sm:$0xff] %vm4237_vm5, %v4232_v10  ;;  %4242 = vst.msk [vmem:[%s6850_s15 + $0x20] sm:$0xff] %vm4237_vm5, %v4233_v9  ;;  %v4254_v60 = vsel %vm2115_vm4, %v4246_v6, 0.0  ;;  %v4255_v42 = vsel %vm2115_vm4, %v4247_v33, 0.0  ;;  %v4257_v58 = vsel %vm2115_vm4, %v4248_v41, 0.0  ;;  %v4252_v62 = vmul.f32 %v4235_v2, %v6722_v12 }
0x2e64   :  { %4243 = vst.msk [vmem:[%s6850_s15 + $0x28] sm:$0xff] %vm4237_vm5, %v4234_v59  ;;  %4244 = vst.msk [vmem:[%s6850_s15 + $0x30] sm:$0xff] %vm4237_vm5, %v4235_v2  ;;  %v4256_v7 = vadd.f32 %v4255_v42, %v4254_v60  ;;  %v4259_v16 = vsel %vm2115_vm4, %v4249_v44, 0.0  ;;  %v4261_v20 = vsel %vm2115_vm4, %v4250_v18, 0.0  ;;  %v4253_v1 = vmul.f32 %v4236_v43, %v6726_v11 }
0x2e65   :  { %v4263_v21 = vsel %vm2115_vm4, %v4251_v15, 0.0  ;;  %v4265_v17 = vsel %vm2115_vm4, %v4252_v62, 0.0 }
0x2e66   :  { %v4258_v13 = vadd.f32 %v4257_v58, %v4256_v7  ;;  %v4267_v23 = vsel %vm2115_vm4, %v4253_v1, 0.0 }
0x2e68   :  { %v4260_v22 = vadd.f32 %v4259_v16, %v4258_v13 }
0x2e6a   :  { %v4262_v39 = vadd.f32 %v4261_v20, %v4260_v22 }
0x2e6c   :  { %v4264_v47 = vadd.f32 %v4263_v21, %v4262_v39 }
0x2e6e   :  { %v4266_v32 = vadd.f32 %v4265_v17, %v4264_v47 }
0x2e70   :  { %v4268_v5 = vadd.f32 %v4267_v23, %v4266_v32 }
0x2e72   :  { %5025 = vmatmul.mubr.msk.f32.vlgmr.msra.gmra.mrb[56].mxu0 %vm2115_vm4, %v4268_v5 }
0x2f45   :  { %v4353_v12 = vpop.f32.mrb[56].mxu0 }
0x2f46   :  { %v4354_v49 = vadd.f32 %v4441_v45, %v4353_v12  ;;  %v5026_v11 = vpop.f32.mrb[57].mxu0 }
0x2f48   :  { %4357 = vst [vmem:[#allocation16] sm:$0xff] %v4354_v49 }
0x2f49   :  { %5723 = shalt.err (!%p5720_p4)
}
0x2f4a   :  { %s6853_s26 = sld [smem:[#allocation22_spill]] }
0x2f50   :  { %s5724_s7 = scalar_lea.hbm %s6853_s26, 128 }
0x2f51   :  { %p5725_p5 = scmp.ne.s32.totalorder %s6853_s26, %s5724_s7  ;;  %p5728_p6 = scmp.lt.u32.totalorder %s5724_s7, %s6853_s26 }
0x2f53   :  { %p5730_p7 = pnand %p5728_p6, %p5725_p5 }
0x2f55   :  { %5733 = shalt.err (!%p5730_p7)
}
0x2f56   :  { %4367 = dma.vmem_to_hbm [thread:$0]  %s4365_s19, 128, %s6853_s26, [#allocation6]  }
0x2f57   :  { %5742 = dma.done.wait [#allocation6], 128  }
0x2f58   :  { %5743 = vsyncadd [#allocation6], 4294967168 }
0x2f59   :  { %4375 = vsyncpa [#allocation5], 1 }
0x2f5a   :  { %4376 = vsyncpa [#allocation8], 1 }
0x2f5b   :  { %4377 = vsyncpa [#allocation11], 1 }
0x2f5c   :  { %4378 = vsyncpa [#allocation14], 1 }
0x2f5d   :  { %4379 = vsyncpa [#allocation6], 1 }

</bundles_post_ra>
